<compile_context>
chip_gen: v7x
topology: tpu7x:2x2x1
jax: 0.10.0
libtpu: 0.0.40
codegen_flags: <defaults>
</compile_context>

<pallas_src>
import functools

import jax
import jax.numpy as jnp
from jax.experimental import pallas as pl
from jax.experimental.pallas import tpu as pltpu

_LN_EPS = 1e-5  # torch.nn.LayerNorm default


def _cdiv(a, b):
    return (a + b - 1) // b


def _round_up(a, b):
    return _cdiv(a, b) * b


def _gelu(x):
    return jax.nn.gelu(x, approximate=True)


# ---------------------------------------------------------------------------
# Fused kernel.  Grid = (B, pass, token_tile).
#   pass 0: LayerNorm -> (C,C) Linear -> GELU; local half -> VMEM scratch,
#           global half pooled with policy weights (MXU dot) into gsum/psum.
#   pass 1: hoisted global projection, then Linear->GELU->Linear->GELU->Linear
#           ->LogSoftmax on each token tile read back from the VMEM scratch.
# ---------------------------------------------------------------------------
def _predictor_kernel(tile_n, half,
                      x_ref, pol_ref,
                      lng_ref, lnb_ref, w1_ref, b1_ref,
                      w2t_ref, w2b_ref, b2_ref, w3_ref, b3_ref,
                      w4_ref, b4_ref,
                      out_ref,
                      yloc_scr, gsum_scr, psum_scr, gproj_scr):
    p = pl.program_id(1)
    i = pl.program_id(2)
    row0 = pl.multiple_of(i * tile_n, 128)

    # ------------------------------ pass 0 ---------------------------------
    @pl.when(p == 0)
    def _pass0():
        x = x_ref[...].astype(jnp.float32)                       # (tile_n, C)
        mean = jnp.mean(x, axis=-1, keepdims=True)
        xc = x - mean
        var = jnp.mean(xc * xc, axis=-1, keepdims=True)
        xn = xc * jax.lax.rsqrt(var + _LN_EPS) * lng_ref[...] + lnb_ref[...]

        # Single full-width bf16 MXU pass for the in_conv Linear.
        y = jnp.dot(xn.astype(jnp.bfloat16), w1_ref[...],
                    preferred_element_type=jnp.float32) + b1_ref[...]
        y = _gelu(y)                                             # (tile_n, C) f32

        y_loc = y[:, :half]                                      # (tile_n, half)
        y_glb = y[:, half:]                                      # (tile_n, half)

        # Local half -> persistent VMEM scratch (bf16: pass-1 matmul operand).
        yloc_scr[pl.ds(row0, tile_n), :] = y_loc.astype(jnp.bfloat16)

        # Policy-weighted global pool; policy is lane-dense (1, tile_n), so the
        # token-axis reduction becomes a (1,tile_n)x(tile_n,half) MXU dot.
        pol = pol_ref[...].astype(jnp.float32)                   # (1, tile_n)

        @pl.when(i == 0)
        def _():
            gsum_scr[...] = jnp.zeros_like(gsum_scr)
            psum_scr[...] = jnp.zeros_like(psum_scr)

        gsum_scr[...] += jnp.dot(pol, y_glb,
                                 preferred_element_type=jnp.float32)
        psum_scr[...] += jnp.sum(pol, axis=-1, keepdims=True)

    # ------------------------------ pass 1 ---------------------------------
    @pl.when(p == 1)
    def _pass1():
        @pl.when(i == 0)
        def _():
            # Hoisted once per batch: (gsum/psum) @ W2_bottom + b2.
            # No zero-policy guard, matching the PyTorch reference semantics.
            g = (gsum_scr[...] / psum_scr[...]).astype(jnp.bfloat16)
            gproj_scr[...] = (
                jnp.dot(g, w2b_ref[...], preferred_element_type=jnp.float32)
                + b2_ref[...])

        y_loc = yloc_scr[pl.ds(row0, tile_n), :]                 # (tile_n, half) bf16
        h = _gelu(jnp.dot(y_loc, w2t_ref[...],
                          preferred_element_type=jnp.float32) + gproj_scr[...])
        h = _gelu(jnp.dot(h.astype(jnp.bfloat16), w3_ref[...],
                          preferred_element_type=jnp.float32) + b3_ref[...])
        logits = jnp.dot(h.astype(jnp.bfloat16), w4_ref[...],
                         preferred_element_type=jnp.float32) + b4_ref[...]

        # log_softmax over the 2 classes (f32).
        m = jnp.max(logits, axis=-1, keepdims=True)
        z = logits - m
        lse = jnp.log(jnp.sum(jnp.exp(z), axis=-1, keepdims=True))
        out_ref[...] = (z - lse).astype(out_ref.dtype)


# ---------------------------------------------------------------------------
# Wrapper
# ---------------------------------------------------------------------------
def predictor_lg_pallas(x, policy, params, *, tile_tokens=1024):
    """Pallas implementation of PredictorLG.forward(x, policy).

    x:      (B, N, C) tokens, C == embed_dim, C % 4 == 0
    policy: (B, N, 1) keep-mask / weights
    params: ln_g, ln_b (C,); w1 (C,C), b1 (C,); w2 (C,C//2), b2 (C//2,);
            w3 (C//2,C//4), b3 (C//4,); w4 (C//4,2), b4 (2,)
            (weights in (in, out) layout, i.e. torch weight .T).
    returns (B, N, 2) log-probabilities (float32).
    """
    B, N, C = x.shape
    assert C % 4 == 0
    half, quarter = C // 2, C // 4
    f32, bf16 = jnp.float32, jnp.bfloat16

    # --- token tiling: multiple of 128, as large as allowed, minimal padding ---
    tile_req = max(128, min(_round_up(tile_tokens, 128), _round_up(N, 128)))
    nt = 1
    while _round_up(_cdiv(N, nt), 128) > tile_req:
        nt += 1
    tile_n = _round_up(_cdiv(N, nt), 128)
    n_pad = nt * tile_n
    last = nt - 1

    # --- parameter prep (weights bf16 for single-pass MXU, biases/LN f32) ---
    ln_g = params["ln_g"].astype(f32).reshape(1, C)
    ln_b = params["ln_b"].astype(f32).reshape(1, C)
    w1 = params["w1"].astype(bf16)                    # (C, C) fused local|global
    b1 = params["b1"].astype(f32).reshape(1, C)
    w2 = params["w2"].astype(bf16)
    w2t, w2b = w2[:half, :], w2[half:, :]             # local rows / global rows
    b2 = params["b2"].astype(f32).reshape(1, half)
    w3 = params["w3"].astype(bf16)
    b3 = params["b3"].astype(f32).reshape(1, quarter)
    w4 = params["w4"].astype(bf16)
    b4 = params["b4"].astype(f32).reshape(1, 2)

    # --- inputs: policy lane-dense (B,1,N); pad tokens (policy pad = 0 so the
    #     padding never pollutes the pooled global feature). ---
    pol = policy.reshape(B, 1, N)
    if n_pad != N:
        x = jnp.pad(x, ((0, 0), (0, n_pad - N), (0, 0)))
        pol = jnp.pad(pol, ((0, 0), (0, 0), (0, n_pad - N)))

    grid = (B, 2, nt)

    def _w_spec(shape):  # weights/biases: same block every step -> stay in VMEM
        return pl.BlockSpec(shape, lambda b, p, i: tuple(0 for _ in shape))

    # x / policy: tile i during pass 0; pinned to the last pass-0 block during
    # pass 1 so no re-DMA happens while out_conv runs from the VMEM scratch.
    x_spec = pl.BlockSpec((None, tile_n, C),
                          lambda b, p, i: (b, i * (1 - p) + last * p, 0))
    pol_spec = pl.BlockSpec((None, 1, tile_n),
                            lambda b, p, i: (b, 0, i * (1 - p) + last * p))
    # Output: stays on block 0 through pass 0 (resident, unwritten), advances
    # with i during pass 1 -> each block is written back exactly once.
    out_spec = pl.BlockSpec((None, tile_n, 2), lambda b, p, i: (b, i * p, 0))

    # --- explicit VMEM budget (portable to v7x's 64 MiB physical VMEM) ---
    est_blocks = 2 * (tile_n * C * 4        # x double-buffer (f32)
                      + 8 * tile_n * 4      # policy block (sublane-padded)
                      + tile_n * 128 * 4)   # out block (lane-padded to 128)
    est_weights = 2 * 2 * (C * C + 2 * half * half + half * quarter
                           + 128 * quarter + 4 * C)
    est_scratch = n_pad * max(half, 128) * 2 + 8 * 8 * 128 * 4
    vmem_limit = int(min(max(2 * (est_blocks + est_weights + est_scratch),
                             16 << 20), 48 << 20))

    kernel = functools.partial(_predictor_kernel, tile_n, half)

    out = pl.pallas_call(
        kernel,
        out_shape=jax.ShapeDtypeStruct((B, n_pad, 2), f32),
        grid_spec=pltpu.PrefetchScalarGridSpec(
            num_scalar_prefetch=0,
            grid=grid,
            in_specs=[
                x_spec, pol_spec,
                _w_spec((1, C)), _w_spec((1, C)),               # ln_g, ln_b
                _w_spec((C, C)), _w_spec((1, C)),               # w1, b1
                _w_spec((half, half)), _w_spec((half, half)),   # w2 top/bottom
                _w_spec((1, half)),                             # b2
                _w_spec((half, quarter)), _w_spec((1, quarter)),  # w3, b3
                _w_spec((quarter, 2)), _w_spec((1, 2)),         # w4, b4
            ],
            out_specs=out_spec,
            scratch_shapes=[
                pltpu.VMEM((n_pad, half), bf16),   # local half of in_conv output
                pltpu.VMEM((1, half), f32),        # sum_n policy * y_global
                pltpu.VMEM((1, 1), f32),           # sum_n policy
                pltpu.VMEM((1, half), f32),        # hoisted g @ W2_bot + b2
            ],
        ),
        compiler_params=pltpu.CompilerParams(
            dimension_semantics=("parallel", "arbitrary", "arbitrary"),
            vmem_limit_bytes=vmem_limit),
    )(x, pol, ln_g, ln_b, w1, b1, w2t, w2b, b2, w3, b3, w4, b4)

    return out[:, :N, :]


# ---------------------------------------------------------------------------
# Pure-JAX reference (mirrors the PyTorch forward, tanh-approx GELU, f32)
# ---------------------------------------------------------------------------
def predictor_lg_ref(x, policy, params, eps=_LN_EPS):
    x = x.astype(jnp.float32)
    mean = x.mean(-1, keepdims=True)
    var = ((x - mean) ** 2).mean(-1, keepdims=True)
    xn = (x - mean) / jnp.sqrt(var + eps) * params["ln_g"] + params["ln_b"]
    y = _gelu(xn @ params["w1"] + params["b1"])
    B, N, C = y.shape
    half = C // 2
    local_x = y[:, :, :half]
    global_x = (y[:, :, half:] * policy).sum(1, keepdims=True) / policy.sum(1, keepdims=True)
    z = jnp.concatenate([local_x, jnp.broadcast_to(global_x, (B, N, half))], axis=-1)
    h = _gelu(z @ params["w2"] + params["b2"])
    h = _gelu(h @ params["w3"] + params["b3"])
    logits = h @ params["w4"] + params["b4"]
    return jax.nn.log_softmax(logits, axis=-1)


if __name__ == "__main__":
    key = jax.random.PRNGKey(0)
    ks = jax.random.split(key, 12)

    # Small, module-consistent shapes: 2 images x 196 patch tokens, embed_dim=128.
    B, N, C = 2, 196, 128
    half, quarter = C // 2, C // 4

    def _w(k, shape, fan_in):
        return jax.random.normal(k, shape, dtype=jnp.float32) / jnp.sqrt(fan_in)

    params = {
        "ln_g": jnp.ones((C,), jnp.float32) + 0.1 * jax.random.normal(ks[0], (C,)),
        "ln_b": 0.1 * jax.random.normal(ks[1], (C,)),
        "w1": _w(ks[2], (C, C), C),              "b1": 0.1 * jax.random.normal(ks[3], (C,)),
        "w2": _w(ks[4], (C, half), C),           "b2": 0.1 * jax.random.normal(ks[5], (half,)),
        "w3": _w(ks[6], (half, quarter), half),  "b3": 0.1 * jax.random.normal(ks[7], (quarter,)),
        "w4": _w(ks[8], (quarter, 2), quarter),  "b4": 0.1 * jax.random.normal(ks[9], (2,)),
    }

    x = jax.random.normal(ks[10], (B, N, C), dtype=jnp.float32)
    policy = (jax.random.uniform(ks[11], (B, N, 1)) > 0.3).astype(jnp.float32)
    policy = policy.at[:, 0, :].set(1.0)  # guarantee at least one kept token per batch

    out = predictor_lg_pallas(x, policy, params)
    out = jax.block_until_ready(out)

    ref = predictor_lg_ref(x, policy, params)

    assert out.shape == (B, N, 2), out.shape
    assert bool(jnp.all(jnp.isfinite(out)))
    # Tolerance accounts for explicit bf16 MXU operands (sanctioned by the perf
    # review) vs. the f32 XLA reference; expected max deviation is ~1e-2.
    err = float(jnp.max(jnp.abs(out - ref)))
    assert jnp.allclose(out, ref, rtol=2e-2, atol=3e-2), err

    print("KERNEL_OK")
</pallas_src>

<mosaic_0001>
module attributes {stable_mosaic.version = 11 : i64} {
  func.func @_predictor_kernel(%arg0: i32, %arg1: i32, %arg2: i32, %arg3: memref<1x256x128xf32, #tpu.memory_space<vmem>>, %arg4: memref<1x1x256xf32, #tpu.memory_space<vmem>>, %arg5: memref<1x128xf32, #tpu.memory_space<vmem>>, %arg6: memref<1x128xf32, #tpu.memory_space<vmem>>, %arg7: memref<128x128xbf16, #tpu.memory_space<vmem>>, %arg8: memref<1x128xf32, #tpu.memory_space<vmem>>, %arg9: memref<64x64xbf16, #tpu.memory_space<vmem>>, %arg10: memref<64x64xbf16, #tpu.memory_space<vmem>>, %arg11: memref<1x64xf32, #tpu.memory_space<vmem>>, %arg12: memref<64x32xbf16, #tpu.memory_space<vmem>>, %arg13: memref<1x32xf32, #tpu.memory_space<vmem>>, %arg14: memref<32x2xbf16, #tpu.memory_space<vmem>>, %arg15: memref<1x2xf32, #tpu.memory_space<vmem>>, %arg16: memref<1x256x2xf32, #tpu.memory_space<vmem>>, %arg17: memref<256x64xbf16, #tpu.memory_space<vmem>>, %arg18: memref<1x64xf32, #tpu.memory_space<vmem>>, %arg19: memref<1x1xf32, #tpu.memory_space<vmem>>, %arg20: memref<1x64xf32, #tpu.memory_space<vmem>>) attributes {dimension_semantics = [#tpu.dimension_semantics<parallel>, #tpu.dimension_semantics<arbitrary>, #tpu.dimension_semantics<arbitrary>], iteration_bounds = array<i64: 2, 2, 1>, scalar_prefetch = 0 : i64, scratch_operands = 4 : i64, tpu.core_type = #tpu.core_type<tc>, window_params = [{transform_indices = @transform_0, window_bounds = array<i64: 1, 256, 128>}, {transform_indices = @transform_1, window_bounds = array<i64: 1, 1, 256>}, {pipeline_mode = #tpu.pipeline_mode<synchronous>, transform_indices = @transform_2, window_bounds = array<i64: 1, 128>}, {pipeline_mode = #tpu.pipeline_mode<synchronous>, transform_indices = @transform_3, window_bounds = array<i64: 1, 128>}, {pipeline_mode = #tpu.pipeline_mode<synchronous>, transform_indices = @transform_4, window_bounds = array<i64: 128, 128>}, {pipeline_mode = #tpu.pipeline_mode<synchronous>, transform_indices = @transform_5, window_bounds = array<i64: 1, 128>}, {pipeline_mode = #tpu.pipeline_mode<synchronous>, transform_indices = @transform_6, window_bounds = array<i64: 64, 64>}, {pipeline_mode = #tpu.pipeline_mode<synchronous>, transform_indices = @transform_7, window_bounds = array<i64: 64, 64>}, {pipeline_mode = #tpu.pipeline_mode<synchronous>, transform_indices = @transform_8, window_bounds = array<i64: 1, 64>}, {pipeline_mode = #tpu.pipeline_mode<synchronous>, transform_indices = @transform_9, window_bounds = array<i64: 64, 32>}, {pipeline_mode = #tpu.pipeline_mode<synchronous>, transform_indices = @transform_10, window_bounds = array<i64: 1, 32>}, {pipeline_mode = #tpu.pipeline_mode<synchronous>, transform_indices = @transform_11, window_bounds = array<i64: 32, 2>}, {pipeline_mode = #tpu.pipeline_mode<synchronous>, transform_indices = @transform_12, window_bounds = array<i64: 1, 2>}, {transform_indices = @transform_13, window_bounds = array<i64: 1, 256, 2>}]} {
    %c256_i32 = arith.constant 256 : i32
    %0 = arith.muli %arg2, %c256_i32 : i32
    %1 = tpu.assume_multiple %0, 128 : i32
    %c0_i32 = arith.constant 0 : i32
    %2 = arith.cmpi eq, %arg1, %c0_i32 : i32
    %3 = arith.extui %2 : i1 to i32
    %c0_i32_0 = arith.constant 0 : i32
    %4 = arith.cmpi ne, %3, %c0_i32_0 : i32
    scf.if %4 {
      %c0 = arith.constant 0 : index
      %c0_2 = arith.constant 0 : index
      %c0_3 = arith.constant 0 : index
      %8 = vector.load %arg3[%c0, %c0_2, %c0_3] : memref<1x256x128xf32, #tpu.memory_space<vmem>>, vector<1x256x128xf32>
      %9 = vector.shape_cast %8 : vector<1x256x128xf32> to vector<256x128xf32>
      %cst = arith.constant dense<0.000000e+00> : vector<256xf32>
      %10 = vector.multi_reduction <add>, %9, %cst [1] : vector<256x128xf32> to vector<256xf32>
      %11 = vector.shape_cast %10 : vector<256xf32> to vector<256x1xf32>
      %cst_4 = arith.constant 1.280000e+02 : f32
      %12 = vector.broadcast %cst_4 : f32 to vector<256x1xf32>
      %13 = arith.divf %11, %12 : vector<256x1xf32>
      %14 = vector.broadcast %13 : vector<256x1xf32> to vector<256x128xf32>
      %15 = arith.subf %9, %14 : vector<256x128xf32>
      %16 = arith.mulf %15, %15 : vector<256x128xf32>
      %cst_5 = arith.constant dense<0.000000e+00> : vector<256xf32>
      %17 = vector.multi_reduction <add>, %16, %cst_5 [1] : vector<256x128xf32> to vector<256xf32>
      %18 = vector.shape_cast %17 : vector<256xf32> to vector<256x1xf32>
      %cst_6 = arith.constant 1.280000e+02 : f32
      %19 = vector.broadcast %cst_6 : f32 to vector<256x1xf32>
      %20 = arith.divf %18, %19 : vector<256x1xf32>
      %cst_7 = arith.constant 9.99999974E-6 : f32
      %21 = vector.broadcast %cst_7 : f32 to vector<256x1xf32>
      %22 = arith.addf %20, %21 : vector<256x1xf32>
      %23 = math.rsqrt %22 : vector<256x1xf32>
      %24 = vector.broadcast %23 : vector<256x1xf32> to vector<256x128xf32>
      %25 = arith.mulf %15, %24 : vector<256x128xf32>
      %c0_8 = arith.constant 0 : index
      %c0_9 = arith.constant 0 : index
      %26 = vector.load %arg5[%c0_8, %c0_9] : memref<1x128xf32, #tpu.memory_space<vmem>>, vector<1x128xf32>
      %27 = vector.broadcast %26 : vector<1x128xf32> to vector<256x128xf32>
      %28 = arith.mulf %25, %27 : vector<256x128xf32>
      %c0_10 = arith.constant 0 : index
      %c0_11 = arith.constant 0 : index
      %29 = vector.load %arg6[%c0_10, %c0_11] : memref<1x128xf32, #tpu.memory_space<vmem>>, vector<1x128xf32>
      %30 = vector.broadcast %29 : vector<1x128xf32> to vector<256x128xf32>
      %31 = arith.addf %28, %30 : vector<256x128xf32>
      %32 = arith.truncf %31 : vector<256x128xf32> to vector<256x128xbf16>
      %c0_12 = arith.constant 0 : index
      %c0_13 = arith.constant 0 : index
      %33 = vector.load %arg7[%c0_12, %c0_13] : memref<128x128xbf16, #tpu.memory_space<vmem>>, vector<128x128xbf16>
      %cst_14 = arith.constant dense<0.000000e+00> : vector<256x128xf32>
      %34 = tpu.matmul %32, %33, %cst_14 {dimension_numbers = #tpu.dot_dimension_numbers<[1], [0], [0], [1], [0, 0, 1, 1], [], []>} : vector<256x128xbf16>, vector<128x128xbf16>, vector<256x128xf32> -> vector<256x128xf32>
      %c0_15 = arith.constant 0 : index
      %c0_16 = arith.constant 0 : index
      %35 = vector.load %arg8[%c0_15, %c0_16] : memref<1x128xf32, #tpu.memory_space<vmem>>, vector<1x128xf32>
      %36 = vector.broadcast %35 : vector<1x128xf32> to vector<256x128xf32>
      %37 = arith.addf %34, %36 : vector<256x128xf32>
      %38 = arith.mulf %37, %37 : vector<256x128xf32>
      %39 = arith.mulf %37, %38 : vector<256x128xf32>
      %cst_17 = arith.constant 4.471500e-02 : f32
      %40 = vector.broadcast %cst_17 : f32 to vector<256x128xf32>
      %41 = arith.mulf %40, %39 : vector<256x128xf32>
      %42 = arith.addf %37, %41 : vector<256x128xf32>
      %cst_18 = arith.constant 0.797884583 : f32
      %43 = vector.broadcast %cst_18 : f32 to vector<256x128xf32>
      %44 = arith.mulf %43, %42 : vector<256x128xf32>
      %45 = math.tanh %44 : vector<256x128xf32>
      %cst_19 = arith.constant 1.000000e+00 : f32
      %46 = vector.broadcast %cst_19 : f32 to vector<256x128xf32>
      %47 = arith.addf %46, %45 : vector<256x128xf32>
      %cst_20 = arith.constant 5.000000e-01 : f32
      %48 = vector.broadcast %cst_20 : f32 to vector<256x128xf32>
      %49 = arith.mulf %48, %47 : vector<256x128xf32>
      %50 = arith.mulf %37, %49 : vector<256x128xf32>
      %51 = vector.extract_strided_slice %50 {offsets = [0, 0], sizes = [256, 64], strides = [1, 1]} : vector<256x128xf32> to vector<256x64xf32>
      %52 = vector.extract_strided_slice %50 {offsets = [0, 64], sizes = [256, 64], strides = [1, 1]} : vector<256x128xf32> to vector<256x64xf32>
      %53 = arith.truncf %51 : vector<256x64xf32> to vector<256x64xbf16>
      %54 = arith.index_cast %1 : i32 to index
      %c0_21 = arith.constant 0 : index
      %55 = vector.load %arg17[%54, %c0_21] : memref<256x64xbf16, #tpu.memory_space<vmem>>, vector<256x64xbf16>
      tpu.vector_store %arg17[%54, %c0_21], %53 {strides = array<i32>} : memref<256x64xbf16, #tpu.memory_space<vmem>>, vector<256x64xbf16>,
      %c0_22 = arith.constant 0 : index
      %c0_23 = arith.constant 0 : index
      %c0_24 = arith.constant 0 : index
      %56 = vector.load %arg4[%c0_22, %c0_23, %c0_24] : memref<1x1x256xf32, #tpu.memory_space<vmem>>, vector<1x1x256xf32>
      %57 = vector.shape_cast %56 : vector<1x1x256xf32> to vector<1x256xf32>
      %c0_i32_25 = arith.constant 0 : i32
      %58 = arith.cmpi eq, %arg2, %c0_i32_25 : i32
      %59 = arith.extui %58 : i1 to i32
      %c0_i32_26 = arith.constant 0 : i32
      %60 = arith.cmpi ne, %59, %c0_i32_26 : i32
      scf.if %60 {
        %cst_37 = arith.constant 0.000000e+00 : f32
        %70 = vector.broadcast %cst_37 : f32 to vector<1x64xf32>
        %c0_38 = arith.constant 0 : index
        %c0_39 = arith.constant 0 : index
        %71 = vector.load %arg18[%c0_38, %c0_39] : memref<1x64xf32, #tpu.memory_space<vmem>>, vector<1x64xf32>
        tpu.vector_store %arg18[%c0_38, %c0_39], %70 {strides = array<i32>} : memref<1x64xf32, #tpu.memory_space<vmem>>, vector<1x64xf32>,
        %cst_40 = arith.constant 0.000000e+00 : f32
        %72 = vector.broadcast %cst_40 : f32 to vector<1x1xf32>
        %c0_41 = arith.constant 0 : index
        %c0_42 = arith.constant 0 : index
        %73 = vector.load %arg19[%c0_41, %c0_42] : memref<1x1xf32, #tpu.memory_space<vmem>>, vector<1x1xf32>
        tpu.vector_store %arg19[%c0_41, %c0_42], %72 {strides = array<i32>} : memref<1x1xf32, #tpu.memory_space<vmem>>, vector<1x1xf32>,
      } else {
      }
      %c0_27 = arith.constant 0 : index
      %c0_28 = arith.constant 0 : index
      %61 = vector.load %arg18[%c0_27, %c0_28] : memref<1x64xf32, #tpu.memory_space<vmem>>, vector<1x64xf32>
      %cst_29 = arith.constant dense<0.000000e+00> : vector<1x64xf32>
      %62 = tpu.matmul %57, %52, %cst_29 {dimension_numbers = #tpu.dot_dimension_numbers<[1], [0], [0], [1], [0, 0, 1, 1], [], []>} : vector<1x256xf32>, vector<256x64xf32>, vector<1x64xf32> -> vector<1x64xf32>
      %63 = arith.addf %61, %62 : vector<1x64xf32>
      %c0_30 = arith.constant 0 : index
      %c0_31 = arith.constant 0 : index
      %64 = vector.load %arg18[%c0_30, %c0_31] : memref<1x64xf32, #tpu.memory_space<vmem>>, vector<1x64xf32>
      tpu.vector_store %arg18[%c0_30, %c0_31], %63 {strides = array<i32>} : memref<1x64xf32, #tpu.memory_space<vmem>>, vector<1x64xf32>,
      %c0_32 = arith.constant 0 : index
      %c0_33 = arith.constant 0 : index
      %65 = vector.load %arg19[%c0_32, %c0_33] : memref<1x1xf32, #tpu.memory_space<vmem>>, vector<1x1xf32>
      %cst_34 = arith.constant dense<0.000000e+00> : vector<1xf32>
      %66 = vector.multi_reduction <add>, %57, %cst_34 [1] : vector<1x256xf32> to vector<1xf32>
      %67 = vector.shape_cast %66 : vector<1xf32> to vector<1x1xf32>
      %68 = arith.addf %65, %67 : vector<1x1xf32>
      %c0_35 = arith.constant 0 : index
      %c0_36 = arith.constant 0 : index
      %69 = vector.load %arg19[%c0_35, %c0_36] : memref<1x1xf32, #tpu.memory_space<vmem>>, vector<1x1xf32>
      tpu.vector_store %arg19[%c0_35, %c0_36], %68 {strides = array<i32>} : memref<1x1xf32, #tpu.memory_space<vmem>>, vector<1x1xf32>,
    } else {
    }
    %c1_i32 = arith.constant 1 : i32
    %5 = arith.cmpi eq, %arg1, %c1_i32 : i32
    %6 = arith.extui %5 : i1 to i32
    %c0_i32_1 = arith.constant 0 : i32
    %7 = arith.cmpi ne, %6, %c0_i32_1 : i32
    scf.if %7 {
      %c0_i32_2 = arith.constant 0 : i32
      %8 = arith.cmpi eq, %arg2, %c0_i32_2 : i32
      %9 = arith.extui %8 : i1 to i32
      %c0_i32_3 = arith.constant 0 : i32
      %10 = arith.cmpi ne, %9, %c0_i32_3 : i32
      scf.if %10 {
        %c0_31 = arith.constant 0 : index
        %c0_32 = arith.constant 0 : index
        %69 = vector.load %arg18[%c0_31, %c0_32] : memref<1x64xf32, #tpu.memory_space<vmem>>, vector<1x64xf32>
        %c0_33 = arith.constant 0 : index
        %c0_34 = arith.constant 0 : index
        %70 = vector.load %arg19[%c0_33, %c0_34] : memref<1x1xf32, #tpu.memory_space<vmem>>, vector<1x1xf32>
        %71 = vector.broadcast %70 : vector<1x1xf32> to vector<1x64xf32>
        %72 = arith.divf %69, %71 : vector<1x64xf32>
        %73 = arith.truncf %72 : vector<1x64xf32> to vector<1x64xbf16>
        %c0_35 = arith.constant 0 : index
        %c0_36 = arith.constant 0 : index
        %74 = vector.load %arg10[%c0_35, %c0_36] : memref<64x64xbf16, #tpu.memory_space<vmem>>, vector<64x64xbf16>
        %cst_37 = arith.constant dense<0.000000e+00> : vector<1x64xf32>
        %75 = tpu.matmul %73, %74, %cst_37 {dimension_numbers = #tpu.dot_dimension_numbers<[1], [0], [0], [1], [0, 0, 1, 1], [], []>} : vector<1x64xbf16>, vector<64x64xbf16>, vector<1x64xf32> -> vector<1x64xf32>
        %c0_38 = arith.constant 0 : index
        %c0_39 = arith.constant 0 : index
        %76 = vector.load %arg11[%c0_38, %c0_39] : memref<1x64xf32, #tpu.memory_space<vmem>>, vector<1x64xf32>
        %77 = arith.addf %75, %76 : vector<1x64xf32>
        %c0_40 = arith.constant 0 : index
        %c0_41 = arith.constant 0 : index
        %78 = vector.load %arg20[%c0_40, %c0_41] : memref<1x64xf32, #tpu.memory_space<vmem>>, vector<1x64xf32>
        tpu.vector_store %arg20[%c0_40, %c0_41], %77 {strides = array<i32>} : memref<1x64xf32, #tpu.memory_space<vmem>>, vector<1x64xf32>,
      } else {
      }
      %11 = arith.index_cast %1 : i32 to index
      %c0 = arith.constant 0 : index
      %12 = vector.load %arg17[%11, %c0] : memref<256x64xbf16, #tpu.memory_space<vmem>>, vector<256x64xbf16>
      %c0_4 = arith.constant 0 : index
      %c0_5 = arith.constant 0 : index
      %13 = vector.load %arg9[%c0_4, %c0_5] : memref<64x64xbf16, #tpu.memory_space<vmem>>, vector<64x64xbf16>
      %cst = arith.constant dense<0.000000e+00> : vector<256x64xf32>
      %14 = tpu.matmul %12, %13, %cst {dimension_numbers = #tpu.dot_dimension_numbers<[1], [0], [0], [1], [0, 0, 1, 1], [], []>} : vector<256x64xbf16>, vector<64x64xbf16>, vector<256x64xf32> -> vector<256x64xf32>
      %c0_6 = arith.constant 0 : index
      %c0_7 = arith.constant 0 : index
      %15 = vector.load %arg20[%c0_6, %c0_7] : memref<1x64xf32, #tpu.memory_space<vmem>>, vector<1x64xf32>
      %16 = vector.broadcast %15 : vector<1x64xf32> to vector<256x64xf32>
      %17 = arith.addf %14, %16 : vector<256x64xf32>
      %18 = arith.mulf %17, %17 : vector<256x64xf32>
      %19 = arith.mulf %17, %18 : vector<256x64xf32>
      %cst_8 = arith.constant 4.471500e-02 : f32
      %20 = vector.broadcast %cst_8 : f32 to vector<256x64xf32>
      %21 = arith.mulf %20, %19 : vector<256x64xf32>
      %22 = arith.addf %17, %21 : vector<256x64xf32>
      %cst_9 = arith.constant 0.797884583 : f32
      %23 = vector.broadcast %cst_9 : f32 to vector<256x64xf32>
      %24 = arith.mulf %23, %22 : vector<256x64xf32>
      %25 = math.tanh %24 : vector<256x64xf32>
      %cst_10 = arith.constant 1.000000e+00 : f32
      %26 = vector.broadcast %cst_10 : f32 to vector<256x64xf32>
      %27 = arith.addf %26, %25 : vector<256x64xf32>
      %cst_11 = arith.constant 5.000000e-01 : f32
      %28 = vector.broadcast %cst_11 : f32 to vector<256x64xf32>
      %29 = arith.mulf %28, %27 : vector<256x64xf32>
      %30 = arith.mulf %17, %29 : vector<256x64xf32>
      %31 = arith.truncf %30 : vector<256x64xf32> to vector<256x64xbf16>
      %c0_12 = arith.constant 0 : index
      %c0_13 = arith.constant 0 : index
      %32 = vector.load %arg12[%c0_12, %c0_13] : memref<64x32xbf16, #tpu.memory_space<vmem>>, vector<64x32xbf16>
      %cst_14 = arith.constant dense<0.000000e+00> : vector<256x32xf32>
      %33 = tpu.matmul %31, %32, %cst_14 {dimension_numbers = #tpu.dot_dimension_numbers<[1], [0], [0], [1], [0, 0, 1, 1], [], []>} : vector<256x64xbf16>, vector<64x32xbf16>, vector<256x32xf32> -> vector<256x32xf32>
      %c0_15 = arith.constant 0 : index
      %c0_16 = arith.constant 0 : index
      %34 = vector.load %arg13[%c0_15, %c0_16] : memref<1x32xf32, #tpu.memory_space<vmem>>, vector<1x32xf32>
      %35 = vector.broadcast %34 : vector<1x32xf32> to vector<256x32xf32>
      %36 = arith.addf %33, %35 : vector<256x32xf32>
      %37 = arith.mulf %36, %36 : vector<256x32xf32>
      %38 = arith.mulf %36, %37 : vector<256x32xf32>
      %cst_17 = arith.constant 4.471500e-02 : f32
      %39 = vector.broadcast %cst_17 : f32 to vector<256x32xf32>
      %40 = arith.mulf %39, %38 : vector<256x32xf32>
      %41 = arith.addf %36, %40 : vector<256x32xf32>
      %cst_18 = arith.constant 0.797884583 : f32
      %42 = vector.broadcast %cst_18 : f32 to vector<256x32xf32>
      %43 = arith.mulf %42, %41 : vector<256x32xf32>
      %44 = math.tanh %43 : vector<256x32xf32>
      %cst_19 = arith.constant 1.000000e+00 : f32
      %45 = vector.broadcast %cst_19 : f32 to vector<256x32xf32>
      %46 = arith.addf %45, %44 : vector<256x32xf32>
      %cst_20 = arith.constant 5.000000e-01 : f32
      %47 = vector.broadcast %cst_20 : f32 to vector<256x32xf32>
      %48 = arith.mulf %47, %46 : vector<256x32xf32>
      %49 = arith.mulf %36, %48 : vector<256x32xf32>
      %50 = arith.truncf %49 : vector<256x32xf32> to vector<256x32xbf16>
      %c0_21 = arith.constant 0 : index
      %c0_22 = arith.constant 0 : index
      %51 = vector.load %arg14[%c0_21, %c0_22] : memref<32x2xbf16, #tpu.memory_space<vmem>>, vector<32x2xbf16>
      %cst_23 = arith.constant dense<0.000000e+00> : vector<256x2xf32>
      %52 = tpu.matmul %50, %51, %cst_23 {dimension_numbers = #tpu.dot_dimension_numbers<[1], [0], [0], [1], [0, 0, 1, 1], [], []>} : vector<256x32xbf16>, vector<32x2xbf16>, vector<256x2xf32> -> vector<256x2xf32>
      %c0_24 = arith.constant 0 : index
      %c0_25 = arith.constant 0 : index
      %53 = vector.load %arg15[%c0_24, %c0_25] : memref<1x2xf32, #tpu.memory_space<vmem>>, vector<1x2xf32>
      %54 = vector.broadcast %53 : vector<1x2xf32> to vector<256x2xf32>
      %55 = arith.addf %52, %54 : vector<256x2xf32>
      %cst_26 = arith.constant dense<0xFF800000> : vector<256xf32>
      %56 = vector.multi_reduction <maximumf>, %55, %cst_26 [1] : vector<256x2xf32> to vector<256xf32>
      %57 = vector.shape_cast %56 : vector<256xf32> to vector<256x1xf32>
      %58 = vector.broadcast %57 : vector<256x1xf32> to vector<256x2xf32>
      %59 = arith.subf %55, %58 : vector<256x2xf32>
      %60 = math.exp %59 : vector<256x2xf32>
      %cst_27 = arith.constant dense<0.000000e+00> : vector<256xf32>
      %61 = vector.multi_reduction <add>, %60, %cst_27 [1] : vector<256x2xf32> to vector<256xf32>
      %62 = vector.shape_cast %61 : vector<256xf32> to vector<256x1xf32>
      %63 = math.log %62 : vector<256x1xf32>
      %64 = vector.broadcast %63 : vector<256x1xf32> to vector<256x2xf32>
      %65 = arith.subf %59, %64 : vector<256x2xf32>
      %c0_28 = arith.constant 0 : index
      %c0_29 = arith.constant 0 : index
      %c0_30 = arith.constant 0 : index
      %66 = vector.load %arg16[%c0_28, %c0_29, %c0_30] : memref<1x256x2xf32, #tpu.memory_space<vmem>>, vector<1x256x2xf32>
      %67 = vector.shape_cast %66 : vector<1x256x2xf32> to vector<256x2xf32>
      %68 = vector.shape_cast %65 : vector<256x2xf32> to vector<1x256x2xf32>
      tpu.vector_store %arg16[%c0_28, %c0_29, %c0_30], %68 {strides = array<i32>} : memref<1x256x2xf32, #tpu.memory_space<vmem>>, vector<1x256x2xf32>,
    } else {
    }
    return
  }
  func.func @transform_0(%arg0: i32, %arg1: i32, %arg2: i32) -> (i32, i32, i32) {
    %c1_i32 = arith.constant 1 : i32
    %0 = arith.subi %c1_i32, %arg1 : i32
    %1 = arith.muli %arg2, %0 : i32
    %c0_i32 = arith.constant 0 : i32
    %2 = arith.muli %c0_i32, %arg1 : i32
    %3 = arith.addi %1, %2 : i32
    %c0_i32_0 = arith.constant 0 : i32
    %c0_i32_1 = arith.constant 0 : i32
    return %arg0, %3, %c0_i32_0 : i32, i32, i32
  }
  func.func @transform_1(%arg0: i32, %arg1: i32, %arg2: i32) -> (i32, i32, i32) {
    %c1_i32 = arith.constant 1 : i32
    %0 = arith.subi %c1_i32, %arg1 : i32
    %1 = arith.muli %arg2, %0 : i32
    %c0_i32 = arith.constant 0 : i32
    %2 = arith.muli %c0_i32, %arg1 : i32
    %3 = arith.addi %1, %2 : i32
    %c0_i32_0 = arith.constant 0 : i32
    %c0_i32_1 = arith.constant 0 : i32
    return %arg0, %c0_i32_0, %3 : i32, i32, i32
  }
  func.func @transform_2(%arg0: i32, %arg1: i32, %arg2: i32) -> (i32, i32) {
    %c0_i32 = arith.constant 0 : i32
    %c0_i32_0 = arith.constant 0 : i32
    %c0_i32_1 = arith.constant 0 : i32
    return %c0_i32, %c0_i32_0 : i32, i32
  }
  func.func @transform_3(%arg0: i32, %arg1: i32, %arg2: i32) -> (i32, i32) {
    %c0_i32 = arith.constant 0 : i32
    %c0_i32_0 = arith.constant 0 : i32
    %c0_i32_1 = arith.constant 0 : i32
    return %c0_i32, %c0_i32_0 : i32, i32
  }
  func.func @transform_4(%arg0: i32, %arg1: i32, %arg2: i32) -> (i32, i32) {
    %c0_i32 = arith.constant 0 : i32
    %c0_i32_0 = arith.constant 0 : i32
    %c0_i32_1 = arith.constant 0 : i32
    return %c0_i32, %c0_i32_0 : i32, i32
  }
  func.func @transform_5(%arg0: i32, %arg1: i32, %arg2: i32) -> (i32, i32) {
    %c0_i32 = arith.constant 0 : i32
    %c0_i32_0 = arith.constant 0 : i32
    %c0_i32_1 = arith.constant 0 : i32
    return %c0_i32, %c0_i32_0 : i32, i32
  }
  func.func @transform_6(%arg0: i32, %arg1: i32, %arg2: i32) -> (i32, i32) {
    %c0_i32 = arith.constant 0 : i32
    %c0_i32_0 = arith.constant 0 : i32
    %c0_i32_1 = arith.constant 0 : i32
    return %c0_i32, %c0_i32_0 : i32, i32
  }
  func.func @transform_7(%arg0: i32, %arg1: i32, %arg2: i32) -> (i32, i32) {
    %c0_i32 = arith.constant 0 : i32
    %c0_i32_0 = arith.constant 0 : i32
    %c0_i32_1 = arith.constant 0 : i32
    return %c0_i32, %c0_i32_0 : i32, i32
  }
  func.func @transform_8(%arg0: i32, %arg1: i32, %arg2: i32) -> (i32, i32) {
    %c0_i32 = arith.constant 0 : i32
    %c0_i32_0 = arith.constant 0 : i32
    %c0_i32_1 = arith.constant 0 : i32
    return %c0_i32, %c0_i32_0 : i32, i32
  }
  func.func @transform_9(%arg0: i32, %arg1: i32, %arg2: i32) -> (i32, i32) {
    %c0_i32 = arith.constant 0 : i32
    %c0_i32_0 = arith.constant 0 : i32
    %c0_i32_1 = arith.constant 0 : i32
    return %c0_i32, %c0_i32_0 : i32, i32
  }
  func.func @transform_10(%arg0: i32, %arg1: i32, %arg2: i32) -> (i32, i32) {
    %c0_i32 = arith.constant 0 : i32
    %c0_i32_0 = arith.constant 0 : i32
    %c0_i32_1 = arith.constant 0 : i32
    return %c0_i32, %c0_i32_0 : i32, i32
  }
  func.func @transform_11(%arg0: i32, %arg1: i32, %arg2: i32) -> (i32, i32) {
    %c0_i32 = arith.constant 0 : i32
    %c0_i32_0 = arith.constant 0 : i32
    %c0_i32_1 = arith.constant 0 : i32
    return %c0_i32, %c0_i32_0 : i32, i32
  }
  func.func @transform_12(%arg0: i32, %arg1: i32, %arg2: i32) -> (i32, i32) {
    %c0_i32 = arith.constant 0 : i32
    %c0_i32_0 = arith.constant 0 : i32
    %c0_i32_1 = arith.constant 0 : i32
    return %c0_i32, %c0_i32_0 : i32, i32
  }
  func.func @transform_13(%arg0: i32, %arg1: i32, %arg2: i32) -> (i32, i32, i32) {
    %0 = arith.muli %arg2, %arg1 : i32
    %c0_i32 = arith.constant 0 : i32
    %c0_i32_0 = arith.constant 0 : i32
    return %arg0, %0, %c0_i32 : i32, i32, i32
  }
}

</mosaic_0001>

<bundles_post_ra>
// kernel: tpu_custom_call.1
= control target key start
LH: loop header
LB: loop body
LE: loop exit
PB: predicated region body
PF: predicated region fallthrough
CT: control target
= control target key end

     0   :  { %s7485_s0 = inlined_call_operand.hbm [shape: f32[2,256,128], index: 0, kind: input, shape index: {}]   ;;  %s7486_s1 = inlined_call_operand.hbm [shape: f32[2,1,256], index: 1, kind: input, shape index: {}]   ;;  %s7487_s2 = inlined_call_operand.vmem [shape: f32[1,128], index: 2, kind: input, shape index: {}]   ;;  %s7488_s3 = inlined_call_operand.vmem [shape: f32[1,128], index: 3, kind: input, shape index: {}]   ;;  %s7489_s4 = inlined_call_operand.vmem [shape: bf16[128,128], index: 4, kind: input, shape index: {}]   ;;  %s7490_s5 = inlined_call_operand.vmem [shape: f32[1,128], index: 5, kind: input, shape index: {}]   ;;  %s7491_s6 = inlined_call_operand.hbm [shape: bf16[64,64], index: 6, kind: input, shape index: {}]   ;;  %s7492_s7 = inlined_call_operand.hbm [shape: bf16[64,64], index: 7, kind: input, shape index: {}]   ;;  %s7493_s8 = inlined_call_operand.vmem [shape: f32[1,64], index: 8, kind: input, shape index: {}]   ;;  %s7494_s9 = inlined_call_operand.vmem [shape: bf16[64,32], index: 9, kind: input, shape index: {}]   ;;  %s7495_s10 = inlined_call_operand.vmem [shape: f32[1,32], index: 10, kind: input, shape index: {}]   ;;  %s7496_s11 = inlined_call_operand.vmem [shape: bf16[32,2], index: 11, kind: input, shape index: {}]   ;;  %s7497_s12 = inlined_call_operand.vmem [shape: f32[1,2], index: 12, kind: input, shape index: {}]   ;;  %s7498_s13 = inlined_call_operand.vmem [shape: f32[2,256,2], index: 13, kind: output, shape index: {}]  }
   0x1   :  { %7508 = sst [smem:[#allocation20_spill]] %s7485_s0 }
   0x2   :  { %7509 = sst [smem:[#allocation21_spill]] %s7488_s3 }
   0x3   :  { %7510 = sst [smem:[#allocation22_spill]] %s7490_s5 }
   0x4   :  { %7511 = sst [smem:[#allocation23_spill]] %s7491_s6 }
   0x5   :  { %7512 = sst [smem:[#allocation24_spill]] %s7492_s7 }
   0x6   :  { %7513 = sst [smem:[#allocation25_spill]] %s7493_s8 }
   0x7   :  { %7514 = sst [smem:[#allocation26_spill]] %s7494_s9 }
   0x8   :  { %7515 = sst [smem:[#allocation27_spill]] %s7495_s10 }
   0x9   :  { %7516 = sst [smem:[#allocation28_spill]] %s7496_s11 }
   0xa   :  { %7517 = sst [smem:[#allocation29_spill]] %s7497_s12 }
   0xb   :  { %18 = vsyncpa [#allocation7], 0 }
   0xc   :  { %20 = vsyncpa [#allocation7 + $0x1], 0 }
   0xd   :  { %21 = vsyncpa [#allocation9], 0 }
   0xe   :  { %23 = vsyncpa [#allocation9 + $0x1], 0 }
   0xf   :  { %24 = vsyncpa [#allocation12], 0  ;;  %s5223_s25 = smov 0   ;;  %s5225_s26 = smov 0  }
  0x10   :  { %s5227_s27 = smov 0   ;;  %s5229_s28 = smov 0  }
  0x11   :  { %s5231_s29 = smov 0   ;;  %s5233_s30 = smov 0  }
  0x12   :  { %s5235_s14 = smov 0   ;;  %s5237_s15 = smov 0  }
  0x13 LB: > { %7518 = sst [smem:[#allocation17_spill]] %s5130_s30  ;;  %s7499_s16 = sadd.s32 4294967295, %s5138_s15   ;;  %s5138_s15 = sphi %s5237_s15, %s30_s15   ;;  %s5134_s14 = sphi %s5235_s14, %s7549_s14   ;;  %s5130_s30 = sphi %s5233_s30, %s7543_s30   ;;  %s5126_s29 = sphi %s5231_s29, %s7548_s29   ;;  %s5122_s28 = sphi %s5229_s28, %s7542_s28   ;;  %s5118_s27 = sphi %s5227_s27, %s7547_s27   ;;  %s5114_s26 = sphi %s5225_s26, %s7546_s26   ;;  %s5110_s25 = sphi %s5223_s25, %s7545_s25  }
  0x14   : > { %p75_p0 = scmp.ne.s32.totalorder %s5114_s26, %s5110_s25  ;;  %p5265_p1 = scmp.eq.s32.totalorder %s7499_s16, 0 }
  0x15   : > { %p3894_p2 = scmp.ge.s32.totalorder %s5138_s15, 1  ;;  %p379_p3 = scmp.lt.s32.totalorder %s5138_s15, 5 }
  0x16   : > { %s7519_s17 = scalar_select %p5265_p1, 1, 0 }
  0x17   : > { %p5273_p4 = por %p5265_p1, %p75_p0  ;;  %p5277_p5 = pnand %p3894_p2, %p379_p3 }
  0x18   : > { %s5140_s20 = smov [#allocation10]   ;;  %s5141_s23 = smov [#allocation11]  }
  0x19   : > { %s7520_s18 = scalar_select %p5273_p4, 1, 0 }
  0x1a   : > { %s7521_s19 = scalar_select %p5277_p5, 1, 0 }
  0x1b   : > { %s403_s21 = sshll.u32 %s5140_s20, 4  ;;  %p4361_p6 = pneg %p5277_p5  ;;  %s404_s21 = int_to_ptr.vmem [resolvable:$true] %s403_s21 }
  0x1c   : > { %s416_s24 = sshll.u32 %s5141_s23, 4  ;;  %s7523_s6 = sld [smem:[#allocation23_spill]]  ;;  %s5289_s24 = int_to_ptr.vmem [resolvable:$true] %s416_s24 }
  0x1d   : > { %p5285_p7 = pnand %p4361_p6, %p5265_p1 }
  0x1f   : > { %p4946_p9 = pneg %p5285_p7 }
  0x22   : > { %s4944_s12 = scalar_lea.hbm %s7523_s6, 512 }
  0x23   : > { %p4945_p8 = scmp.ne.s32.totalorder %s7523_s6, %s4944_s12  ;;  %p4951_p12 = scmp.lt.u32.totalorder %s4944_s12, %s7523_s6 }
  0x25   : > { %p4947_p10 = pnand %p4946_p9, %p4945_p8 }
  0x27   : > { %p4948_p11 = pneg %p4947_p10 }
  0x29   : > { %p4953_p13 = pnand %p4951_p12, %p4948_p11 }
  0x2b   : > { %4956 = shalt.err (!%p4953_p13)
}
  0x2c   : > { %s4957_s23 = scalar_lea.vmem %s404_s21, 512  ;;  %p4965_p6 = scmp.lt.s32.totalorder %s404_s21, %s404_s21 }
  0x2d   : > { %p4958_p0 = scmp.ne.s32.totalorder %s404_s21, %s4957_s23  ;;  %p4966_p1 = scmp.lt.s32.totalorder %s4957_s23, %s4957_s23 }
  0x2f   : > { %p4960_p2 = pnand %p4958_p0, %p4946_p9  ;;  %p4967_p4 = por %p4966_p1, %p4965_p6 }
  0x31   : > { %p4961_p3 = pneg %p4960_p2 }
  0x33   : > { %p4968_p5 = pnand %p4967_p4, %p4961_p3 }
  0x35   : > { %4971 = shalt.err (!%p4968_p5)
}
  0x36   : > { %s5142_s10 = smov 64   ;;  %s5143_s16 = smov 4  }
  0x37   : > { %4364 = dma.hbm_to_vmem [thread:$0]  (!%p5285_p7), %s7523_s6, 512, %s404_s21, [#allocation9], %s5142_s10, %s5142_s10, %s5143_s16  }
  0x38   : > { %s7524_s7 = sld [smem:[#allocation24_spill]] }
  0x3e   : > { %s4972_s20 = scalar_lea.hbm %s7524_s7, 512 }
  0x3f   : > { %p4973_p8 = scmp.ne.s32.totalorder %s7524_s7, %s4972_s20  ;;  %p4979_p5 = scmp.lt.u32.totalorder %s4972_s20, %s7524_s7 }
  0x41   : > { %p4975_p1 = pnand %p4973_p8, %p4946_p9 }
  0x43   : > { %p4976_p4 = pneg %p4975_p1 }
  0x45   : > { %p4981_p10 = pnand %p4979_p5, %p4976_p4 }
  0x47   : > { %4984 = shalt.err (!%p4981_p10)
}
  0x48   : > { %s4985_s21 = scalar_lea.vmem %s5289_s24, 512  ;;  %p4993_p0 = scmp.lt.s32.totalorder %s5289_s24, %s5289_s24 }
  0x49   : > { %p4986_p11 = scmp.ne.s32.totalorder %s5289_s24, %s4985_s21  ;;  %p4994_p2 = scmp.lt.s32.totalorder %s4985_s21, %s4985_s21 }
  0x4b   : > { %p4988_p12 = pnand %p4986_p11, %p4946_p9  ;;  %p4995_p3 = por %p4994_p2, %p4993_p0 }
  0x4d   : > { %p4989_p13 = pneg %p4988_p12 }
  0x4f   : > { %p4996_p6 = pnand %p4995_p3, %p4989_p13 }
  0x51   : > { %4999 = shalt.err (!%p4996_p6)
}
  0x52   : > { %4367 = dma.hbm_to_vmem [thread:$0]  (!%p5285_p7), %s7524_s7, 512, %s5289_s24, [#allocation12], %s5142_s10, %s5142_s10, %s5143_s16  }
  0x53   : > { %s45_s9 = sadd.s32 1, %s5130_s30  ;;  %s49_s8 = sadd.s32 1, %s5134_s14 }
  0x54   : > { %p47_p9 = scmp.ge.s32.totalorder %s45_s9, 2  ;;  %s62_s22 = sadd.s32 1, %s5118_s27 }
  0x55   : > { %p69_p8 = scmp.ne.s32.totalorder %s5118_s27, %s5114_s26  ;;  %p70_p1 = scmp.eq.s32.totalorder %s5138_s15, 0 }
  0x56   : > { %s7551_s9 = smov (%p47_p9, %s45_s9), 0  ;;  %s7553_s8 = smov (!%p47_p9, %s49_s8), %s5134_s14 }
  0x57   : > { %7525 = sst [smem:[#allocation18_spill]] %s7551_s9  ;;  %p5347_p4 = por %p70_p1, %p69_p8 }
  0x58   : > { %p4377_p5 = scmp.lt.s32.totalorder %s5138_s15, 4  ;;  %p51_p10 = scmp.ge.s32.totalorder %s7553_s8, 2 }
  0x59   : > { %s5353_s24 = sand.u32 1, %s5118_s27   ;;  %s3992_s16 = sshll.u32 %s5134_s14, 12 }
  0x5a   : > { %s3898_s10 = sshll.u32 %s5353_s24, 8  ;;  %s7555_s8 = smov (%p51_p10, %s7553_s8), 0 }
  0x5b   : > { %7527 = sst [smem:[#allocation19_spill]] %s7555_s8  ;;  %s57_s12 = ssub.s32 %s5134_s14, %s7555_s8 }
  0x5c   : > { %s7528_s0 = sld [smem:[#allocation20_spill]]  ;;  %p60_p7 = scmp.eq.s32.totalorder %s57_s12, 0 }
  0x5d   : > { %s449_s21 = scalar_lea.vmem [#allocation6], %s3898_s10  ;;  %p5370_p11 = pnand %p4377_p5, %p5347_p4 }
  0x5e   : > { %s460_s3 = sshll.u32 %s449_s21, 4  ;;  %s446_s25 = scalar_lea.sflag [#allocation7], %s5353_s24  ;;  %s5366_s3 = int_to_ptr.vmem [resolvable:$true] %s460_s3 }
  0x5f   : > { %s5375_s6 = scalar_select %p60_p7, %s5118_s27, %s62_s22  }
  0x60   : > { %p5002_p13 = pneg %p5370_p11 }
  0x62   : > { %s5364_s23 = scalar_lea.hbm %s7528_s0, %s3992_s16  ;;  %s5005_s12 = scalar_lea.hbm %s7528_s0, 8192 }
  0x63   : > { %s5000_s20 = scalar_lea.hbm %s5364_s23, 4096  ;;  %p5006_p3 = scmp.lt.u32.totalorder %s5364_s23, %s7528_s0 }
  0x64   : > { %p5001_p12 = scmp.ne.s32.totalorder %s5364_s23, %s5000_s20  ;;  %p5007_p6 = scmp.lt.u32.totalorder %s5005_s12, %s5000_s20 }
  0x65   : > { %p5009_p8 = scmp.lt.u32.totalorder %s5000_s20, %s5364_s23 }
  0x66   : > { %p5003_p0 = pnand %p5002_p13, %p5001_p12  ;;  %p5008_p9 = por %p5007_p6, %p5006_p3 }
  0x68   : > { %p5004_p2 = pneg %p5003_p0  ;;  %p5010_p1 = por %p5009_p8, %p5008_p9 }
  0x6a   : > { %p5011_p4 = pnand %p5010_p1, %p5004_p2 }
  0x6c   : > { %5014 = shalt.err (!%p5011_p4)
}
  0x6d   : > { %s5015_s22 = scalar_lea.vmem %s5366_s3, 4096  ;;  %s5144_s10 = smov [#allocation6]  }
  0x6e   : > { %p5016_p5 = scmp.ne.s32.totalorder %s5366_s3, %s5015_s22  ;;  %s5020_s11 = sshll.u32 %s5144_s10, 4  ;;  %s5021_s11 = int_to_ptr.vmem [resolvable:$false] %s5020_s11 }
  0x6f   : > { %s5022_s7 = scalar_lea.vmem %s5021_s11, 8192  ;;  %p5023_p12 = scmp.lt.s32.totalorder %s5366_s3, %s5021_s11 }
  0x70   : > { %p5018_p10 = pnand %p5016_p5, %p5002_p13  ;;  %p5024_p0 = scmp.lt.s32.totalorder %s5022_s7, %s5015_s22 }
  0x72   : > { %p5019_p7 = pneg %p5018_p10  ;;  %p5025_p3 = por %p5024_p0, %p5023_p12 }
  0x74   : > { %p5026_p6 = pnand %p5025_p3, %p5019_p7 }
  0x76   : > { %5029 = shalt.err (!%p5026_p6)
}
  0x77   : > { %s5145_s20 = smov 128   ;;  %s5146_s12 = smov 8  }
  0x78   : > { %4371 = dma.hbm_to_vmem [thread:$0]  (!%p5370_p11), %s5364_s23, 4096, %s5366_s3, %s446_s25, %s5145_s20, %s5145_s20, %s5146_s12  }
  0x79   : > { %s3901_s21 = sshll.u32 %s5353_s24, 1  ;;  %s3993_s10 = sshll.u32 %s5134_s14, 5 }
  0x7a   : > { %s5411_s7 = scalar_lea.hbm %s7486_s1, %s3993_s10  ;;  %s474_s16 = scalar_lea.vmem [#allocation8], %s3901_s21 }
  0x7b   : > { %s486_s0 = sshll.u32 %s474_s16, 4  ;;  %s7530_s8 = sand.u32 1, %s5138_s15   ;;  %s487_s0 = int_to_ptr.vmem [resolvable:$true] %s486_s0 }
  0x7c   : > { %s471_s9 = scalar_lea.sflag [#allocation9], %s7530_s8  ;;  %s5030_s30 = scalar_lea.hbm %s5411_s7, 32 }
  0x7d   : > { %p5031_p2 = scmp.ne.s32.totalorder %s5411_s7, %s5030_s30  ;;  %s5035_s3 = scalar_lea.hbm %s7486_s1, 64 }
  0x7e   : > { %p5036_p1 = scmp.lt.u32.totalorder %s5411_s7, %s7486_s1  ;;  %p5037_p4 = scmp.lt.u32.totalorder %s5035_s3, %s5030_s30 }
  0x7f   : > { %p5033_p9 = pnand %p5031_p2, %p5002_p13  ;;  %p5039_p10 = scmp.lt.u32.totalorder %s5030_s30, %s5411_s7 }
  0x80   : > { %p5038_p5 = por %p5037_p4, %p5036_p1 }
  0x81   : > { %p5034_p8 = pneg %p5033_p9 }
  0x82   : > { %p5040_p7 = por %p5039_p10, %p5038_p5 }
  0x84   : > { %p5041_p12 = pnand %p5040_p7, %p5034_p8 }
  0x86   : > { %5044 = shalt.err (!%p5041_p12)
}
  0x87   : > { %s5045_s8 = scalar_lea.vmem %s487_s0, 32  ;;  %s5147_s16 = smov [#allocation8]  }
  0x88   : > { %p5046_p0 = scmp.ne.s32.totalorder %s487_s0, %s5045_s8  ;;  %s5050_s12 = sshll.u32 %s5147_s16, 4  ;;  %s5051_s12 = int_to_ptr.vmem [resolvable:$false] %s5050_s12 }
  0x89   : > { %s5052_s21 = scalar_lea.vmem %s5051_s12, 64  ;;  %p5053_p2 = scmp.lt.s32.totalorder %s487_s0, %s5051_s12 }
  0x8a   : > { %p5048_p3 = pnand %p5046_p0, %p5002_p13  ;;  %p5054_p9 = scmp.lt.s32.totalorder %s5052_s21, %s5045_s8 }
  0x8c   : > { %p5049_p6 = pneg %p5048_p3  ;;  %p5055_p1 = por %p5054_p9, %p5053_p2 }
  0x8e   : > { %p5056_p4 = pnand %p5055_p1, %p5049_p6 }
  0x90   : > { %5059 = shalt.err (!%p5056_p4)
}
  0x91   : > { %4374 = dma.hbm_to_vmem [thread:$0]  (!%p5370_p11), %s5411_s7, 32, %s487_s0, %s471_s9  }
  0x92   : > { %p7531_p8 = scmp.ne.s32.totalorder %s7521_s19, 0 }
  0x93   : > { %s497_s30 = sand.u32 (!%p7531_p8), 1, %s5114_s26   ;;  %p7532_p13 = scmp.ne.s32.totalorder (!%p7531_p8), %s7520_s18, 0 }
  0x94   : > { %495 = sbr.rel (%p7531_p8) target bundleno = 2468 (0x9a4), region = 72  ;;  %s3905_s10 = sshll.u32 (!%p7531_p8), %s497_s30, 8 }
  0x95   : > { %s498_s11 = scalar_lea.sflag (!%p7531_p8), [#allocation7], %s497_s30  ;;  %s5437_s22 = scalar_lea.vmem (!%p7531_p8), [#allocation6], %s3905_s10 }
  0x9b   : > { %5093 = dma.done.wait (%p7532_p13), %s498_s11, 4096  }
  0x9c   : > { %5095 = vsyncadd (%p7532_p13), %s498_s11, 4294963200  ;;  %s7533_s24 = sadd.s32 4294967295, %s5138_s15   ;;  %s3906_s0 = sshll.u32 %s497_s30, 1 }
  0x9d   : > { %s506_s5 = sand.u32 1, %s7533_s24   ;;  %s5445_s19 = scalar_lea.vmem [#allocation8], %s3906_s0 }
  0x9e   : > { %s507_s9 = scalar_lea.sflag [#allocation9], %s506_s5 }
  0x9f   : > { %5097 = dma.done.wait (%p7532_p13), %s507_s9, 32  }
  0xa0   : > { %5099 = vsyncadd (%p7532_p13), %s507_s9, 4294967264  ;;  %p7534_p11 = scmp.ne.s32.totalorder %s7519_s17, 0 }
  0xa2   : > { %5101 = dma.done.wait (%p7534_p11), [#allocation9], 512  }
  0xa3   : > { %5103 = vsyncadd (%p7534_p11), [#allocation9], 4294966784 }
  0xa4   : > { %5105 = dma.done.wait (%p7534_p11), [#allocation12], 512  }
  0xa5   : > { %5107 = vsyncadd (%p7534_p11), [#allocation12], 4294966784  ;;  %p579_p5 = scmp.lt.s32.totalorder %s5126_s29, 1  ;;  %p3911_p10 = scmp.ne.s32.totalorder %s5122_s28, 0 }
  0xa6   : > { %v5468_v0 = vld [vmem:[%s5437_s22 + $0x80] sm:$0xff] (!%p3911_p10)  ;;  %v5476_v2 = vld [vmem:[%s5437_s22 + $0x88] sm:$0xff] (!%p3911_p10)  ;;  %v5484_v4 = vld [vmem:[%s5437_s22 + $0x90] sm:$0xff] (!%p3911_p10)  ;;  %s7535_s17 = sld [smem:[#allocation21_spill]] (!%p3911_p10)  ;;  %s7536_s8 = sld [smem:[#allocation22_spill]] (!%p3911_p10)  ;;  %vm1614_vm0 = vcmask (!%p3911_p10), 523264  }
  0xa7   : > { %s7557_s29 = smov (!%p579_p5, %s5126_s29), 1  ;;  %594 = sbr.rel (%p3911_p10) target bundleno = 1152 (0x480), region = 92 }
  0xa8   : > { %s3994_s7 = sshll.u32 %s7557_s29, 8  ;;  %v5471_v1 = vld [vmem:[%s5437_s22] sm:$0xff] (!%p3911_p10)  ;;  %659 = vadd.xlane.f32.xlu0 (!%p3911_p10), %v5468_v0  ;;  %v5479_v3 = vld [vmem:[%s5437_s22 + $0x8] sm:$0xff] (!%p3911_p10)  ;;  %v5487_v5 = vld [vmem:[%s5437_s22 + $0x98] sm:$0xff] (!%p3911_p10)  ;;  %s5148_s16 = smov (!%p3911_p10), 64   ;;  %vm1854_vm1 = vcmask (!%p3911_p10), 1040384  }
  0xa9   : > { %s5464_s3 = scalar_lea.vmem %s7498_s13, %s3994_s7  ;;  %627 = vadd.xlane.f32.xlu1 (!%p3911_p10), %v5471_v1  ;;  %v5492_v6 = vld [vmem:[%s5437_s22 + $0x10] sm:$0xff] (!%p3911_p10)  ;;  %v5495_v7 = vld [vmem:[%s5437_s22 + $0x18] sm:$0xff] (!%p3911_p10)  ;;  %v5498_v8 = vld [vmem:[%s5437_s22 + $0xa0] sm:$0xff] (!%p3911_p10)  ;;  %vm1636_vm2 = vcmask (!%p3911_p10), 516096   ;;  %vm1638_vm3 = vcmask (!%p3911_p10), 0  }
  0xaa   : > { %v5501_v9 = vld [vmem:[%s5437_s22 + $0xa8] sm:$0xff] (!%p3911_p10)  ;;  %v5508_v10 = vld [vmem:[%s5437_s22 + $0x20] sm:$0xff] (!%p3911_p10)  ;;  %v5516_v12 = vld [vmem:[%s5437_s22 + $0xb0] sm:$0xff] (!%p3911_p10) }
  0xab   : > { %v5511_v11 = vld [vmem:[%s5437_s22 + $0x28] sm:$0xff] (!%p3911_p10)  ;;  %v5519_v13 = vld [vmem:[%s5437_s22 + $0xb8] sm:$0xff] (!%p3911_p10)  ;;  %v5524_v14 = vld [vmem:[%s5437_s22 + $0x30] sm:$0xff] (!%p3911_p10) }
  0xac   : > { %661 = vadd.xlane.f32.xlu0 (!%p3911_p10), %v5476_v2  ;;  %v5527_v15 = vld [vmem:[%s5437_s22 + $0x38] sm:$0xff] (!%p3911_p10)  ;;  %v5532_v16 = vld [vmem:[%s5437_s22 + $0xc0] sm:$0xff] (!%p3911_p10)  ;;  %v5535_v17 = vld [vmem:[%s5437_s22 + $0xc8] sm:$0xff] (!%p3911_p10) }
  0xad   : > { %629 = vadd.xlane.f32.xlu1 (!%p3911_p10), %v5479_v3  ;;  %v5540_v18 = vld [vmem:[%s5437_s22 + $0x40] sm:$0xff] (!%p3911_p10)  ;;  %v5543_v19 = vld [vmem:[%s5437_s22 + $0x48] sm:$0xff] (!%p3911_p10)  ;;  %v5548_v20 = vld [vmem:[%s5437_s22 + $0xd0] sm:$0xff] (!%p3911_p10) }
  0xae   : > { %v5551_v21 = vld [vmem:[%s5437_s22 + $0xd8] sm:$0xff]  ;;  %v5556_v22 = vld [vmem:[%s5437_s22 + $0x50] sm:$0xff]  ;;  %v5564_v24 = vld [vmem:[%s5437_s22 + $0xe0] sm:$0xff] }
  0xaf   : > { %v5559_v23 = vld [vmem:[%s5437_s22 + $0x58] sm:$0xff]  ;;  %v5567_v25 = vld [vmem:[%s5437_s22 + $0xe8] sm:$0xff]  ;;  %v5572_v26 = vld [vmem:[%s5437_s22 + $0x60] sm:$0xff] }
  0xb0   : > { %663 = vadd.xlane.f32.xlu0 %v5484_v4  ;;  %v5575_v27 = vld [vmem:[%s5437_s22 + $0x68] sm:$0xff]  ;;  %v5580_v28 = vld [vmem:[%s5437_s22 + $0xf0] sm:$0xff]  ;;  %v5583_v29 = vld [vmem:[%s5437_s22 + $0xf8] sm:$0xff] }
  0xb1   : > { %665 = vadd.xlane.f32.xlu1 %v5487_v5  ;;  %v5588_v30 = vld [vmem:[%s5437_s22 + $0x70] sm:$0xff]  ;;  %v5591_v31 = vld [vmem:[%s5437_s22 + $0x78] sm:$0xff] }
  0xb4   : > { %631 = vadd.xlane.f32.xlu0 %v5492_v6 }
  0xb5   : > { %633 = vadd.xlane.f32.xlu1 %v5495_v7 }
  0xb8   : > { %667 = vadd.xlane.f32.xlu0 %v5498_v8 }
  0xb9   : > { %669 = vadd.xlane.f32.xlu1 %v5501_v9 }
  0xbc   : > { %635 = vadd.xlane.f32.xlu0 %v5508_v10 }
  0xbd   : > { %637 = vadd.xlane.f32.xlu1 %v5511_v11 }
  0xc0   : > { %671 = vadd.xlane.f32.xlu0 %v5516_v12 }
  0xc1   : > { %673 = vadd.xlane.f32.xlu1 %v5519_v13 }
  0xc4   : > { %639 = vadd.xlane.f32.xlu0 %v5524_v14 }
  0xc5   : > { %641 = vadd.xlane.f32.xlu1 %v5527_v15 }
  0xc8   : > { %675 = vadd.xlane.f32.xlu0 %v5532_v16 }
  0xc9   : > { %677 = vadd.xlane.f32.xlu1 %v5535_v17 }
  0xcc   : > { %643 = vadd.xlane.f32.xlu0 %v5540_v18 }
  0xcd   : > { %645 = vadd.xlane.f32.xlu1 %v5543_v19 }
  0xd0   : > { %679 = vadd.xlane.f32.xlu0 %v5548_v20 }
  0xd1   : > { %681 = vadd.xlane.f32.xlu1 %v5551_v21 }
  0xd4   : > { %647 = vadd.xlane.f32.xlu0 %v5556_v22 }
  0xd5   : > { %649 = vadd.xlane.f32.xlu1 %v5559_v23 }
  0xd8   : > { %683 = vadd.xlane.f32.xlu0 %v5564_v24 }
  0xd9   : > { %685 = vadd.xlane.f32.xlu1 %v5567_v25 }
  0xdc   : > { %651 = vadd.xlane.f32.xlu0 %v5572_v26 }
  0xdd   : > { %653 = vadd.xlane.f32.xlu1 %v5575_v27 }
  0xe0   : > { %687 = vadd.xlane.f32.xlu0 %v5580_v28 }
  0xe1   : > { %689 = vadd.xlane.f32.xlu1 %v5583_v29 }
  0xe4   : > { %655 = vadd.xlane.f32.xlu0 %v5588_v30 }
  0xe5   : > { %657 = vadd.xlane.f32.xlu1 %v5591_v31 }
 0x135   : > { %v660_v32 = vpop.xlane.xlu0 %659 }
 0x136   : > { %v628_v33 = vpop.xlane.xlu1 %627  ;;  %v708_v34 = vmul.f32 0.0078125, %v660_v32 }
 0x137   : > { %v692_v35 = vmul.f32 0.0078125, %v628_v33 }
 0x138   : > { %v5596_v36 = vsub.f32 %v5468_v0, %v708_v34 }
 0x139   : > { %v5599_v37 = vsub.f32 %v5471_v1, %v692_v35  ;;  %v662_v38 = vpop.xlane.xlu0 %661 }
 0x13a   : > { %v630_v39 = vpop.xlane.xlu1 %629  ;;  %v709_v40 = vmul.f32 0.0078125, %v662_v38  ;;  %v772_v41 = vmul.f32 %v5596_v36, %v5596_v36 }
 0x13b   : > { %v693_v42 = vmul.f32 0.0078125, %v630_v39  ;;  %v756_v45 = vmul.f32 %v5599_v37, %v5599_v37 }
 0x13c   : > { %v5604_v43 = vsub.f32 %v5476_v2, %v709_v40  ;;  %820 = vadd.xlane.f32.xlu0 %v772_v41 }
 0x13d   : > { %v5607_v44 = vsub.f32 %v5479_v3, %v693_v42  ;;  %v664_v46 = vpop.xlane.xlu0 %663 }
 0x13e   : > { %v666_v47 = vpop.xlane.xlu1 %665  ;;  %v710_v48 = vmul.f32 0.0078125, %v664_v46  ;;  %v773_v49 = vmul.f32 %v5604_v43, %v5604_v43 }
 0x13f   : > { %v711_v50 = vmul.f32 0.0078125, %v666_v47  ;;  %v757_v53 = vmul.f32 %v5607_v44, %v5607_v44  ;;  %v4536_v47 = vld [vmem:[%s7489_s4 + $0x8] sm:$0xff]  }
 0x140   : > { %v5614_v51 = vsub.f32 %v5484_v4, %v710_v48  ;;  %822 = vadd.xlane.f32.xlu1 %v773_v49  ;;  %788 = vadd.xlane.f32.xlu0 %v756_v45 }
 0x141   : > { %v5617_v52 = vsub.f32 %v5487_v5, %v711_v50  ;;  %v632_v54 = vpop.xlane.xlu0 %631 }
 0x142   : > { %v634_v55 = vpop.xlane.xlu1 %633  ;;  %v694_v56 = vmul.f32 0.0078125, %v632_v54  ;;  %v774_v57 = vmul.f32 %v5614_v51, %v5614_v51 }
 0x143   : > { %v695_v58 = vmul.f32 0.0078125, %v634_v55  ;;  %v775_v61 = vmul.f32 %v5617_v52, %v5617_v52 }
 0x144   : > { %v5624_v59 = vsub.f32 %v5492_v6, %v694_v56  ;;  %824 = vadd.xlane.f32.xlu0 %v774_v57  ;;  %790 = vadd.xlane.f32.xlu1 %v757_v53  ;;  %v4537_v56 = vld [vmem:[%s7489_s4 + $0x10] sm:$0xff]  }
 0x145   : > { %v5627_v60 = vsub.f32 %v5495_v7, %v695_v58  ;;  %v668_v62 = vpop.xlane.xlu0 %667 }
 0x146   : > { %v670_v63 = vpop.xlane.xlu1 %669  ;;  %v712_v0 = vmul.f32 0.0078125, %v668_v62  ;;  %v758_v1 = vmul.f32 %v5624_v59, %v5624_v59 }
 0x147   : > { %v713_v2 = vmul.f32 0.0078125, %v670_v63  ;;  %v759_v5 = vmul.f32 %v5627_v60, %v5627_v60 }
 0x148   : > { %v5634_v3 = vsub.f32 %v5498_v8, %v712_v0  ;;  %792 = vadd.xlane.f32.xlu0 %v758_v1  ;;  %826 = vadd.xlane.f32.xlu1 %v775_v61  ;;  %v4535_v8 = vld [vmem:[%s7489_s4] sm:$0xff]   ;;  %v4538_v1 = vld [vmem:[%s7489_s4 + $0x18] sm:$0xff]  }
 0x149   : > { %v5637_v4 = vsub.f32 %v5501_v9, %v713_v2  ;;  %v636_v6 = vpop.xlane.xlu0 %635  ;;  %4325 = vmatprep.subr.bf16.mxu1 %v4535_v8  ;;  %4117 = vmatprep.subr.bf16.mxu0 %v4535_v8 }
 0x14a   : > { %v638_v7 = vpop.xlane.xlu1 %637  ;;  %v696_v32 = vmul.f32 0.0078125, %v636_v6  ;;  %v776_v33 = vmul.f32 %v5634_v3, %v5634_v3  ;;  %4333 = vmatpush3.bf16.msra.mxu1 %v4535_v8  ;;  %4118 = vmatpush3.bf16.msra.mxu0 %v4535_v8 }
 0x14b   : > { %v697_v34 = vmul.f32 0.0078125, %v638_v7  ;;  %v777_v38 = vmul.f32 %v5637_v4, %v5637_v4  ;;  %4326 = vmatprep.subr.bf16.mxu1 %v4536_v47  ;;  %4119 = vmatprep.subr.bf16.mxu0 %v4536_v47 }
 0x14c   : > { %v5647_v35 = vsub.f32 %v5508_v10, %v696_v32  ;;  %828 = vadd.xlane.f32.xlu0 %v776_v33  ;;  %794 = vadd.xlane.f32.xlu1 %v759_v5 }
 0x14d   : > { %v5650_v9 = vsub.f32 %v5511_v11, %v697_v34  ;;  %v672_v39 = vpop.xlane.xlu0 %671  ;;  %v4539_v34 = vld [vmem:[%s7489_s4 + $0x20] sm:$0xff]  }
 0x14e   : > { %v674_v40 = vpop.xlane.xlu1 %673  ;;  %v714_v41 = vmul.f32 0.0078125, %v672_v39  ;;  %v760_v42 = vmul.f32 %v5647_v35, %v5647_v35  ;;  %4334 = vmatpush3.bf16.msra.mxu1 %v4536_v47  ;;  %4120 = vmatpush3.bf16.msra.mxu0 %v4536_v47 }
 0x14f   : > { %v715_v45 = vmul.f32 0.0078125, %v674_v40  ;;  %v761_v46 = vmul.f32 %v5650_v9, %v5650_v9  ;;  %4327 = vmatprep.subr.bf16.mxu1 %v4537_v56  ;;  %4121 = vmatprep.subr.bf16.mxu0 %v4537_v56 }
 0x150   : > { %v5657_v10 = vsub.f32 %v5516_v12, %v714_v41  ;;  %796 = vadd.xlane.f32.xlu0 %v760_v42  ;;  %830 = vadd.xlane.f32.xlu1 %v777_v38 }
 0x151   : > { %v5660_v11 = vsub.f32 %v5519_v13, %v715_v45  ;;  %v640_v48 = vpop.xlane.xlu0 %639  ;;  %v4540_v45 = vld [vmem:[%s7489_s4 + $0x28] sm:$0xff]  }
 0x152   : > { %v642_v49 = vpop.xlane.xlu1 %641  ;;  %v698_v50 = vmul.f32 0.0078125, %v640_v48  ;;  %v778_v53 = vmul.f32 %v5657_v10, %v5657_v10  ;;  %4335 = vmatpush3.bf16.msra.mxu1 %v4537_v56  ;;  %4122 = vmatpush3.bf16.msra.mxu0 %v4537_v56 }
 0x153   : > { %v699_v12 = vmul.f32 0.0078125, %v642_v49  ;;  %v779_v55 = vmul.f32 %v5660_v11, %v5660_v11  ;;  %4328 = vmatprep.subr.bf16.mxu1 %v4538_v1  ;;  %4123 = vmatprep.subr.bf16.mxu0 %v4538_v1 }
 0x154   : > { %v5670_v13 = vsub.f32 %v5524_v14, %v698_v50  ;;  %832 = vadd.xlane.f32.xlu0 %v778_v53  ;;  %798 = vadd.xlane.f32.xlu1 %v761_v46 }
 0x155   : > { %v5673_v54 = vsub.f32 %v5527_v15, %v699_v12  ;;  %v676_v57 = vpop.xlane.xlu0 %675  ;;  %v4541_v12 = vld [vmem:[%s7489_s4 + $0x30] sm:$0xff]  }
 0x156   : > { %v678_v58 = vpop.xlane.xlu1 %677  ;;  %v716_v61 = vmul.f32 0.0078125, %v676_v57  ;;  %v762_v62 = vmul.f32 %v5670_v13, %v5670_v13  ;;  %4336 = vmatpush3.bf16.msra.mxu1 %v4538_v1  ;;  %4124 = vmatpush3.bf16.msra.mxu0 %v4538_v1 }
 0x157   : > { %v717_v14 = vmul.f32 0.0078125, %v678_v58  ;;  %v763_v0 = vmul.f32 %v5673_v54, %v5673_v54  ;;  %4329 = vmatprep.subr.bf16.mxu1 %v4539_v34  ;;  %4125 = vmatprep.subr.bf16.mxu0 %v4539_v34 }
 0x158   : > { %v5683_v15 = vsub.f32 %v5532_v16, %v716_v61  ;;  %800 = vadd.xlane.f32.xlu0 %v762_v62  ;;  %834 = vadd.xlane.f32.xlu1 %v779_v55 }
 0x159   : > { %v5686_v63 = vsub.f32 %v5535_v17, %v717_v14  ;;  %v644_v2 = vpop.xlane.xlu0 %643  ;;  %v4542_v14 = vld [vmem:[%s7489_s4 + $0x38] sm:$0xff]  }
 0x15a   : > { %v646_v5 = vpop.xlane.xlu1 %645  ;;  %v700_v6 = vmul.f32 0.0078125, %v644_v2  ;;  %v780_v7 = vmul.f32 %v5683_v15, %v5683_v15  ;;  %4337 = vmatpush3.bf16.msra.mxu1 %v4539_v34  ;;  %4126 = vmatpush3.bf16.msra.mxu0 %v4539_v34 }
 0x15b   : > { %v701_v16 = vmul.f32 0.0078125, %v646_v5  ;;  %v781_v33 = vmul.f32 %v5686_v63, %v5686_v63  ;;  %4330 = vmatprep.subr.bf16.mxu1 %v4540_v45  ;;  %4127 = vmatprep.subr.bf16.mxu0 %v4540_v45 }
 0x15c   : > { %v5696_v17 = vsub.f32 %v5540_v18, %v700_v6  ;;  %836 = vadd.xlane.f32.xlu0 %v780_v7  ;;  %802 = vadd.xlane.f32.xlu1 %v763_v0 }
 0x15d   : > { %v5699_v32 = vsub.f32 %v5543_v19, %v701_v16  ;;  %v680_v8 = vpop.xlane.xlu0 %679 }
 0x15e   : > { %v682_v38 = vpop.xlane.xlu1 %681  ;;  %v718_v39 = vmul.f32 0.0078125, %v680_v8  ;;  %v764_v40 = vmul.f32 %v5696_v17, %v5696_v17  ;;  %4338 = vmatpush3.bf16.msra.mxu1 %v4540_v45  ;;  %4128 = vmatpush3.bf16.msra.mxu0 %v4540_v45 }
 0x15f   : > { %v719_v18 = vmul.f32 0.0078125, %v682_v38  ;;  %v765_v42 = vmul.f32 %v5699_v32, %v5699_v32  ;;  %4331 = vmatprep.subr.bf16.mxu1 %v4541_v12  ;;  %4129 = vmatprep.subr.bf16.mxu0 %v4541_v12 }
 0x160   : > { %v5709_v19 = vsub.f32 %v5548_v20, %v718_v39  ;;  %804 = vadd.xlane.f32.xlu0 %v764_v40  ;;  %838 = vadd.xlane.f32.xlu1 %v781_v33 }
 0x161   : > { %v5712_v41 = vsub.f32 %v5551_v21, %v719_v18  ;;  %v648_v46 = vpop.xlane.xlu0 %647 }
 0x162   : > { %v650_v47 = vpop.xlane.xlu1 %649  ;;  %v702_v48 = vmul.f32 0.0078125, %v648_v46  ;;  %v782_v49 = vmul.f32 %v5709_v19, %v5709_v19  ;;  %4339 = vmatpush3.bf16.msra.mxu1 %v4541_v12  ;;  %4130 = vmatpush3.bf16.msra.mxu0 %v4541_v12 }
 0x163   : > { %v703_v20 = vmul.f32 0.0078125, %v650_v47  ;;  %v783_v53 = vmul.f32 %v5712_v41, %v5712_v41  ;;  %4332 = vmatprep.subr.bf16.mxu1 %v4542_v14  ;;  %4131 = vmatprep.subr.bf16.mxu0 %v4542_v14 }
 0x164   : > { %v5722_v21 = vsub.f32 %v5556_v22, %v702_v48  ;;  %840 = vadd.xlane.f32.xlu0 %v782_v49  ;;  %806 = vadd.xlane.f32.xlu1 %v765_v42 }
 0x165   : > { %v5725_v50 = vsub.f32 %v5559_v23, %v703_v20  ;;  %v684_v55 = vpop.xlane.xlu0 %683 }
 0x166   : > { %v686_v56 = vpop.xlane.xlu1 %685  ;;  %v720_v57 = vmul.f32 0.0078125, %v684_v55  ;;  %v766_v58 = vmul.f32 %v5722_v21, %v5722_v21  ;;  %4340 = vmatpush3.bf16.msra.mxu1 %v4542_v14  ;;  %4132 = vmatpush3.bf16.msra.mxu0 %v4542_v14 }
 0x167   : > { %v721_v22 = vmul.f32 0.0078125, %v686_v56  ;;  %v767_v62 = vmul.f32 %v5725_v50, %v5725_v50 }
 0x168   : > { %v5735_v23 = vsub.f32 %v5564_v24, %v720_v57  ;;  %808 = vadd.xlane.f32.xlu0 %v766_v58  ;;  %842 = vadd.xlane.f32.xlu1 %v783_v53 }
 0x169   : > { %v5738_v61 = vsub.f32 %v5567_v25, %v721_v22  ;;  %v652_v0 = vpop.xlane.xlu0 %651 }
 0x16a   : > { %v654_v1 = vpop.xlane.xlu1 %653  ;;  %v704_v2 = vmul.f32 0.0078125, %v652_v0  ;;  %v784_v5 = vmul.f32 %v5735_v23, %v5735_v23 }
 0x16b   : > { %v705_v24 = vmul.f32 0.0078125, %v654_v1  ;;  %v785_v7 = vmul.f32 %v5738_v61, %v5738_v61 }
 0x16c   : > { %v5748_v25 = vsub.f32 %v5572_v26, %v704_v2  ;;  %844 = vadd.xlane.f32.xlu0 %v784_v5  ;;  %810 = vadd.xlane.f32.xlu1 %v767_v62 }
 0x16d   : > { %v5751_v6 = vsub.f32 %v5575_v27, %v705_v24  ;;  %v688_v16 = vpop.xlane.xlu0 %687 }
 0x16e   : > { %v690_v33 = vpop.xlane.xlu1 %689  ;;  %v722_v34 = vmul.f32 0.0078125, %v688_v16  ;;  %v768_v8 = vmul.f32 %v5748_v25, %v5748_v25 }
 0x16f   : > { %v723_v38 = vmul.f32 0.0078125, %v690_v33  ;;  %v769_v27 = vmul.f32 %v5751_v6, %v5751_v6 }
 0x170   : > { %v5758_v39 = vsub.f32 %v5580_v28, %v722_v34  ;;  %812 = vadd.xlane.f32.xlu0 %v768_v8  ;;  %846 = vadd.xlane.f32.xlu1 %v785_v7 }
 0x171   : > { %v5761_v26 = vsub.f32 %v5583_v29, %v723_v38  ;;  %v656_v40 = vpop.xlane.xlu0 %655 }
 0x172   : > { %v658_v18 = vpop.xlane.xlu1 %657  ;;  %v706_v42 = vmul.f32 0.0078125, %v656_v40  ;;  %v786_v45 = vmul.f32 %v5758_v39, %v5758_v39 }
 0x173   : > { %v707_v46 = vmul.f32 0.0078125, %v658_v18  ;;  %v787_v29 = vmul.f32 %v5761_v26, %v5761_v26 }
 0x174   : > { %v5768_v47 = vsub.f32 %v5588_v30, %v706_v42  ;;  %848 = vadd.xlane.f32.xlu0 %v786_v45  ;;  %814 = vadd.xlane.f32.xlu1 %v769_v27  ;;  %v5783_v45 = vld [vmem:[%s7487_s2] ss:$0 sm:$0xff] }
 0x175   : > { %v5771_v28 = vsub.f32 %v5591_v31, %v707_v46 }
 0x176   : > { %v770_v48 = vmul.f32 %v5768_v47, %v5768_v47 }
 0x177   : > { %v771_v49 = vmul.f32 %v5771_v28, %v5771_v28 }
 0x178   : > { %816 = vadd.xlane.f32.xlu0 %v770_v48  ;;  %850 = vadd.xlane.f32.xlu1 %v787_v29 }
 0x17c   : > { %818 = vadd.xlane.f32.xlu1 %v771_v49 }
 0x1c9   : > { %v821_v20 = vpop.xlane.xlu0 %820 }
 0x1ca   : > { %v868_v30 = vmul.f32 0.0078125, %v821_v20 }
 0x1cc   : > { %v900_v53 = vadd.f32 1e-05, %v868_v30 }
 0x1cd   : > { %v789_v12 = vpop.xlane.xlu0 %788  ;;  %v823_v55 = vpop.xlane.xlu1 %822 }
 0x1ce   : > { %4543 = vrsqrt.f32 %v900_v53  ;;  %v852_v31 = vmul.f32 0.0078125, %v789_v12  ;;  %v869_v56 = vmul.f32 0.0078125, %v823_v55 }
 0x1d0   : > { %v884_v57 = vadd.f32 1e-05, %v852_v31  ;;  %v901_v58 = vadd.f32 1e-05, %v869_v56  ;;  %v5790_v31 = vld [vmem:[%s7535_s17] ss:$0 sm:$0xff] }
 0x1d1   : > { %v825_v22 = vpop.xlane.xlu0 %824  ;;  %v791_v62 = vpop.xlane.xlu1 %790 }
 0x1d2   : > { %4545 = vrsqrt.f32 %v884_v57  ;;  %v870_v14 = vmul.f32 0.0078125, %v825_v22  ;;  %v853_v0 = vmul.f32 0.0078125, %v791_v62 }
 0x1d3   : > { %4547 = vrsqrt.f32 %v901_v58 }
 0x1d4   : > { %v902_v1 = vadd.f32 1e-05, %v870_v14  ;;  %v885_v2 = vadd.f32 1e-05, %v853_v0 }
 0x1d5   : > { %v793_v5 = vpop.xlane.xlu0 %792  ;;  %v827_v24 = vpop.xlane.xlu1 %826 }
 0x1d6   : > { %4549 = vrsqrt.f32 %v902_v1  ;;  %v854_v7 = vmul.f32 0.0078125, %v793_v5  ;;  %v871_v16 = vmul.f32 0.0078125, %v827_v24 }
 0x1d7   : > { %4551 = vrsqrt.f32 %v885_v2 }
 0x1d8   : > { %v4544_v33 = vpop.eup %4543  ;;  %v886_v34 = vadd.f32 1e-05, %v854_v7  ;;  %v903_v8 = vadd.f32 1e-05, %v871_v16 }
 0x1d9   : > { %v829_v38 = vpop.xlane.xlu0 %828  ;;  %v795_v27 = vpop.xlane.xlu1 %794  ;;  %v964_v40 = vmul.f32 %v4544_v33, %v5596_v36 }
 0x1da   : > { %4553 = vrsqrt.f32 %v886_v34  ;;  %v872_v18 = vmul.f32 0.0078125, %v829_v38  ;;  %v855_v42 = vmul.f32 0.0078125, %v795_v27 }
 0x1db   : > { %4555 = vrsqrt.f32 %v903_v8  ;;  %v1003_v53 = vmul.f32 %v5783_v45, %v964_v40 }
 0x1dc   : > { %v4546_v46 = vpop.eup %4545  ;;  %v904_v29 = vadd.f32 1e-05, %v872_v18  ;;  %v887_v48 = vadd.f32 1e-05, %v855_v42 }
 0x1dd   : > { %v4548_v49 = vpop.eup %4547  ;;  %v797_v20 = vpop.xlane.xlu0 %796  ;;  %v948_v56 = vmul.f32 %v4546_v46, %v5599_v37  ;;  %v1042_v2 = vadd.f32 %v5790_v31, %v1003_v53 }
 0x1de   : > { %v831_v30 = vpop.xlane.xlu1 %830  ;;  %4557 = vrsqrt.f32 %v904_v29  ;;  %v856_v12 = vmul.f32 0.0078125, %v797_v20  ;;  %v965_v55 = vmul.f32 %v4548_v49, %v5604_v43 }
 0x1df   : > { %v873_v36 = vmul.f32 0.0078125, %v831_v30  ;;  %4559 = vrsqrt.f32 %v887_v48  ;;  %v987_v16 = vmul.f32 %v5783_v45, %v948_v56 }
 0x1e0   : > { %v4550_v57 = vpop.eup %4549  ;;  %v888_v58 = vadd.f32 1e-05, %v856_v12  ;;  %v1004_v62 = vmul.f32 %v5783_v45, %v965_v55 }
 0x1e1   : > { %v905_v22 = vadd.f32 1e-05, %v873_v36  ;;  %v4552_v14 = vpop.eup %4551  ;;  %v833_v0 = vpop.xlane.xlu0 %832  ;;  %v966_v43 = vmul.f32 %v4550_v57, %v5614_v51 }
 0x1e2   : > { %v799_v1 = vpop.xlane.xlu1 %798  ;;  %4561 = vrsqrt.f32 %v888_v58  ;;  %v874_v5 = vmul.f32 0.0078125, %v833_v0  ;;  %v1043_v7 = vadd.f32 %v5790_v31, %v1004_v62  ;;  %v949_v37 = vmul.f32 %v4552_v14, %v5607_v44 }
 0x1e3   : > { %v857_v24 = vmul.f32 0.0078125, %v799_v1  ;;  %4563 = vrsqrt.f32 %v905_v22  ;;  %v1005_v51 = vmul.f32 %v5783_v45, %v966_v43  ;;  %v1026_v44 = vadd.f32 %v5790_v31, %v987_v16 }
 0x1e4   : > { %v4554_v33 = vpop.eup %4553  ;;  %v906_v34 = vadd.f32 1e-05, %v874_v5  ;;  %v1066_v38 = vpack.c.bf16 %v1043_v7, %v1042_v2  ;;  %v988_v42 = vmul.f32 %v5783_v45, %v949_v37 }
 0x1e5   : > { %v889_v8 = vadd.f32 1e-05, %v857_v24  ;;  %v4556_v27 = vpop.eup %4555  ;;  %v801_v40 = vpop.xlane.xlu0 %800  ;;  %v950_v20 = vmul.f32 %v4554_v33, %v5624_v59  ;;  %v1044_v22 = vadd.f32 %v5790_v31, %v1005_v51 }
 0x1e6   : > { %v835_v18 = vpop.xlane.xlu1 %834  ;;  %4565 = vrsqrt.f32 %v906_v34  ;;  %v858_v46 = vmul.f32 0.0078125, %v801_v40  ;;  %4149 = vmatprep.mubr.bf16.mxu1 %v1066_v38  ;;  %v967_v48 = vmul.f32 %v4556_v27, %v5617_v52  ;;  %v1027_v49 = vadd.f32 %v5790_v31, %v988_v42 }
 0x1e7   : > { %v875_v29 = vmul.f32 0.0078125, %v835_v18  ;;  %4567 = vrsqrt.f32 %v889_v8  ;;  %v989_v1 = vmul.f32 %v5783_v45, %v950_v20 }
 0x1e8   : > { %v4558_v30 = vpop.eup %4557  ;;  %v890_v53 = vadd.f32 1e-05, %v858_v46  ;;  %v1006_v36 = vmul.f32 %v5783_v45, %v967_v48  ;;  %v1058_v57 = vpack.c.bf16 %v1027_v49, %v1026_v44 }
 0x1e9   : > { %v907_v12 = vadd.f32 1e-05, %v875_v29  ;;  %v4560_v55 = vpop.eup %4559  ;;  %v837_v56 = vpop.xlane.xlu0 %836  ;;  %v968_v52 = vmul.f32 %v4558_v30, %v5634_v3 }
 0x1ea   : > { %v803_v58 = vpop.xlane.xlu1 %802  ;;  %4569 = vrsqrt.f32 %v890_v53  ;;  %v876_v62 = vmul.f32 0.0078125, %v837_v56  ;;  %v1045_v0 = vadd.f32 %v5790_v31, %v1006_v36  ;;  %4133 = vmatprep.mubr.bf16.mxu0 %v1058_v57  ;;  %v951_v59 = vmul.f32 %v4560_v55, %v5627_v60 }
 0x1eb   : > { %v859_v14 = vmul.f32 0.0078125, %v803_v58  ;;  %4571 = vrsqrt.f32 %v907_v12  ;;  %v1007_v33 = vmul.f32 %v5783_v45, %v968_v52  ;;  %v1028_v60 = vadd.f32 %v5790_v31, %v989_v1 }
 0x1ec   : > { %v4562_v2 = vpop.eup %4561  ;;  %v908_v43 = vadd.f32 1e-05, %v876_v62  ;;  %v1067_v24 = vpack.c.bf16 %v1045_v0, %v1044_v22  ;;  %v990_v3 = vmul.f32 %v5783_v45, %v951_v59 }
 0x1ed   : > { %v891_v5 = vadd.f32 1e-05, %v859_v14  ;;  %v4564_v7 = vpop.eup %4563  ;;  %v805_v37 = vpop.xlane.xlu0 %804  ;;  %v952_v40 = vmul.f32 %v4562_v2, %v5647_v35  ;;  %v1046_v20 = vadd.f32 %v5790_v31, %v1007_v33 }
 0x1ee   : > { %v839_v16 = vpop.xlane.xlu1 %838  ;;  %4573 = vrsqrt.f32 %v908_v43  ;;  %v860_v34 = vmul.f32 0.0078125, %v805_v37  ;;  %4150 = vmatmul.mubr.bf16.vlgmr.msra.gmra.mrb[0].mxu1 %v1067_v24  ;;  %v969_v38 = vmul.f32 %v4564_v7, %v5637_v4  ;;  %v1029_v27 = vadd.f32 %v5790_v31, %v990_v3 }
 0x1ef   : > { %v877_v8 = vmul.f32 0.0078125, %v839_v16  ;;  %4575 = vrsqrt.f32 %v891_v5  ;;  %v991_v36 = vmul.f32 %v5783_v45, %v952_v40 }
 0x1f0   : > { %v4566_v18 = vpop.eup %4565  ;;  %v892_v42 = vadd.f32 1e-05, %v860_v34  ;;  %v1008_v46 = vmul.f32 %v5783_v45, %v969_v38  ;;  %v1059_v44 = vpack.c.bf16 %v1029_v27, %v1028_v60 }
 0x1f1   : > { %v909_v51 = vadd.f32 1e-05, %v877_v8  ;;  %v4568_v29 = vpop.eup %4567  ;;  %v841_v48 = vpop.xlane.xlu0 %840  ;;  %v970_v4 = vmul.f32 %v4566_v18, %v5657_v10 }
 0x1f2   : > { %v807_v49 = vpop.xlane.xlu1 %806  ;;  %4577 = vrsqrt.f32 %v892_v42  ;;  %v878_v30 = vmul.f32 0.0078125, %v841_v48  ;;  %v1047_v12 = vadd.f32 %v5790_v31, %v1008_v46  ;;  %4134 = vmatmul.mubr.bf16.vlgmr.msra.gmra.mrb[0].mxu0 %v1059_v44  ;;  %v953_v35 = vmul.f32 %v4568_v29, %v5650_v9 }
 0x1f3   : > { %v861_v53 = vmul.f32 0.0078125, %v807_v49  ;;  %4579 = vrsqrt.f32 %v909_v51  ;;  %v1009_v14 = vmul.f32 %v5783_v45, %v970_v4  ;;  %v1030_v9 = vadd.f32 %v5790_v31, %v991_v36 }
 0x1f4   : > { %v4570_v55 = vpop.eup %4569  ;;  %v910_v56 = vadd.f32 1e-05, %v878_v30  ;;  %v1068_v58 = vpack.c.bf16 %v1047_v12, %v1046_v20  ;;  %v992_v10 = vmul.f32 %v5783_v45, %v953_v35 }
 0x1f5   : > { %v893_v57 = vadd.f32 1e-05, %v861_v53  ;;  %v4572_v22 = vpop.eup %4571  ;;  %v809_v52 = vpop.xlane.xlu0 %808  ;;  %v954_v43 = vmul.f32 %v4570_v55, %v5670_v13  ;;  %v1048_v8 = vadd.f32 %v5790_v31, %v1009_v14 }
 0x1f6   : > { %v843_v62 = vpop.xlane.xlu1 %842  ;;  %4581 = vrsqrt.f32 %v910_v56  ;;  %v862_v0 = vmul.f32 0.0078125, %v809_v52  ;;  %4153 = vmatprep.mubr.bf16.mxu1 %v1068_v58  ;;  %v971_v1 = vmul.f32 %v4572_v22, %v5660_v11  ;;  %v1031_v2 = vadd.f32 %v5790_v31, %v992_v10 }
 0x1f7   : > { %v879_v59 = vmul.f32 0.0078125, %v843_v62  ;;  %4583 = vrsqrt.f32 %v893_v57  ;;  %v993_v40 = vmul.f32 %v5783_v45, %v954_v43 }
 0x1f8   : > { %v4574_v5 = vpop.eup %4573  ;;  %v894_v24 = vadd.f32 1e-05, %v862_v0  ;;  %v1010_v37 = vmul.f32 %v5783_v45, %v971_v1  ;;  %v1060_v33 = vpack.c.bf16 %v1031_v2, %v1030_v9 }
 0x1f9   : > { %v911_v7 = vadd.f32 1e-05, %v879_v59  ;;  %v4576_v16 = vpop.eup %4575  ;;  %v845_v3 = vpop.xlane.xlu0 %844  ;;  %v972_v11 = vmul.f32 %v4574_v5, %v5683_v15 }
 0x1fa   : > { %v811_v34 = vpop.xlane.xlu1 %810  ;;  %4585 = vrsqrt.f32 %v894_v24  ;;  %v880_v38 = vmul.f32 0.0078125, %v845_v3  ;;  %v1049_v27 = vadd.f32 %v5790_v31, %v1010_v37  ;;  %4137 = vmatprep.mubr.bf16.mxu0 %v1060_v33  ;;  %v955_v13 = vmul.f32 %v4576_v16, %v5673_v54 }
 0x1fb   : > { %v863_v60 = vmul.f32 0.0078125, %v811_v34  ;;  %4587 = vrsqrt.f32 %v911_v7  ;;  %v1011_v49 = vmul.f32 %v5783_v45, %v972_v11  ;;  %v1032_v54 = vadd.f32 %v5790_v31, %v993_v40 }
 0x1fc   : > { %v4578_v18 = vpop.eup %4577  ;;  %v912_v42 = vadd.f32 1e-05, %v880_v38  ;;  %v1069_v46 = vpack.c.bf16 %v1049_v27, %v1048_v8  ;;  %v994_v15 = vmul.f32 %v5783_v45, %v955_v13 }
 0x1fd   : > { %v895_v51 = vadd.f32 1e-05, %v863_v60  ;;  %v4580_v29 = vpop.eup %4579  ;;  %v813_v48 = vpop.xlane.xlu0 %812  ;;  %v956_v12 = vmul.f32 %v4578_v18, %v5696_v17  ;;  %v1050_v62 = vadd.f32 %v5790_v31, %v1011_v49 }
 0x1fe   : > { %v847_v44 = vpop.xlane.xlu1 %846  ;;  %4589 = vrsqrt.f32 %v912_v42  ;;  %v864_v20 = vmul.f32 0.0078125, %v813_v48  ;;  %4154 = vmatmul.mubr.bf16.gmra.mrb[4].mxu1 %v1069_v46  ;;  %v973_v30 = vmul.f32 %v4580_v29, %v5686_v63  ;;  %v1033_v53 = vadd.f32 %v5790_v31, %v994_v15 }
 0x1ff   : > { %v881_v4 = vmul.f32 0.0078125, %v847_v44  ;;  %4591 = vrsqrt.f32 %v895_v51  ;;  %v995_v59 = vmul.f32 %v5783_v45, %v956_v12 }
 0x200   : > { %v4582_v35 = vpop.eup %4581  ;;  %v896_v36 = vadd.f32 1e-05, %v864_v20  ;;  %v1012_v56 = vmul.f32 %v5783_v45, %v973_v30  ;;  %v1061_v22 = vpack.c.bf16 %v1033_v53, %v1032_v54 }
 0x201   : > { %v913_v55 = vadd.f32 1e-05, %v881_v4  ;;  %v4584_v57 = vpop.eup %4583  ;;  %v849_v58 = vpop.xlane.xlu0 %848  ;;  %v974_v63 = vmul.f32 %v4582_v35, %v5709_v19  ;;  %v1034_v34 = vadd.f32 %v5790_v31, %v995_v59 }
 0x202   : > { %v815_v52 = vpop.xlane.xlu1 %814  ;;  %4593 = vrsqrt.f32 %v896_v36  ;;  %v882_v10 = vmul.f32 0.0078125, %v849_v58  ;;  %v1051_v0 = vadd.f32 %v5790_v31, %v1012_v56  ;;  %4138 = vmatmul.mubr.bf16.gmra.mrb[4].mxu0 %v1061_v22  ;;  %v957_v17 = vmul.f32 %v4584_v57, %v5699_v32 }
 0x203   : > { %v865_v14 = vmul.f32 0.0078125, %v815_v52  ;;  %4595 = vrsqrt.f32 %v913_v55  ;;  %v1013_v37 = vmul.f32 %v5783_v45, %v974_v63 }
 0x204   : > { %v4586_v1 = vpop.eup %4585  ;;  %v914_v9 = vadd.f32 1e-05, %v882_v10  ;;  %v1070_v43 = vpack.c.bf16 %v1051_v0, %v1050_v62  ;;  %v996_v19 = vmul.f32 %v5783_v45, %v957_v17 }
 0x205   : > { %v897_v2 = vadd.f32 1e-05, %v865_v14  ;;  %v4588_v5 = vpop.eup %4587  ;;  %v817_v24 = vpop.xlane.xlu0 %816  ;;  %v958_v16 = vmul.f32 %v4586_v1, %v5722_v21  ;;  %v1052_v21 = vadd.f32 %v5790_v31, %v1013_v37 }
 0x206   : > { %v851_v7 = vpop.xlane.xlu1 %850  ;;  %4597 = vrsqrt.f32 %v914_v9  ;;  %v866_v3 = vmul.f32 0.0078125, %v817_v24  ;;  %4157 = vmatprep.mubr.bf16.mxu1 %v1070_v43  ;;  %v975_v32 = vmul.f32 %v4588_v5, %v5712_v41  ;;  %v1035_v8 = vadd.f32 %v5790_v31, %v996_v19 }
 0x207   : > { %v883_v33 = vmul.f32 0.0078125, %v851_v7  ;;  %4599 = vrsqrt.f32 %v897_v2  ;;  %v997_v42 = vmul.f32 %v5783_v45, %v958_v16 }
 0x208   : > { %v4590_v11 = vpop.eup %4589  ;;  %v898_v38 = vadd.f32 1e-05, %v866_v3  ;;  %v1014_v27 = vmul.f32 %v5783_v45, %v975_v32  ;;  %v1062_v40 = vpack.c.bf16 %v1035_v8, %v1034_v34 }
 0x209   : > { %v915_v60 = vadd.f32 1e-05, %v883_v33  ;;  %v4592_v13 = vpop.eup %4591  ;;  %v976_v51 = vmul.f32 %v4590_v11, %v5735_v23  ;;  %v1036_v4 = vadd.f32 %v5790_v31, %v997_v42 }
 0x20a   : > { %v819_v18 = vpop.xlane.xlu1 %818  ;;  %4601 = vrsqrt.f32 %v898_v38  ;;  %v1053_v46 = vadd.f32 %v5790_v31, %v1014_v27  ;;  %v959_v29 = vmul.f32 %v4592_v13, %v5725_v50  ;;  %4141 = vmatprep.mubr.bf16.mxu0 %v1062_v40 }
 0x20b   : > { %v867_v41 = vmul.f32 0.0078125, %v819_v18  ;;  %4603 = vrsqrt.f32 %v915_v60  ;;  %v1015_v30 = vmul.f32 %v5783_v45, %v976_v51 }
 0x20c   : > { %v4594_v48 = vpop.eup %4593  ;;  %v1071_v15 = vpack.c.bf16 %v1053_v46, %v1052_v21  ;;  %v998_v49 = vmul.f32 %v5783_v45, %v959_v29 }
 0x20d   : > { %v899_v44 = vadd.f32 1e-05, %v867_v41  ;;  %v4596_v20 = vpop.eup %4595  ;;  %v960_v50 = vmul.f32 %v4594_v48, %v5748_v25  ;;  %v1054_v55 = vadd.f32 %v5790_v31, %v1015_v30 }
 0x20e   : > { %4158 = vmatmul.mubr.bf16.gmra.mrb[8].mxu1 %v1071_v15  ;;  %v1037_v23 = vadd.f32 %v5790_v31, %v998_v49  ;;  %v977_v54 = vmul.f32 %v4596_v20, %v5738_v61 }
 0x20f   : > { %4605 = vrsqrt.f32 %v899_v44  ;;  %v999_v58 = vmul.f32 %v5783_v45, %v960_v50 }
 0x210   : > { %v4598_v53 = vpop.eup %4597  ;;  %v1063_v12 = vpack.c.bf16 %v1037_v23, %v1036_v4  ;;  %v1016_v35 = vmul.f32 %v5783_v45, %v977_v54 }
 0x211   : > { %v4600_v36 = vpop.eup %4599  ;;  %v978_v22 = vmul.f32 %v4598_v53, %v5758_v39  ;;  %v1038_v10 = vadd.f32 %v5790_v31, %v999_v58 }
 0x212   : > { %4142 = vmatmul.mubr.bf16.gmra.mrb[8].mxu0 %v1063_v12  ;;  %v1055_v56 = vadd.f32 %v5790_v31, %v1016_v35  ;;  %v961_v57 = vmul.f32 %v4600_v36, %v5751_v6 }
 0x213   : > { %v1017_v6 = vmul.f32 %v5783_v45, %v978_v22 }
 0x214   : > { %v4602_v52 = vpop.eup %4601  ;;  %v1072_v61 = vpack.c.bf16 %v1055_v56, %v1054_v55  ;;  %v1000_v25 = vmul.f32 %v5783_v45, %v961_v57 }
 0x215   : > { %v4604_v62 = vpop.eup %4603  ;;  %v962_v63 = vmul.f32 %v4602_v52, %v5768_v47  ;;  %v1056_v47 = vadd.f32 %v5790_v31, %v1017_v6 }
 0x216   : > { %4161 = vmatprep.mubr.bf16.mxu1 %v1072_v61  ;;  %v1039_v14 = vadd.f32 %v5790_v31, %v1000_v25  ;;  %v979_v0 = vmul.f32 %v4604_v62, %v5761_v26 }
 0x217   : > { %v1001_v9 = vmul.f32 %v5783_v45, %v962_v63 }
 0x218   : > { %v1064_v59 = vpack.c.bf16 %v1039_v14, %v1038_v10  ;;  %v1018_v39 = vmul.f32 %v5783_v45, %v979_v0 }
 0x219   : > { %v4606_v17 = vpop.eup %4605  ;;  %v1040_v26 = vadd.f32 %v5790_v31, %v1001_v9 }
 0x21a   : > { %v963_v1 = vmul.f32 %v4606_v17, %v5771_v28  ;;  %4145 = vmatprep.mubr.bf16.mxu0 %v1064_v59  ;;  %v1057_v2 = vadd.f32 %v5790_v31, %v1018_v39  ;;  %v5888_v28 = vld [vmem:[%s7536_s8] ss:$0 sm:$0xff] }
 0x21c   : > { %v1002_v43 = vmul.f32 %v5783_v45, %v963_v1  ;;  %v1073_v5 = vpack.c.bf16 %v1057_v2, %v1056_v47 }
 0x21e   : > { %v1041_v24 = vadd.f32 %v5790_v31, %v1002_v43  ;;  %4162 = vmatmul.mubr.bf16.gmra.mrb[12].mxu1 %v1073_v5 }
 0x220   : > { %v1065_v7 = vpack.c.bf16 %v1041_v24, %v1040_v26 }
 0x222   : > { %4146 = vmatmul.mubr.bf16.gmra.mrb[12].mxu0 %v1065_v7 }
 0x2c1   : > { %v4151_v19 = vpop.f32.mrb[0].mxu1 }
 0x2c2   : > { %v5891_v37 = vadd.f32 %v4151_v19, %v5888_v28  ;;  %v1243_v16 = vpop.f32.mrb[1].mxu1 }
 0x2c3   : > { %v5894_v45 = vadd.f32 %v5888_v28, %v1243_v16  ;;  %v4152_v3 = vpop.f32.mrb[2].mxu1 }
 0x2c4   : > { %v1324_v31 = vmul.f32 %v5891_v37, %v5891_v37  ;;  %v5899_v33 = vadd.f32 %v4152_v3, %v5888_v28  ;;  %v1246_v32 = vpop.f32.mrb[3].mxu1 }
 0x2c5   : > { %v1322_v34 = vmul.f32 %v5894_v45, %v5894_v45  ;;  %v5904_v8 = vadd.f32 %v5888_v28, %v1246_v32  ;;  %v4135_v60 = vpop.f32.mrb[0].mxu0 }
 0x2c6   : > { %v1356_v11 = vmul.f32 %v1324_v31, %v5891_v37  ;;  %v1325_v38 = vmul.f32 %v5899_v33, %v5899_v33  ;;  %v5913_v40 = vadd.f32 %v4135_v60, %v5888_v28  ;;  %v1179_v18 = vpop.f32.mrb[1].mxu0 }
 0x2c7   : > { %v1354_v27 = vmul.f32 %v1322_v34, %v5894_v45  ;;  %v1323_v13 = vmul.f32 %v5904_v8, %v5904_v8  ;;  %v5917_v51 = vadd.f32 %v5888_v28, %v1179_v18  ;;  %v4136_v41 = vpop.f32.mrb[2].mxu0 }
 0x2c8   : > { %v1388_v21 = vmul.f32 0.044715, %v1356_v11  ;;  %v1357_v42 = vmul.f32 %v1325_v38, %v5899_v33  ;;  %v1308_v48 = vmul.f32 %v5913_v40, %v5913_v40  ;;  %v5923_v44 = vadd.f32 %v4136_v41, %v5888_v28  ;;  %v1182_v15 = vpop.f32.mrb[3].mxu0 }
 0x2c9   : > { %v1386_v46 = vmul.f32 0.044715, %v1354_v27  ;;  %v1355_v29 = vmul.f32 %v1323_v13, %v5904_v8  ;;  %v1306_v4 = vmul.f32 %v5917_v51, %v5917_v51  ;;  %v5929_v30 = vadd.f32 %v5888_v28, %v1182_v15 }
 0x2ca   : > { %v1420_v49 = vadd.f32 %v1388_v21, %v5891_v37  ;;  %v1389_v20 = vmul.f32 0.044715, %v1357_v42  ;;  %v1340_v50 = vmul.f32 %v1308_v48, %v5913_v40  ;;  %v1309_v53 = vmul.f32 %v5923_v44, %v5923_v44 }
 0x2cb   : > { %v1418_v23 = vadd.f32 %v1386_v46, %v5894_v45  ;;  %v1387_v54 = vmul.f32 0.044715, %v1355_v29  ;;  %v1338_v35 = vmul.f32 %v1306_v4, %v5917_v51  ;;  %v1307_v36 = vmul.f32 %v5929_v30, %v5929_v30 }
 0x2cc   : > { %v1421_v12 = vadd.f32 %v1389_v20, %v5899_v33  ;;  %v1452_v55 = vmul.f32 0.7978846, %v1420_v49  ;;  %v1372_v57 = vmul.f32 0.044715, %v1340_v50  ;;  %v1341_v58 = vmul.f32 %v1309_v53, %v5923_v44 }
 0x2cd   : > { %v1419_v56 = vadd.f32 %v1387_v54, %v5904_v8  ;;  %v1450_v22 = vmul.f32 0.7978846, %v1418_v23  ;;  %v1370_v52 = vmul.f32 0.044715, %v1338_v35  ;;  %v1339_v61 = vmul.f32 %v1307_v36, %v5929_v30 }
 0x2ce   : > { %v1453_v25 = vmul.f32 0.7978846, %v1421_v12  ;;  %v1404_v62 = vadd.f32 %v1372_v57, %v5913_v40  ;;  %v1373_v63 = vmul.f32 0.044715, %v1341_v58  ;;  %4607 = vtanh.f32 %v1452_v55 }
 0x2cf   : > { %v1451_v10 = vmul.f32 0.7978846, %v1419_v56  ;;  %v1402_v14 = vadd.f32 %v1370_v52, %v5917_v51  ;;  %v1371_v0 = vmul.f32 0.044715, %v1339_v61  ;;  %4609 = vtanh.f32 %v1450_v22 }
 0x2d0   : > { %v1436_v6 = vmul.f32 0.7978846, %v1404_v62  ;;  %v1405_v17 = vadd.f32 %v1373_v63, %v5923_v44  ;;  %4611 = vtanh.f32 %v1453_v25 }
 0x2d1   : > { %v4155_v59 = vpop.f32.mrb[4].mxu1  ;;  %v1434_v39 = vmul.f32 0.7978846, %v1402_v14  ;;  %v1403_v1 = vadd.f32 %v1371_v0, %v5929_v30  ;;  %4613 = vtanh.f32 %v1451_v10 }
 0x2d2   : > { %v5947_v9 = vadd.f32 %v4155_v59, %v5888_v28  ;;  %v1259_v47 = vpop.f32.mrb[5].mxu1  ;;  %v1437_v2 = vmul.f32 0.7978846, %v1405_v17  ;;  %4615 = vtanh.f32 %v1436_v6 }
 0x2d3   : > { %v5950_v43 = vadd.f32 %v5888_v28, %v1259_v47  ;;  %v4156_v5 = vpop.f32.mrb[6].mxu1  ;;  %v1435_v26 = vmul.f32 0.7978846, %v1403_v1  ;;  %4617 = vtanh.f32 %v1434_v39 }
 0x2d4   : > { %v1328_v24 = vmul.f32 %v5947_v9, %v5947_v9  ;;  %v5955_v7 = vadd.f32 %v4156_v5, %v5888_v28  ;;  %v1262_v19 = vpop.f32.mrb[7].mxu1  ;;  %4619 = vtanh.f32 %v1437_v2 }
 0x2d5   : > { %v1326_v16 = vmul.f32 %v5950_v43, %v5950_v43  ;;  %v5960_v3 = vadd.f32 %v5888_v28, %v1262_v19  ;;  %v4139_v34 = vpop.f32.mrb[4].mxu0  ;;  %4621 = vtanh.f32 %v1435_v26 }
 0x2d6   : > { %v1360_v31 = vmul.f32 %v1328_v24, %v5947_v9  ;;  %v1329_v32 = vmul.f32 %v5955_v7, %v5955_v7  ;;  %v5969_v60 = vadd.f32 %v4139_v34, %v5888_v28  ;;  %v1195_v27 = vpop.f32.mrb[5].mxu0 }
 0x2d7   : > { %v1358_v11 = vmul.f32 %v1326_v16, %v5950_v43  ;;  %v1327_v38 = vmul.f32 %v5960_v3, %v5960_v3  ;;  %v5973_v21 = vadd.f32 %v5888_v28, %v1195_v27  ;;  %v4140_v42 = vpop.f32.mrb[6].mxu0 }
 0x2d8   : > { %v1392_v13 = vmul.f32 0.044715, %v1360_v31  ;;  %v1361_v18 = vmul.f32 %v1329_v32, %v5955_v7  ;;  %v1312_v29 = vmul.f32 %v5969_v60, %v5969_v60  ;;  %v5979_v48 = vadd.f32 %v4140_v42, %v5888_v28  ;;  %v1198_v15 = vpop.f32.mrb[7].mxu0  ;;  %v4608_v54 = vpop.eup %4607 }
 0x2d9   : > { %v1390_v41 = vmul.f32 0.044715, %v1358_v11  ;;  %v1359_v46 = vmul.f32 %v1327_v38, %v5960_v3  ;;  %v1310_v4 = vmul.f32 %v5973_v21, %v5973_v21  ;;  %v5985_v23 = vadd.f32 %v5888_v28, %v1198_v15  ;;  %v4610_v36 = vpop.eup %4609 }
 0x2da   : > { %v1424_v49 = vadd.f32 %v1392_v13, %v5947_v9  ;;  %v1393_v20 = vmul.f32 0.044715, %v1361_v18  ;;  %v1344_v12 = vmul.f32 %v1312_v29, %v5969_v60  ;;  %v1313_v35 = vmul.f32 %v5979_v48, %v5979_v48  ;;  %v4612_v22 = vpop.eup %4611 }
 0x2db   : > { %v1422_v50 = vadd.f32 %v1390_v41, %v5950_v43  ;;  %v1391_v53 = vmul.f32 0.044715, %v1359_v46  ;;  %v1342_v57 = vmul.f32 %v1310_v4, %v5973_v21  ;;  %v1311_v58 = vmul.f32 %v5985_v23, %v5985_v23  ;;  %v4614_v63 = vpop.eup %4613 }
 0x2dc   : > { %v1456_v55 = vmul.f32 0.7978846, %v1424_v49  ;;  %v1425_v56 = vadd.f32 %v1393_v20, %v5955_v7  ;;  %v1376_v25 = vmul.f32 0.044715, %v1344_v12  ;;  %v1345_v62 = vmul.f32 %v1313_v35, %v5979_v48  ;;  %v5998_v6 = vpop.eup %4615 }
 0x2dd   : > { %v1454_v52 = vmul.f32 0.7978846, %v1422_v50  ;;  %v1423_v61 = vadd.f32 %v1391_v53, %v5960_v3  ;;  %v1374_v14 = vmul.f32 0.044715, %v1342_v57  ;;  %v1343_v0 = vmul.f32 %v1311_v58, %v5985_v23  ;;  %v6001_v1 = vpop.eup %4617 }
 0x2de   : > { %4623 = vtanh.f32 %v1456_v55  ;;  %v1457_v10 = vmul.f32 0.7978846, %v1425_v56  ;;  %v1408_v59 = vadd.f32 %v1376_v25, %v5969_v60  ;;  %v1377_v39 = vmul.f32 0.044715, %v1345_v62  ;;  %v6004_v26 = vpop.eup %4619 }
 0x2df   : > { %4625 = vtanh.f32 %v1454_v52  ;;  %v1455_v17 = vmul.f32 0.7978846, %v1423_v61  ;;  %v1406_v47 = vadd.f32 %v1374_v14, %v5973_v21  ;;  %v1375_v2 = vmul.f32 0.044715, %v1343_v0  ;;  %v6007_v32 = vpop.eup %4621 }
 0x2e0   : > { %4627 = vtanh.f32 %v1457_v10  ;;  %v1516_v5 = vadd.f32 1.0, %v4608_v54  ;;  %v1440_v24 = vmul.f32 0.7978846, %v1408_v59  ;;  %v1409_v19 = vadd.f32 %v1377_v39, %v5979_v48 }
 0x2e1   : > { %4629 = vtanh.f32 %v1455_v17  ;;  %v4159_v16 = vpop.f32.mrb[8].mxu1  ;;  %v1517_v31 = vadd.f32 1.0, %v4612_v22  ;;  %v1438_v34 = vmul.f32 0.7978846, %v1406_v47  ;;  %v1407_v11 = vadd.f32 %v1375_v2, %v5985_v23 }
 0x2e2   : > { %v6011_v38 = vadd.f32 %v4159_v16, %v5888_v28  ;;  %v1275_v27 = vpop.f32.mrb[9].mxu1  ;;  %v1548_v13 = vmul.f32 0.5, %v1516_v5  ;;  %4631 = vtanh.f32 %v1440_v24  ;;  %v1441_v18 = vmul.f32 0.7978846, %v1409_v19 }
 0x2e3   : > { %v6014_v42 = vadd.f32 %v5888_v28, %v1275_v27  ;;  %v1549_v41 = vmul.f32 0.5, %v1517_v31  ;;  %v4160_v46 = vpop.f32.mrb[10].mxu1  ;;  %4633 = vtanh.f32 %v1438_v34  ;;  %v1439_v29 = vmul.f32 0.7978846, %v1407_v11 }
 0x2e4   : > { %v1332_v15 = vmul.f32 %v6011_v38, %v6011_v38  ;;  %v1580_v49 = vmul.f32 %v1548_v13, %v5891_v37  ;;  %v1278_v20 = vpop.f32.mrb[11].mxu1  ;;  %4635 = vtanh.f32 %v1441_v18  ;;  %v6023_v50 = vadd.f32 %v4160_v46, %v5888_v28 }
 0x2e5   : > { %v1330_v4 = vmul.f32 %v6014_v42, %v6014_v42  ;;  %v1581_v54 = vmul.f32 %v1549_v41, %v5899_v33  ;;  %v4143_v53 = vpop.f32.mrb[8].mxu0  ;;  %4637 = vtanh.f32 %v1439_v29  ;;  %v1514_v35 = vadd.f32 1.0, %v4610_v36 }
 0x2e6   : > { %v1364_v12 = vmul.f32 %v1332_v15, %v6011_v38  ;;  %v1515_v55 = vadd.f32 1.0, %v4614_v63  ;;  %v1211_v56 = vpop.f32.mrb[9].mxu0  ;;  %v1333_v22 = vmul.f32 %v6023_v50, %v6023_v50  ;;  %v6032_v10 = vadd.f32 %v5888_v28, %v1278_v20 }
 0x2e7   : > { %v1362_v57 = vmul.f32 %v1330_v4, %v6014_v42  ;;  %v4460_v37 = vpack.i.bf16 %v1581_v54, %v1580_v49  ;;  %v1603_v58 = vpack.c.bf16 %v1581_v54, %v1580_v49  ;;  %v4144_v52 = vpop.f32.mrb[10].mxu0  ;;  %v1546_v25 = vmul.f32 0.5, %v1514_v35 }
 0x2e8   : > { %v6029_v61 = vpop.eup %4623  ;;  %v1396_v33 = vmul.f32 0.044715, %v1364_v12  ;;  %v1547_v62 = vmul.f32 0.5, %v1515_v55  ;;  %v1214_v14 = vpop.f32.mrb[11].mxu0  ;;  %v1365_v0 = vmul.f32 %v1333_v22, %v6023_v50  ;;  %v6040_v17 = vadd.f32 %v4143_v53, %v5888_v28 }
 0x2e9   : > { %v6034_v36 = vpop.eup %4625  ;;  %v1394_v63 = vmul.f32 0.044715, %v1362_v57  ;;  %4461 = vrot.lane.b32.xlu1 %v4460_v37, %s5148_s16  ;;  %1624 = vst.msk [vmem:[#allocation2 + $0x48] sm:$0xff] %vm1614_vm0, %v1603_v58  ;;  %v6043_v59 = vadd.f32 %v5888_v28, %v1211_v56  ;;  %v1578_v2 = vmul.f32 %v1546_v25, %v5894_v45  ;;  %v1331_v24 = vmul.f32 %v6032_v10, %v6032_v10 }
 0x2ea   : > { %v6045_v39 = vpop.eup %4627  ;;  %v1428_v47 = vadd.f32 %v1396_v33, %v6011_v38  ;;  %v1579_v5 = vmul.f32 %v1547_v62, %v5904_v8  ;;  %v1397_v31 = vmul.f32 0.044715, %v1365_v0  ;;  %v1316_v34 = vmul.f32 %v6040_v17, %v6040_v17 }
 0x2eb   : > { %v6052_v19 = vpop.eup %4629  ;;  %v1426_v16 = vadd.f32 %v1394_v63, %v6014_v42  ;;  %v1314_v11 = vmul.f32 %v6043_v59, %v6043_v59  ;;  %v1363_v45 = vmul.f32 %v1331_v24, %v6032_v10  ;;  %v6070_v4 = vadd.f32 %v4144_v52, %v5888_v28 }
 0x2ec   : > { %v1460_v27 = vmul.f32 0.7978846, %v1428_v47  ;;  %v4455_v13 = vpack.i.bf16 %v1579_v5, %v1578_v2  ;;  %v1602_v18 = vpack.c.bf16 %v1579_v5, %v1578_v2  ;;  %v6060_v8 = vpop.eup %4631  ;;  %v1429_v46 = vadd.f32 %v1397_v31, %v6023_v50 }
 0x2ed   : > { %v1458_v41 = vmul.f32 0.7978846, %v1426_v16  ;;  %v1348_v29 = vmul.f32 %v1316_v34, %v6040_v17  ;;  %v1346_v15 = vmul.f32 %v1314_v11, %v6043_v59  ;;  %v6065_v49 = vpop.eup %4633  ;;  %v1395_v20 = vmul.f32 0.044715, %v1363_v45 }
 0x2ee   : > { %4639 = vtanh.f32 %v1460_v27  ;;  %4456 = vrot.lane.b32.xlu0 %v4455_v13, %s5148_s16  ;;  %1623 = vst.msk [vmem:[#allocation2 + $0x40] sm:$0xff] %vm1614_vm0, %v1602_v18  ;;  %v1498_v54 = vadd.f32 1.0, %v6001_v1  ;;  %v6073_v53 = vpop.eup %4635  ;;  %v1461_v12 = vmul.f32 0.7978846, %v1429_v46  ;;  %v1317_v37 = vmul.f32 %v6070_v4, %v6070_v4 }
 0x2ef   : > { %4641 = vtanh.f32 %v1458_v41  ;;  %v1380_v35 = vmul.f32 0.044715, %v1348_v29  ;;  %v1378_v55 = vmul.f32 0.044715, %v1346_v15  ;;  %v6075_v56 = vpop.eup %4637  ;;  %v1427_v57 = vadd.f32 %v1395_v20, %v6032_v10 }
 0x2f0   : > { %v1499_v58 = vadd.f32 1.0, %v6007_v32  ;;  %v1530_v22 = vmul.f32 0.5, %v1498_v54  ;;  %4643 = vtanh.f32 %v1461_v12  ;;  %v6084_v33 = vadd.f32 %v5888_v28, %v1214_v14 }
 0x2f1   : > { %v1412_v52 = vadd.f32 %v1380_v35, %v6040_v17  ;;  %v1410_v1 = vadd.f32 %v1378_v55, %v6043_v59  ;;  %v4163_v25 = vpop.f32.mrb[12].mxu1  ;;  %v1459_v62 = vmul.f32 0.7978846, %v1427_v57  ;;  %v1349_v63 = vmul.f32 %v1317_v37, %v6070_v4 }
 0x2f2   : > { %v1531_v0 = vmul.f32 0.5, %v1499_v58  ;;  %v1562_v47 = vmul.f32 %v1530_v22, %v5917_v51  ;;  %v1291_v2 = vpop.f32.mrb[13].mxu1  ;;  %v1315_v32 = vmul.f32 %v6084_v33, %v6084_v33  ;;  %v1500_v16 = vadd.f32 1.0, %v5998_v6 }
 0x2f3   : > { %v1444_v5 = vmul.f32 0.7978846, %v1412_v52  ;;  %v1442_v24 = vmul.f32 0.7978846, %v1410_v1  ;;  %v4164_v31 = vpop.f32.mrb[14].mxu1  ;;  %4645 = vtanh.f32 %v1459_v62  ;;  %v1501_v11 = vadd.f32 1.0, %v6004_v26 }
 0x2f4   : > { %v1381_v34 = vmul.f32 0.044715, %v1349_v63  ;;  %v1563_v14 = vmul.f32 %v1531_v0, %v5929_v30  ;;  %v1294_v27 = vpop.f32.mrb[15].mxu1  ;;  %v1347_v51 = vmul.f32 %v1315_v32, %v6084_v33  ;;  %v1532_v18 = vmul.f32 0.5, %v1500_v16 }
 0x2f5   : > { %v4147_v13 = vpop.f32.mrb[12].mxu0  ;;  %4647 = vtanh.f32 %v1444_v5  ;;  %v6095_v45 = vadd.f32 %v4163_v25, %v5888_v28  ;;  %v1533_v30 = vmul.f32 0.5, %v1501_v11  ;;  %v6108_v57 = vadd.f32 %v5888_v28, %v1291_v2 }
 0x2f6   : > { %v1227_v41 = vpop.f32.mrb[13].mxu0  ;;  %4649 = vtanh.f32 %v1442_v24  ;;  %v1413_v6 = vadd.f32 %v1381_v34, %v6070_v4  ;;  %v4465_v46 = vpack.i.bf16 %v1563_v14, %v1562_v47  ;;  %v1594_v29 = vpack.c.bf16 %v1563_v14, %v1562_v47 }
 0x2f7   : > { %v4148_v15 = vpop.f32.mrb[14].mxu0  ;;  %v1379_v20 = vmul.f32 0.044715, %v1347_v51  ;;  %v1564_v26 = vmul.f32 %v1532_v18, %v5913_v40  ;;  %v1336_v54 = vmul.f32 %v6095_v45, %v6095_v45  ;;  %v6111_v37 = vadd.f32 %v4164_v31, %v5888_v28 }
 0x2f8   : > { %v6101_v12 = vpop.f32.mrb[15].mxu0  ;;  %v6103_v35 = vpop.eup %4639  ;;  %v1445_v55 = vmul.f32 0.7978846, %v1413_v6  ;;  %4466 = vrot.lane.b32.xlu1 %v4465_v46, %s5148_s16  ;;  %1615 = vst.msk [vmem:[#allocation2] sm:$0xff] %vm1614_vm0, %v1594_v29  ;;  %v1518_v40 = vadd.f32 1.0, %v6034_v36  ;;  %v1565_v52 = vmul.f32 %v1533_v30, %v5923_v44  ;;  %v1519_v25 = vadd.f32 1.0, %v6052_v19 }
 0x2f9   : > { %v6114_v58 = vpop.eup %4641  ;;  %v1411_v22 = vadd.f32 %v1379_v20, %v6084_v33  ;;  %v1368_v1 = vmul.f32 %v1336_v54, %v6095_v45  ;;  %v1334_v62 = vmul.f32 %v6108_v57, %v6108_v57  ;;  %v1337_v63 = vmul.f32 %v6111_v37, %v6111_v37 }
 0x2fa   : > { %4651 = vtanh.f32 %v1445_v55  ;;  %v1550_v0 = vmul.f32 0.5, %v1518_v40  ;;  %v6124_v47 = vpop.eup %4643  ;;  %v4470_v2 = vpack.i.bf16 %v1565_v52, %v1564_v26  ;;  %v1595_v5 = vpack.c.bf16 %v1565_v52, %v1564_v26 }
 0x2fb   : > { %v1443_v36 = vmul.f32 0.7978846, %v1411_v22  ;;  %v1400_v24 = vmul.f32 0.044715, %v1368_v1  ;;  %v1366_v44 = vmul.f32 %v1334_v62, %v6108_v57  ;;  %v1369_v32 = vmul.f32 %v1337_v63, %v6111_v37 }
 0x2fc   : > { %v1551_v16 = vmul.f32 0.5, %v1519_v25  ;;  %v1582_v19 = vmul.f32 %v1550_v0, %v5950_v43  ;;  %1616 = vst.msk [vmem:[#allocation2 + $0x8] sm:$0xff] %vm1614_vm0, %v1595_v5  ;;  %4471 = vrot.lane.b32.xlu1 %v4470_v2, %s5148_s16  ;;  %v6133_v34 = vadd.f32 %v5888_v28, %v1294_v27  ;;  %v6136_v14 = vadd.f32 %v4147_v13, %v5888_v28 }
 0x2fd   : > { %4653 = vtanh.f32 %v1443_v36  ;;  %v1432_v31 = vadd.f32 %v1400_v24, %v6095_v45  ;;  %v6138_v11 = vpop.eup %4645  ;;  %v1398_v51 = vmul.f32 0.044715, %v1366_v44  ;;  %v1401_v18 = vmul.f32 0.044715, %v1369_v32 }
 0x2fe   : > { %v1583_v6 = vmul.f32 %v1551_v16, %v5960_v3  ;;  %v6142_v43 = vadd.f32 %v5888_v28, %v1227_v41  ;;  %v1335_v20 = vmul.f32 %v6133_v34, %v6133_v34  ;;  %v1320_v27 = vmul.f32 %v6136_v14, %v6136_v14 }
 0x2ff   : > { %v6144_v46 = vpop.eup %4647  ;;  %v1464_v29 = vmul.f32 0.7978846, %v1432_v31  ;;  %v6151_v13 = vadd.f32 %v4148_v15, %v5888_v28  ;;  %v1430_v26 = vadd.f32 %v1398_v51, %v6108_v57  ;;  %v1433_v3 = vadd.f32 %v1401_v18, %v6111_v37 }
 0x300   : > { %v6153_v30 = vpop.eup %4649  ;;  %v4475_v41 = vpack.i.bf16 %v1583_v6, %v1582_v19  ;;  %v1604_v54 = vpack.c.bf16 %v1583_v6, %v1582_v19  ;;  %v1367_v55 = vmul.f32 %v1335_v20, %v6133_v34  ;;  %v1352_v40 = vmul.f32 %v1320_v27, %v6136_v14 }
 0x301   : > { %4655 = vtanh.f32 %v1464_v29  ;;  %v1318_v22 = vmul.f32 %v6142_v43, %v6142_v43  ;;  %v1462_v52 = vmul.f32 0.7978846, %v1430_v26  ;;  %v1465_v1 = vmul.f32 0.7978846, %v1433_v3 }
 0x302   : > { %4476 = vrot.lane.b32.xlu0 %v4475_v41, %s5148_s16  ;;  %1625 = vst.msk [vmem:[#allocation2 + $0x50] sm:$0xff] %vm1614_vm0, %v1604_v54  ;;  %v1321_v15 = vmul.f32 %v6151_v13, %v6151_v13  ;;  %v1520_v25 = vadd.f32 1.0, %v6029_v61  ;;  %v1399_v62 = vmul.f32 0.044715, %v1367_v55  ;;  %v1384_v63 = vmul.f32 0.044715, %v1352_v40 }
 0x303   : > { %v1350_v0 = vmul.f32 %v1318_v22, %v6142_v43  ;;  %v1521_v36 = vadd.f32 1.0, %v6045_v39  ;;  %4657 = vtanh.f32 %v1462_v52  ;;  %v1502_v44 = vadd.f32 1.0, %v6065_v49 }
 0x304   : > { %v6168_v2 = vpop.eup %4651  ;;  %v1353_v5 = vmul.f32 %v1321_v15, %v6151_v13  ;;  %v1552_v24 = vmul.f32 0.5, %v1520_v25  ;;  %4659 = vtanh.f32 %v1465_v1  ;;  %v1431_v32 = vadd.f32 %v1399_v62, %v6133_v34 }
 0x305   : > { %v1416_v16 = vadd.f32 %v1384_v63, %v6136_v14  ;;  %v1382_v61 = vmul.f32 0.044715, %v1350_v0  ;;  %v1553_v31 = vmul.f32 0.5, %v1521_v36  ;;  %v1503_v39 = vadd.f32 1.0, %v6075_v56 }
 0x306   : > { %v1385_v19 = vmul.f32 0.044715, %v1353_v5  ;;  %v1584_v51 = vmul.f32 %v1552_v24, %v5947_v9  ;;  %v1463_v6 = vmul.f32 0.7978846, %v1431_v32  ;;  %v1534_v27 = vmul.f32 0.5, %v1502_v44 }
 0x307   : > { %v4654_v18 = vpop.eup %4653  ;;  %v1448_v29 = vmul.f32 0.7978846, %v1416_v16  ;;  %v1414_v20 = vadd.f32 %v1382_v61, %v6142_v43  ;;  %v1585_v26 = vmul.f32 %v1553_v31, %v5955_v7  ;;  %v1535_v3 = vmul.f32 0.5, %v1503_v39 }
 0x308   : > { %v1417_v49 = vadd.f32 %v1385_v19, %v6151_v13  ;;  %v6181_v41 = vadd.f32 %v5888_v28, %v6101_v12  ;;  %4661 = vtanh.f32 %v1463_v6  ;;  %v1566_v9 = vmul.f32 %v1534_v27, %v5973_v21 }
 0x309   : > { %v1446_v54 = vmul.f32 0.7978846, %v1414_v20  ;;  %v1504_v56 = vadd.f32 1.0, %v6060_v8  ;;  %4663 = vtanh.f32 %v1448_v29  ;;  %v4480_v40 = vpack.i.bf16 %v1585_v26, %v1584_v51 }
 0x30a   : > { %v1449_v55 = vmul.f32 0.7978846, %v1417_v49  ;;  %v1605_v22 = vpack.c.bf16 %v1585_v26, %v1584_v51  ;;  %v1567_v7 = vmul.f32 %v1535_v3, %v5985_v23  ;;  %v1319_v1 = vmul.f32 %v6181_v41, %v6181_v41 }
 0x30b   : > { %v6185_v52 = vpop.eup %4655  ;;  %4665 = vtanh.f32 %v1446_v54  ;;  %v1505_v28 = vadd.f32 1.0, %v6073_v53  ;;  %4481 = vrot.lane.b32.xlu0 %v4480_v40, %s5148_s16  ;;  %v1536_v21 = vmul.f32 0.5, %v1504_v56  ;;  %v1522_v8 = vadd.f32 1.0, %v6114_v58 }
 0x30c   : > { %4667 = vtanh.f32 %v1449_v55  ;;  %1626 = vst.msk [vmem:[#allocation2 + $0x58] sm:$0xff] %vm1614_vm0, %v1605_v22  ;;  %v1523_v12 = vadd.f32 1.0, %v6138_v11  ;;  %v4485_v15 = vpack.i.bf16 %v1567_v7, %v1566_v9  ;;  %v1596_v25 = vpack.c.bf16 %v1567_v7, %v1566_v9 }
 0x30d   : > { %v1351_v62 = vmul.f32 %v1319_v1, %v6181_v41  ;;  %v1537_v23 = vmul.f32 0.5, %v1505_v28  ;;  %v4658_v63 = vpop.eup %4657  ;;  %v1568_v0 = vmul.f32 %v1536_v21, %v5969_v60  ;;  %v1554_v36 = vmul.f32 0.5, %v1522_v8 }
 0x30e   : > { %v1555_v53 = vmul.f32 0.5, %v1523_v12  ;;  %v1524_v5 = vadd.f32 1.0, %v6103_v35  ;;  %v4660_v24 = vpop.eup %4659  ;;  %4486 = vrot.lane.b32.xlu1 %v4485_v15, %s5148_s16  ;;  %1617 = vst.msk [vmem:[#allocation2 + $0x10] sm:$0xff] %vm1614_vm0, %v1596_v25  ;;  %v1525_v44 = vadd.f32 1.0, %v6124_v47  ;;  %v1506_v32 = vadd.f32 1.0, %v6153_v30 }
 0x30f   : > { %v1383_v58 = vmul.f32 0.044715, %v1351_v62  ;;  %v1569_v11 = vmul.f32 %v1537_v23, %v5979_v48  ;;  %v1586_v16 = vmul.f32 %v1554_v36, %v6014_v42  ;;  %v1507_v19 = vadd.f32 1.0, %v4654_v18 }
 0x310   : > { %v1587_v60 = vmul.f32 %v1555_v53, %v6032_v10  ;;  %v1556_v61 = vmul.f32 0.5, %v1524_v5  ;;  %v1557_v39 = vmul.f32 0.5, %v1525_v44  ;;  %v1538_v48 = vmul.f32 0.5, %v1506_v32 }
 0x311   : > { %v1415_v35 = vadd.f32 %v1383_v58, %v6181_v41  ;;  %v4490_v31 = vpack.i.bf16 %v1569_v11, %v1568_v0  ;;  %v1597_v51 = vpack.c.bf16 %v1569_v11, %v1568_v0  ;;  %v1539_v10 = vmul.f32 0.5, %v1507_v19 }
 0x312   : > { %v4495_v6 = vpack.i.bf16 %v1587_v60, %v1586_v16  ;;  %v1606_v29 = vpack.c.bf16 %v1587_v60, %v1586_v16  ;;  %v1588_v20 = vmul.f32 %v1556_v61, %v6011_v38  ;;  %v4662_v27 = vpop.eup %4661  ;;  %v1589_v42 = vmul.f32 %v1557_v39, %v6023_v50 }
 0x313   : > { %v1447_v47 = vmul.f32 0.7978846, %v1415_v35  ;;  %1618 = vst.msk [vmem:[#allocation2 + $0x18] sm:$0xff] %vm1614_vm0, %v1597_v51  ;;  %4491 = vrot.lane.b32.xlu1 %v4490_v31, %s5148_s16  ;;  %v1508_v30 = vadd.f32 1.0, %v6144_v46  ;;  %v4664_v18 = vpop.eup %4663  ;;  %v1570_v49 = vmul.f32 %v1538_v48, %v6043_v59  ;;  %v1509_v38 = vadd.f32 1.0, %v6168_v2 }
 0x314   : > { %4496 = vrot.lane.b32.xlu0 %v4495_v6, %s5148_s16  ;;  %1627 = vst.msk [vmem:[#allocation2 + $0x60] sm:$0xff] %vm1614_vm0, %v1606_v29  ;;  %v1526_v26 = vadd.f32 1.0, %v4658_v63  ;;  %v1527_v3 = vadd.f32 1.0, %v4662_v27  ;;  %v4500_v9 = vpack.i.bf16 %v1589_v42, %v1588_v20  ;;  %v1607_v56 = vpack.c.bf16 %v1589_v42, %v1588_v20 }
 0x315   : > { %v4666_v54 = vpop.eup %4665  ;;  %4669 = vtanh.f32 %v1447_v47  ;;  %v1571_v50 = vmul.f32 %v1539_v10, %v6084_v33  ;;  %v1540_v40 = vmul.f32 0.5, %v1508_v30  ;;  %v1541_v46 = vmul.f32 0.5, %v1509_v38 }
 0x316   : > { %v4668_v55 = vpop.eup %4667  ;;  %v1558_v22 = vmul.f32 0.5, %v1526_v26  ;;  %v1559_v7 = vmul.f32 0.5, %v1527_v3  ;;  %1628 = vst.msk [vmem:[#allocation2 + $0x68] sm:$0xff] %vm1614_vm0, %v1607_v56  ;;  %v1528_v59 = vadd.f32 1.0, %v6185_v52  ;;  %v1529_v2 = vadd.f32 1.0, %v4660_v24 }
 0x317   : > { %v4505_v1 = vpack.i.bf16 %v1571_v50, %v1570_v49  ;;  %v1598_v28 = vpack.c.bf16 %v1571_v50, %v1570_v49  ;;  %v1572_v21 = vmul.f32 %v1540_v40, %v6040_v17  ;;  %v1573_v8 = vmul.f32 %v1541_v46, %v6070_v4 }
 0x318   : > { %4501 = vrot.lane.b32.xlu0 %v4500_v9, %s5148_s16  ;;  %v1590_v33 = vmul.f32 %v1558_v22, %v6108_v57  ;;  %v1591_v12 = vmul.f32 %v1559_v7, %v6133_v34  ;;  %v1560_v15 = vmul.f32 0.5, %v1528_v59  ;;  %v1561_v25 = vmul.f32 0.5, %v1529_v2 }
 0x319   : > { %4506 = vrot.lane.b32.xlu1 %v4505_v1, %s5148_s16  ;;  %1619 = vst.msk [vmem:[#allocation2 + $0x20] sm:$0xff] %vm1614_vm0, %v1598_v28  ;;  %v1512_v62 = vadd.f32 1.0, %v4664_v18  ;;  %v4510_v23 = vpack.i.bf16 %v1573_v8, %v1572_v21  ;;  %v1599_v52 = vpack.c.bf16 %v1573_v8, %v1572_v21  ;;  %v1513_v4 = vadd.f32 1.0, %v4668_v55 }
 0x31a   : > { %v4515_v63 = vpack.i.bf16 %v1591_v12, %v1590_v33  ;;  %v1608_v0 = vpack.c.bf16 %v1591_v12, %v1590_v33  ;;  %v1592_v36 = vmul.f32 %v1560_v15, %v6095_v45  ;;  %v1593_v17 = vmul.f32 %v1561_v25, %v6111_v37 }
 0x31b   : > { %1620 = vst.msk [vmem:[#allocation2 + $0x28] sm:$0xff] %vm1614_vm0, %v1599_v52  ;;  %v1510_v57 = vadd.f32 1.0, %v4666_v54  ;;  %v1544_v34 = vmul.f32 0.5, %v1512_v62  ;;  %v1545_v24 = vmul.f32 0.5, %v1513_v4  ;;  %v1642_v61 = vlaneseq }
 0x31c   : > { %4516 = vrot.lane.b32.xlu0 %v4515_v63, %s5148_s16  ;;  %1629 = vst.msk [vmem:[#allocation2 + $0x70] sm:$0xff] %vm1614_vm0, %v1608_v0  ;;  %v4520_v53 = vpack.i.bf16 %v1593_v17, %v1592_v36  ;;  %v1609_v5 = vpack.c.bf16 %v1593_v17, %v1592_v36 }
 0x31d   : > { %4511 = vrot.lane.b32.xlu1 %v4510_v23, %s5148_s16  ;;  %v1576_v45 = vmul.f32 %v1544_v34, %v6136_v14  ;;  %v1577_v37 = vmul.f32 %v1545_v24, %v6151_v13  ;;  %v1542_v44 = vmul.f32 0.5, %v1510_v57  ;;  %v1643_v31 = vshrl.u32 %v1642_v61, 7  ;;  %v1631_v14 = vld [vmem:[%s5445_s19] sm:$0x3] }
 0x31e   : > { %1630 = vst.msk [vmem:[#allocation2 + $0x78] sm:$0xff] %vm1614_vm0, %v1609_v5 }
 0x31f   : > { %v4670_v58 = vpop.eup %4669  ;;  %v4530_v32 = vpack.i.bf16 %v1577_v37, %v1576_v45  ;;  %v1601_v16 = vpack.c.bf16 %v1577_v37, %v1576_v45  ;;  %v1574_v19 = vmul.f32 %v1542_v44, %v6142_v43  ;;  %v1648_v6 = vsub.s32 1, %v1643_v31 }
 0x320   : > { %4521 = vrot.lane.b32.xlu0 %v4520_v53, %s5148_s16  ;;  %v1511_v11 = vadd.f32 1.0, %v4670_v58  ;;  %v1644_v29 = vsub.s32 0, %v1643_v31 }
 0x321   : > { %1622 = vst.msk [vmem:[#allocation2 + $0x38] sm:$0xff] %vm1614_vm0, %v1601_v16  ;;  %v1649_v13 = vrot.slane %v1631_v14, %v1648_v6 }
 0x322   : > { %v1543_v60 = vmul.f32 0.5, %v1511_v11  ;;  %v6242_v20 = vrot.slane %v1631_v14, %v1644_v29 }
 0x323   : > { %1844 = vmatprep.mubr.f32.mxu1 %v1649_v13 }
 0x324   : > { %v1575_v35 = vmul.f32 %v1543_v60, %v6181_v41  ;;  %v1855_v43 = vsel %vm1854_vm1, %v6242_v20, 0.0  ;;  %v1856_v41 = vsel %vm1854_vm1, %v1649_v13, 0.0 }
 0x325   : > { %v1857_v48 = vadd.f32 %v1856_v41, %v1855_v43 }
 0x326   : > { %v4525_v51 = vpack.i.bf16 %v1575_v35, %v1574_v19  ;;  %v1600_v39 = vpack.c.bf16 %v1575_v35, %v1574_v19 }
 0x328   : > { %4526 = vrot.lane.b32.xlu1 %v4525_v51, %s5148_s16  ;;  %1621 = vst.msk [vmem:[#allocation2 + $0x30] sm:$0xff] %vm1614_vm0, %v1600_v39 }
 0x32c   : > { %4531 = vrot.lane.b32.xlu1 %v4530_v32, %s5148_s16 }
 0x33f   : > { %1858 = vadd.xlane.f32.xlu0 %v1857_v48 }
 0x35b   : > { %v4462_v30 = vpop.permute.xlu1 %4461 }
 0x35c   : > { %v4464_v18 = vunpack.i.h.bf16 %v4462_v30  ;;  %v4463_v49 = vunpack.i.l.bf16 %v4462_v30 }
 0x35e   : > { %v4297_v9 = vpack.c.bf16 %v4464_v18, %v4463_v49 }
 0x360   : > { %v4457_v27 = vpop.permute.xlu0 %4456 }
 0x361   : > { %v4459_v47 = vunpack.i.h.bf16 %v4457_v27  ;;  %v4458_v42 = vunpack.i.l.bf16 %v4457_v27 }
 0x363   : > { %v4293_v10 = vpack.c.bf16 %v4459_v47, %v4458_v42  ;;  %v5149_v47 = vmov 0.0  }
 0x364   : > { %1637 = vst.msk [vmem:[#allocation3] sm:$0x1] %vm1636_vm2, %v5149_v47 }
 0x365   : > { %4294 = vmatprep.subr.bf16.mxu1 %v4293_v10  ;;  %1639 = vst.msk [vmem:[#allocation4] sm:$0x1] %vm1638_vm3, %v5149_v47 }
 0x36a   : > { %v4467_v38 = vpop.permute.xlu1 %4466 }
 0x36b   : > { %v4469_v26 = vunpack.i.h.bf16 %v4467_v38  ;;  %v4468_v3 = vunpack.i.l.bf16 %v4467_v38  ;;  %v1640_v49 = vld [vmem:[#allocation3] sm:$0x1] }
 0x36c   : > { %v1853_v10 = vld [vmem:[#allocation4] sm:$0x1] }
 0x36d   : > { %v4295_v54 = vpack.c.bf16 %v4469_v26, %v4468_v3 }
 0x36e   : > { %v4472_v56 = vpop.permute.xlu1 %4471 }
 0x36f   : > { %4296 = vmatpush3.bf16.msra.mxu1 %v4295_v54  ;;  %v4474_v50 = vunpack.i.h.bf16 %v4472_v56  ;;  %v4473_v55 = vunpack.i.l.bf16 %v4472_v56 }
 0x370   : > { %4298 = vmatprep.subr.bf16.mxu1 %v4297_v9 }
 0x371   : > { %v4299_v40 = vpack.c.bf16 %v4474_v50, %v4473_v55 }
 0x373   : > { %4300 = vmatpush3.bf16.msra.mxu1 %v4299_v40 }
 0x374   : > { %v4477_v46 = vpop.permute.xlu0 %4476 }
 0x375   : > { %v4479_v22 = vunpack.i.h.bf16 %v4477_v46  ;;  %v4478_v7 = vunpack.i.l.bf16 %v4477_v46 }
 0x377   : > { %v4301_v1 = vpack.c.bf16 %v4479_v22, %v4478_v7 }
 0x379   : > { %4302 = vmatprep.subr.bf16.mxu1 %v4301_v1 }
 0x37d   : > { %v4482_v28 = vpop.permute.xlu0 %4481 }
 0x37e   : > { %v4484_v59 = vunpack.i.h.bf16 %v4482_v28  ;;  %v4483_v2 = vunpack.i.l.bf16 %v4482_v28 }
 0x380   : > { %v4487_v21 = vpop.permute.xlu1 %4486  ;;  %v4305_v12 = vpack.c.bf16 %v4484_v59, %v4483_v2 }
 0x381   : > { %v4489_v8 = vunpack.i.h.bf16 %v4487_v21  ;;  %v4488_v33 = vunpack.i.l.bf16 %v4487_v21 }
 0x383   : > { %v4303_v15 = vpack.c.bf16 %v4489_v8, %v4488_v33 }
 0x385   : > { %v4492_v25 = vpop.permute.xlu1 %4491  ;;  %4304 = vmatpush3.bf16.msra.mxu1 %v4303_v15 }
 0x386   : > { %v4494_v62 = vunpack.i.h.bf16 %v4492_v25  ;;  %v4493_v23 = vunpack.i.l.bf16 %v4492_v25  ;;  %v4497_v52 = vpop.permute.xlu0 %4496  ;;  %4306 = vmatprep.subr.bf16.mxu1 %v4305_v12 }
 0x387   : > { %v4499_v63 = vunpack.i.h.bf16 %v4497_v52  ;;  %v4498_v0 = vunpack.i.l.bf16 %v4497_v52 }
 0x388   : > { %v4307_v36 = vpack.c.bf16 %v4494_v62, %v4493_v23 }
 0x389   : > { %v4309_v17 = vpack.c.bf16 %v4499_v63, %v4498_v0 }
 0x38a   : > { %4308 = vmatpush3.bf16.msra.mxu1 %v4307_v36  ;;  %v4502_v4 = vpop.permute.xlu0 %4501 }
 0x38b   : > { %v4504_v57 = vunpack.i.h.bf16 %v4502_v4  ;;  %v4503_v34 = vunpack.i.l.bf16 %v4502_v4  ;;  %v4507_v53 = vpop.permute.xlu1 %4506  ;;  %4310 = vmatprep.subr.bf16.mxu1 %v4309_v17 }
 0x38c   : > { %v4509_v5 = vunpack.i.h.bf16 %v4507_v53  ;;  %v4508_v24 = vunpack.i.l.bf16 %v4507_v53 }
 0x38d   : > { %v4313_v58 = vpack.c.bf16 %v4504_v57, %v4503_v34 }
 0x38e   : > { %v4311_v45 = vpack.c.bf16 %v4509_v5, %v4508_v24  ;;  %v4517_v37 = vpop.permute.xlu0 %4516 }
 0x38f   : > { %v4512_v11 = vpop.permute.xlu1 %4511  ;;  %v4519_v44 = vunpack.i.h.bf16 %v4517_v37  ;;  %v4518_v32 = vunpack.i.l.bf16 %v4517_v37 }
 0x390   : > { %v4514_v16 = vunpack.i.h.bf16 %v4512_v11  ;;  %v4513_v60 = vunpack.i.l.bf16 %v4512_v11  ;;  %4312 = vmatpush3.bf16.msra.mxu1 %v4311_v45 }
 0x391   : > { %4314 = vmatprep.subr.bf16.mxu1 %v4313_v58  ;;  %v4317_v61 = vpack.c.bf16 %v4519_v44, %v4518_v32 }
 0x392   : > { %v4315_v19 = vpack.c.bf16 %v4514_v16, %v4513_v60  ;;  %v4522_v35 = vpop.permute.xlu0 %4521 }
 0x393   : > { %v4524_v31 = vunpack.i.h.bf16 %v4522_v35  ;;  %v4523_v51 = vunpack.i.l.bf16 %v4522_v35 }
 0x394   : > { %4316 = vmatpush3.bf16.msra.mxu1 %v4315_v19 }
 0x395   : > { %4318 = vmatprep.subr.bf16.mxu1 %v4317_v61  ;;  %v4321_v13 = vpack.c.bf16 %v4524_v31, %v4523_v51 }
 0x39a   : > { %v4527_v39 = vpop.permute.xlu1 %4526 }
 0x39b   : > { %v4529_v14 = vunpack.i.h.bf16 %v4527_v39  ;;  %v4528_v6 = vunpack.i.l.bf16 %v4527_v39 }
 0x39d   : > { %v4319_v29 = vpack.c.bf16 %v4529_v14, %v4528_v6 }
 0x39e   : > { %v4532_v43 = vpop.permute.xlu1 %4531 }
 0x39f   : > { %v4534_v41 = vunpack.i.h.bf16 %v4532_v43  ;;  %v4533_v48 = vunpack.i.l.bf16 %v4532_v43  ;;  %4320 = vmatpush3.bf16.msra.mxu1 %v4319_v29 }
 0x3a0   : > { %4322 = vmatprep.subr.bf16.mxu1 %v4321_v13 }
 0x3a1   : > { %v4323_v27 = vpack.c.bf16 %v4534_v41, %v4533_v48 }
 0x3a3   : > { %4324 = vmatpush3.bf16.msra.mxu1 %v4323_v27 }
 0x3a6   : > { %1845 = vmatmul.mubr.f32.vlgmr.msra.gmra.mrb[16].mxu1 %v6242_v20 }
 0x3cc   : > { %v1859_v42 = vpop.xlane.xlu0 %1858 }
 0x3cd   : > { %v1860_v30 = vadd.f32 %v1859_v42, %v1853_v10 }
 0x3cf   : > { %1862 = vst.msk [vmem:[#allocation4] sm:$0x1] %vm1638_vm3, %v1860_v30 }
 0x479   : > { %v4051_v18 = vpop.f32.mrb[16].mxu1 }
 0x47a   : > { %v4052_v38 = vpop.f32.mrb[17].mxu1 }
 0x47b   : > { %v4053_v26 = vadd.f32 %v4052_v38, %v4051_v18 }
 0x47d   : > { %v1850_v3 = vadd.f32 %v4053_v26, %v1640_v49 }
 0x47f   : > { %1852 = vst.msk [vmem:[#allocation3] sm:$0x1] %vm1636_vm2, %v1850_v3 }
 0x480 PF: > { %p3923_p7 = scmp.ne.s32.totalorder %s5122_s28, 1 }
 0x481   : > { %v1872_v20 = vld [vmem:[#allocation4] sm:$0x1] (!%p3923_p7)  ;;  %v6247_v54 = vld [vmem:[#allocation10] sm:$0xff] (!%p3923_p7)   ;;  %v5150_v9 = vmov (!%p3923_p7), 0   ;;  %v4673_v56 = vld [vmem:[#allocation10 + $0x8] sm:$0xff] (!%p3923_p7)   ;;  %vm1918_vm4 = vcmask (!%p3923_p7), 523264   ;;  %v1878_v23 = vlaneseq (!%p3923_p7) }
 0x482   : > { %1866 = sbr.rel (%p3923_p7) target bundleno = 2468 (0x9a4), region = 100  ;;  %4671 = vset.pattern.permute.xlu0 (!%p3923_p7), %v5150_v9  ;;  %4341 = vmatprep.subr.bf16.mxu1 (!%p3923_p7), %v6247_v54  ;;  %v4674_v50 = vld [vmem:[#allocation10 + $0x10] sm:$0xff] (!%p3923_p7)   ;;  %v5151_v40 = vmov (!%p3923_p7), 0.0   ;;  %v4676_v46 = vld [vmem:[#allocation11] sm:$0xff] (!%p3923_p7)   ;;  %vm5152_vm5 = vmmov (!%p3923_p7), 0   ;;  %v4675_v22 = vld [vmem:[#allocation10 + $0x18] sm:$0xff] (!%p3923_p7)  }
 0x483   : > { %1875 = vperm.xlu0 (!%p3923_p7), %4671, %v1872_v20   ;;  %4345 = vmatpush3.bf16.msra.mxu1 (!%p3923_p7), %v6247_v54  ;;  %v1974_v55 = vld [vmem:[#allocation2 + $0x30] sm:$0xff] (!%p3923_p7)  ;;  %v1975_v28 = vld [vmem:[#allocation2 + $0x38] sm:$0xff] (!%p3923_p7)  ;;  %v1976_v59 = vld [vmem:[#allocation2 + $0x40] sm:$0xff] (!%p3923_p7)  ;;  %v1879_v52 = vshrl.u32 (!%p3923_p7), %v1878_v23, 7  ;;  %s7537_s12 = sld [smem:[#allocation26_spill]] (!%p3923_p7)  ;;  %s7538_s9 = sld [smem:[#allocation25_spill]] (!%p3923_p7) }
 0x484   : > { %4342 = vmatprep.subr.bf16.mxu1 (!%p3923_p7), %v4673_v56  ;;  %4197 = vmatprep.mubr.msk.bf16.mxu1 (!%p3923_p7), %vm1918_vm4, %v1974_v55  ;;  %v4677_v7 = vld [vmem:[#allocation11 + $0x8] sm:$0xff] (!%p3923_p7)   ;;  %v4678_v1 = vld [vmem:[#allocation11 + $0x10] sm:$0xff] (!%p3923_p7)   ;;  %v4679_v2 = vld [vmem:[#allocation11 + $0x18] sm:$0xff] (!%p3923_p7)   ;;  %vm1962_vm6 = vcmask (!%p3923_p7), 516096   ;;  %s7539_s18 = sld [smem:[#allocation28_spill]] (!%p3923_p7)  ;;  %s7540_s8 = sld [smem:[#allocation27_spill]] (!%p3923_p7) }
 0x485   : > { %4165 = vmatprep.subr.bf16.mxu0 (!%p3923_p7), %v5151_v40  ;;  %4173 = vmatprep.mubr.msk.bf16.mxu0 (!%p3923_p7), %vm5152_vm5, %v5151_v40  ;;  %v1977_v21 = vld [vmem:[#allocation2 + $0x48] sm:$0xff] (!%p3923_p7)  ;;  %v1978_v8 = vld [vmem:[#allocation2 + $0x50] sm:$0xff] (!%p3923_p7)  ;;  %v1979_v33 = vld [vmem:[#allocation2 + $0x58] sm:$0xff] (!%p3923_p7)  ;;  %v1880_v63 = vsub.s32 (!%p3923_p7), 0, %v1879_v52  ;;  %vm3112_vm7 = vcmask (!%p3923_p7), 261120   ;;  %s7541_s19 = sld [smem:[#allocation29_spill]] (!%p3923_p7) }
 0x486   : > { %4166 = vmatpush3.bf16.msra.mxu0 (!%p3923_p7), %v4676_v46  ;;  %v1980_v12 = vld [vmem:[#allocation2 + $0x60] sm:$0xff] (!%p3923_p7)  ;;  %v1981_v15 = vld [vmem:[#allocation2 + $0x68] sm:$0xff] (!%p3923_p7)  ;;  %v1982_v25 = vld [vmem:[#allocation2 + $0x70] sm:$0xff] (!%p3923_p7)  ;;  %vm3322_vm8 = vcmask (!%p3923_p7), 15360  }
 0x487   : > { %4346 = vmatpush3.bf16.msra.mxu1 (!%p3923_p7), %v4673_v56  ;;  %4167 = vmatprep.subr.bf16.mxu0 (!%p3923_p7), %v5151_v40  ;;  %v1983_v62 = vld [vmem:[#allocation2 + $0x78] sm:$0xff] (!%p3923_p7)  ;;  %v1871_v17 = vld [vmem:[#allocation3] sm:$0x1] (!%p3923_p7)  ;;  %v1969_v5 = vld [vmem:[#allocation2 + $0x8] sm:$0xff] (!%p3923_p7) }
 0x488   : > { %4343 = vmatprep.subr.bf16.mxu1 (!%p3923_p7), %v4674_v50  ;;  %v1968_v53 = vld [vmem:[#allocation2] sm:$0xff] (!%p3923_p7)  ;;  %v1970_v24 = vld [vmem:[#allocation2 + $0x10] sm:$0xff] (!%p3923_p7)  ;;  %v1971_v58 = vld [vmem:[#allocation2 + $0x18] sm:$0xff] (!%p3923_p7) }
 0x489   : > { %v1972_v45 = vld [vmem:[#allocation2 + $0x20] sm:$0xff]  ;;  %v1973_v37 = vld [vmem:[#allocation2 + $0x28] sm:$0xff]  ;;  %v4682_v30 = vld [vmem:[%s7537_s12 + $0x10] sm:$0xff]  }
 0x48a   : > { %4168 = vmatpush3.bf16.msra.mxu0 %v4677_v7  ;;  %v4680_v42 = vld [vmem:[%s7537_s12] sm:$0xff]   ;;  %v4681_v10 = vld [vmem:[%s7537_s12 + $0x8] sm:$0xff]   ;;  %v4683_v18 = vld [vmem:[%s7537_s12 + $0x18] sm:$0xff]  }
 0x48b   : > { %4347 = vmatpush3.bf16.msra.mxu1 %v4674_v50  ;;  %4169 = vmatprep.subr.bf16.mxu0 %v5151_v40  ;;  %v1893_v49 = vld [vmem:[%s7538_s9] sm:$0x1] }
 0x48c   : > { %4344 = vmatprep.subr.bf16.mxu1 %v4675_v22 }
 0x48e   : > { %4170 = vmatpush3.bf16.msra.mxu0 %v4678_v1 }
 0x48f   : > { %4348 = vmatpush3.bf16.msra.mxu1 %v4675_v22  ;;  %4171 = vmatprep.subr.bf16.mxu0 %v5151_v40 }
 0x492   : > { %4198 = vmatmul.mubr.msk.bf16.vlgmr.msra.gmra.mrb[0].mxu1 %vm1918_vm4, %v1975_v28  ;;  %4172 = vmatpush3.bf16.msra.mxu0 %v4679_v2 }
 0x493   : > { %4201 = vmatprep.mubr.msk.bf16.mxu1 %vm1918_vm4, %v1976_v59  ;;  %4177 = vmatprep.subr.bf16.mxu0 %v6247_v54 }
 0x49a   : > { %4202 = vmatmul.mubr.msk.bf16.gmra.mrb[4].mxu1 %vm1918_vm4, %v1977_v21 }
 0x49b   : > { %4205 = vmatprep.mubr.msk.bf16.mxu1 %vm1918_vm4, %v1978_v8 }
 0x4a2   : > { %4206 = vmatmul.mubr.msk.bf16.gmra.mrb[8].mxu1 %vm1918_vm4, %v1979_v33 }
 0x4a3   : > { %4209 = vmatprep.mubr.msk.bf16.mxu1 %vm1918_vm4, %v1980_v12 }
 0x4aa   : > { %4210 = vmatmul.mubr.msk.bf16.gmra.mrb[12].mxu1 %vm1918_vm4, %v1981_v15 }
 0x4ab   : > { %4213 = vmatprep.mubr.msk.bf16.mxu1 %vm1918_vm4, %v1982_v25 }
 0x4b2   : > { %4214 = vmatmul.mubr.msk.bf16.gmra.mrb[16].mxu1 %vm1918_vm4, %v1983_v62 }
 0x502   : > { %v1876_v0 = vpop.permute.xlu0 %1875 }
 0x503   : > { %v1881_v36 = vrot.slane %v1876_v0, %v1880_v63 }
 0x505   : > { %4686 = vrcp.f32 %v1881_v36 }
 0x50f   : > { %v4687_v4 = vpop.eup %4686 }
 0x510   : > { %v1883_v57 = vmul.f32 %v4687_v4, %v1871_v17 }
 0x512   : > { %v1884_v34 = vpack.c.bf16 %v1883_v57, %v1883_v57 }
 0x514   : > { %4174 = vmatmul.mubr.msk.bf16.vlgmr.msra.gmra.mrb[0].mxu0 %vm1918_vm4, %v1884_v34 }
 0x515   : > { %4178 = vmatpush3.bf16.msra.mxu0 %v6247_v54  ;;  %4185 = vmatprep.mubr.msk.bf16.mxu0 %vm1918_vm4, %v1968_v53 }
 0x516   : > { %4179 = vmatprep.subr.bf16.mxu0 %v4673_v56 }
 0x519   : > { %4180 = vmatpush3.bf16.msra.mxu0 %v4673_v56 }
 0x51a   : > { %4181 = vmatprep.subr.bf16.mxu0 %v4674_v50 }
 0x51d   : > { %4182 = vmatpush3.bf16.msra.mxu0 %v4674_v50 }
 0x51e   : > { %4183 = vmatprep.subr.bf16.mxu0 %v4675_v22 }
 0x521   : > { %4184 = vmatpush3.bf16.msra.mxu0 %v4675_v22 }
 0x522   : > { %4217 = vmatprep.subr.bf16.mxu0 %v4680_v42 }
 0x524   : > { %4186 = vmatmul.mubr.msk.bf16.vlgmr.msra.gmra.mrb[4].mxu0 %vm1918_vm4, %v1969_v5 }
 0x525   : > { %4189 = vmatprep.mubr.msk.bf16.mxu0 %vm1918_vm4, %v1970_v24  ;;  %4218 = vmatpush3.bf16.msra.mxu0 %v4680_v42 }
 0x526   : > { %4219 = vmatprep.subr.bf16.mxu0 %v4681_v10 }
 0x529   : > { %4220 = vmatpush3.bf16.msra.mxu0 %v4681_v10 }
 0x52a   : > { %4221 = vmatprep.subr.bf16.mxu0 %v4682_v30 }
 0x52c   : > { %4190 = vmatmul.mubr.msk.bf16.gmra.mrb[8].mxu0 %vm1918_vm4, %v1971_v58 }
 0x52d   : > { %4193 = vmatprep.mubr.msk.bf16.mxu0 %vm1918_vm4, %v1972_v45  ;;  %4222 = vmatpush3.bf16.msra.mxu0 %v4682_v30 }
 0x52e   : > { %4223 = vmatprep.subr.bf16.mxu0 %v4683_v18 }
 0x531   : > { %4224 = vmatpush3.bf16.msra.mxu0 %v4683_v18 }
 0x534   : > { %4194 = vmatmul.mubr.msk.bf16.gmra.mrb[12].mxu0 %vm1918_vm4, %v1973_v37 }
 0x565   : > { %v4199_v11 = vpop.f32.mrb[0].mxu1 }
 0x566   : > { %v2154_v44 = vpop.f32.mrb[1].mxu1 }
 0x567   : > { %v4200_v32 = vpop.f32.mrb[2].mxu1 }
 0x568   : > { %v2157_v16 = vpop.f32.mrb[3].mxu1 }
 0x56d   : > { %v4203_v60 = vpop.f32.mrb[4].mxu1 }
 0x56e   : > { %v2170_v61 = vpop.f32.mrb[5].mxu1 }
 0x56f   : > { %v4204_v19 = vpop.f32.mrb[6].mxu1 }
 0x570   : > { %v2173_v35 = vpop.f32.mrb[7].mxu1 }
 0x575   : > { %v4207_v31 = vpop.f32.mrb[8].mxu1 }
 0x576   : > { %v2186_v51 = vpop.f32.mrb[9].mxu1 }
 0x577   : > { %v6270_v39 = vpop.f32.mrb[10].mxu1 }
 0x578   : > { %v6272_v14 = vpop.f32.mrb[11].mxu1 }
 0x57d   : > { %v6274_v6 = vpop.f32.mrb[12].mxu1 }
 0x57e   : > { %v6276_v13 = vpop.f32.mrb[13].mxu1 }
 0x57f   : > { %v6278_v29 = vpop.f32.mrb[14].mxu1 }
 0x580   : > { %v6280_v43 = vpop.f32.mrb[15].mxu1 }
 0x585   : > { %v6282_v41 = vpop.f32.mrb[16].mxu1 }
 0x586   : > { %v6284_v48 = vpop.f32.mrb[17].mxu1 }
 0x587   : > { %v6286_v27 = vpop.f32.mrb[18].mxu1 }
 0x588   : > { %v6288_v47 = vpop.f32.mrb[19].mxu1 }
 0x5e7   : > { %v1956_v38 = vpop.f32.mrb[0].mxu0 }
 0x5e8   : > { %v1957_v26 = vadd.f32 %v1956_v38, %v1893_v49  ;;  %v4175_v3 = vpop.f32.mrb[1].mxu0 }
 0x5e9   : > { %v1959_v20 = vpop.f32.mrb[2].mxu0  ;;  %v4684_v3 = vld [vmem:[%s7539_s18] sm:$0xff]  }
 0x5ea   : > { %1963 = vst.msk [vmem:[#allocation5] sm:$0x1] %vm1962_vm6, %v1957_v26  ;;  %v4176_v54 = vpop.f32.mrb[3].mxu0  ;;  %4257 = vmatprep.subr.bf16.mxu1 %v4684_v3 }
 0x5eb   : > { %4258 = vmatpush3.bf16.msra.mxu1 %v4684_v3 }
 0x5f1   : > { %v6305_v9 = vld [vmem:[#allocation5] ss:$0 sm:$0xff] }
 0x5f2   : > { %v6308_v56 = vadd.f32 %v6305_v9, %v2154_v44  ;;  %v6311_v50 = vadd.f32 %v4199_v11, %v6305_v9  ;;  %v6314_v55 = vadd.f32 %v6305_v9, %v2157_v16  ;;  %v6317_v40 = vadd.f32 %v4200_v32, %v6305_v9 }
 0x5f3   : > { %v6320_v46 = vadd.f32 %v6305_v9, %v2170_v61  ;;  %v6323_v22 = vadd.f32 %v4203_v60, %v6305_v9  ;;  %v6326_v7 = vadd.f32 %v6305_v9, %v2173_v35  ;;  %v6329_v1 = vadd.f32 %v4204_v19, %v6305_v9 }
 0x5f4   : > { %v6332_v28 = vadd.f32 %v4207_v31, %v6305_v9  ;;  %v6335_v59 = vadd.f32 %v6305_v9, %v2186_v51  ;;  %v2245_v2 = vmul.f32 %v6308_v56, %v6308_v56  ;;  %v2246_v21 = vmul.f32 %v6314_v55, %v6314_v55 }
 0x5f5   : > { %v2247_v8 = vmul.f32 %v6311_v50, %v6311_v50  ;;  %v2248_v33 = vmul.f32 %v6317_v40, %v6317_v40  ;;  %v2249_v12 = vmul.f32 %v6320_v46, %v6320_v46  ;;  %v2250_v15 = vmul.f32 %v6326_v7, %v6326_v7 }
 0x5f6   : > { %v2253_v25 = vmul.f32 %v6335_v59, %v6335_v59  ;;  %v2251_v62 = vmul.f32 %v6323_v22, %v6323_v22  ;;  %v2252_v23 = vmul.f32 %v6329_v1, %v6329_v1  ;;  %v2255_v52 = vmul.f32 %v6332_v28, %v6332_v28 }
 0x5f7   : > { %v2277_v63 = vmul.f32 %v2245_v2, %v6308_v56  ;;  %v2278_v0 = vmul.f32 %v2246_v21, %v6314_v55  ;;  %v2279_v36 = vmul.f32 %v2247_v8, %v6311_v50  ;;  %v2280_v17 = vmul.f32 %v2248_v33, %v6317_v40  ;;  %v6361_v4 = vpop.f32.mrb[4].mxu0 }
 0x5f8   : > { %v2285_v57 = vmul.f32 %v2253_v25, %v6335_v59  ;;  %v2281_v34 = vmul.f32 %v2249_v12, %v6320_v46  ;;  %v2282_v53 = vmul.f32 %v2250_v15, %v6326_v7  ;;  %v2283_v5 = vmul.f32 %v2251_v62, %v6323_v22  ;;  %v6367_v24 = vpop.f32.mrb[5].mxu0 }
 0x5f9   : > { %v2284_v58 = vmul.f32 %v2252_v23, %v6329_v1  ;;  %v2287_v45 = vmul.f32 %v2255_v52, %v6332_v28  ;;  %v6373_v37 = vadd.f32 %v6270_v39, %v6305_v9  ;;  %v2309_v11 = vmul.f32 0.044715, %v2277_v63  ;;  %v6375_v44 = vpop.f32.mrb[6].mxu0 }
 0x5fa   : > { %v2317_v32 = vmul.f32 0.044715, %v2285_v57  ;;  %v2310_v16 = vmul.f32 0.044715, %v2278_v0  ;;  %v2311_v60 = vmul.f32 0.044715, %v2279_v36  ;;  %v6379_v61 = vadd.f32 %v6305_v9, %v6272_v14 }
 0x5fb   : > { %v2256_v19 = vmul.f32 %v6373_v37, %v6373_v37  ;;  %v2312_v35 = vmul.f32 0.044715, %v2280_v17  ;;  %v2313_v31 = vmul.f32 0.044715, %v2281_v34  ;;  %v2314_v51 = vmul.f32 0.044715, %v2282_v53 }
 0x5fc   : > { %v2349_v42 = vadd.f32 %v2317_v32, %v6335_v59  ;;  %v2315_v39 = vmul.f32 0.044715, %v2283_v5  ;;  %v2316_v10 = vmul.f32 0.044715, %v2284_v58  ;;  %v2319_v30 = vmul.f32 0.044715, %v2287_v45 }
 0x5fd   : > { %v2288_v18 = vmul.f32 %v2256_v19, %v6373_v37  ;;  %v2341_v49 = vadd.f32 %v2309_v11, %v6308_v56  ;;  %v2342_v38 = vadd.f32 %v2310_v16, %v6314_v55  ;;  %v2343_v14 = vadd.f32 %v2311_v60, %v6311_v50  ;;  %v6388_v26 = vpop.f32.mrb[7].mxu0 }
 0x5fe   : > { %v2381_v20 = vmul.f32 0.7978846, %v2349_v42  ;;  %v2344_v54 = vadd.f32 %v2312_v35, %v6317_v40  ;;  %v2345_v2 = vadd.f32 %v2313_v31, %v6320_v46  ;;  %v2346_v21 = vadd.f32 %v2314_v51, %v6326_v7 }
 0x5ff   : > { %v2320_v8 = vmul.f32 0.044715, %v2288_v18  ;;  %v2347_v33 = vadd.f32 %v2315_v39, %v6323_v22  ;;  %v2348_v12 = vadd.f32 %v2316_v10, %v6329_v1  ;;  %v2351_v15 = vadd.f32 %v2319_v30, %v6332_v28  ;;  %v6399_v25 = vpop.f32.mrb[8].mxu0 }
 0x600   : > { %4688 = vtanh.f32 %v2381_v20  ;;  %v2254_v62 = vmul.f32 %v6379_v61, %v6379_v61  ;;  %v2373_v23 = vmul.f32 0.7978846, %v2341_v49  ;;  %v2374_v52 = vmul.f32 0.7978846, %v2342_v38  ;;  %v6403_v63 = vpop.f32.mrb[9].mxu0 }
 0x601   : > { %v2352_v0 = vadd.f32 %v2320_v8, %v6373_v37  ;;  %v2375_v36 = vmul.f32 0.7978846, %v2343_v14  ;;  %v2376_v17 = vmul.f32 0.7978846, %v2344_v54  ;;  %v2377_v57 = vmul.f32 0.7978846, %v2345_v2 }
 0x602   : > { %v2286_v34 = vmul.f32 %v2254_v62, %v6379_v61  ;;  %v2378_v53 = vmul.f32 0.7978846, %v2346_v21  ;;  %v2379_v5 = vmul.f32 0.7978846, %v2347_v33  ;;  %v2380_v58 = vmul.f32 0.7978846, %v2348_v12 }
 0x603   : > { %v2384_v45 = vmul.f32 0.7978846, %v2352_v0  ;;  %v2383_v11 = vmul.f32 0.7978846, %v2351_v15  ;;  %4690 = vtanh.f32 %v2373_v23  ;;  %v6409_v32 = vadd.f32 %v6274_v6, %v6305_v9  ;;  %v6411_v16 = vpop.f32.mrb[10].mxu0 }
 0x604   : > { %v2318_v60 = vmul.f32 0.044715, %v2286_v34  ;;  %4692 = vtanh.f32 %v2374_v52  ;;  %v6415_v19 = vadd.f32 %v6305_v9, %v6276_v13  ;;  %v6419_v35 = vadd.f32 %v6278_v29, %v6305_v9  ;;  %v6421_v31 = vpop.f32.mrb[11].mxu0 }
 0x605   : > { %4694 = vtanh.f32 %v2384_v45  ;;  %v2259_v51 = vmul.f32 %v6409_v32, %v6409_v32  ;;  %v6427_v6 = vadd.f32 %v6305_v9, %v6280_v43  ;;  %v6431_v42 = vadd.f32 %v6282_v41, %v6305_v9 }
 0x606   : > { %v2350_v13 = vadd.f32 %v2318_v60, %v6379_v61  ;;  %4696 = vtanh.f32 %v2375_v36  ;;  %v2257_v29 = vmul.f32 %v6415_v19, %v6415_v19  ;;  %v2260_v39 = vmul.f32 %v6419_v35, %v6419_v35 }
 0x607   : > { %4698 = vtanh.f32 %v2376_v17  ;;  %v2291_v10 = vmul.f32 %v2259_v51, %v6409_v32  ;;  %v2258_v43 = vmul.f32 %v6427_v6, %v6427_v6  ;;  %v2263_v30 = vmul.f32 %v6431_v42, %v6431_v42  ;;  %v6443_v41 = vpop.f32.mrb[12].mxu0 }
 0x608   : > { %v2382_v18 = vmul.f32 0.7978846, %v2350_v13  ;;  %4700 = vtanh.f32 %v2377_v57  ;;  %v2289_v49 = vmul.f32 %v2257_v29, %v6415_v19  ;;  %v2292_v38 = vmul.f32 %v2260_v39, %v6419_v35  ;;  %v6447_v14 = vpop.f32.mrb[13].mxu0 }
 0x609   : > { %4702 = vtanh.f32 %v2378_v53  ;;  %v2323_v3 = vmul.f32 0.044715, %v2291_v10  ;;  %v2290_v20 = vmul.f32 %v2258_v43, %v6427_v6  ;;  %v2295_v54 = vmul.f32 %v2263_v30, %v6431_v42  ;;  %v6451_v2 = vpop.f32.mrb[14].mxu0 }
 0x60a   : > { %v4689_v21 = vpop.eup %4688  ;;  %4704 = vtanh.f32 %v2382_v18  ;;  %v2321_v8 = vmul.f32 0.044715, %v2289_v49  ;;  %v2324_v33 = vmul.f32 0.044715, %v2292_v38  ;;  %v6453_v12 = vpop.f32.mrb[15].mxu0  ;;  %v6461_v53 = vadd.f32 %v6305_v9, %v6284_v48 }
 0x60b   : > { %v2445_v15 = vadd.f32 1.0, %v4689_v21  ;;  %4706 = vtanh.f32 %v2379_v5  ;;  %v2355_v62 = vadd.f32 %v2323_v3, %v6409_v32  ;;  %v2322_v23 = vmul.f32 0.044715, %v2290_v20 }
 0x60c   : > { %4708 = vtanh.f32 %v2380_v58  ;;  %v2353_v52 = vadd.f32 %v2321_v8, %v6415_v19  ;;  %v2356_v0 = vadd.f32 %v2324_v33, %v6419_v35  ;;  %v2327_v36 = vmul.f32 0.044715, %v2295_v54 }
 0x60d   : > { %v4691_v17 = vpop.eup %4690  ;;  %4710 = vtanh.f32 %v2383_v11  ;;  %v2387_v57 = vmul.f32 0.7978846, %v2355_v62  ;;  %v2354_v34 = vadd.f32 %v2322_v23, %v6427_v6  ;;  %v2477_v29 = vmul.f32 0.5, %v2445_v15 }
 0x60e   : > { %v4693_v45 = vpop.eup %4692  ;;  %v2437_v5 = vadd.f32 1.0, %v4691_v17  ;;  %v2385_v60 = vmul.f32 0.7978846, %v2353_v52  ;;  %v2388_v51 = vmul.f32 0.7978846, %v2356_v0  ;;  %v2359_v58 = vadd.f32 %v2327_v36, %v6431_v42 }
 0x60f   : > { %v4695_v13 = vpop.eup %4694  ;;  %4712 = vtanh.f32 %v2387_v57  ;;  %v2438_v39 = vadd.f32 1.0, %v4693_v45  ;;  %v2386_v10 = vmul.f32 0.7978846, %v2354_v34  ;;  %v2261_v3 = vmul.f32 %v6461_v53, %v6461_v53 }
 0x610   : > { %v4697_v43 = vpop.eup %4696  ;;  %v2448_v11 = vadd.f32 1.0, %v4695_v13  ;;  %4714 = vtanh.f32 %v2385_v60  ;;  %v2469_v30 = vmul.f32 0.5, %v2437_v5  ;;  %v2391_v18 = vmul.f32 0.7978846, %v2359_v58 }
 0x611   : > { %v4699_v49 = vpop.eup %4698  ;;  %v2439_v38 = vadd.f32 1.0, %v4697_v43  ;;  %v2470_v48 = vmul.f32 0.5, %v2438_v39  ;;  %4716 = vtanh.f32 %v2388_v51  ;;  %v6467_v33 = vmul.f32 %v2477_v29, %v6335_v59 }
 0x612   : > { %v4701_v20 = vpop.eup %4700  ;;  %v2480_v54 = vmul.f32 0.5, %v2448_v11  ;;  %v2440_v21 = vadd.f32 1.0, %v4699_v49  ;;  %4718 = vtanh.f32 %v2386_v10  ;;  %v6470_v36 = vmul.f32 %v2469_v30, %v6308_v56 }
 0x613   : > { %v4703_v8 = vpop.eup %4702  ;;  %v2441_v15 = vadd.f32 1.0, %v4701_v20  ;;  %v2471_v62 = vmul.f32 0.5, %v2439_v38  ;;  %4720 = vtanh.f32 %v2391_v18  ;;  %v2293_v17 = vmul.f32 %v2261_v3, %v6461_v53 }
 0x614   : > { %v4705_v23 = vpop.eup %4704  ;;  %v2442_v52 = vadd.f32 1.0, %v4703_v8  ;;  %v2472_v0 = vmul.f32 0.5, %v2440_v21  ;;  %v6474_v5 = vmul.f32 %v2470_v48, %v6314_v55  ;;  %v6478_v59 = vadd.f32 %v6286_v27, %v6305_v9 }
 0x615   : > { %v4707_v57 = vpop.eup %4706  ;;  %v2446_v34 = vadd.f32 1.0, %v4705_v23  ;;  %v2473_v45 = vmul.f32 0.5, %v2441_v15  ;;  %v6481_v51 = vmul.f32 %v2480_v54, %v6373_v37  ;;  %v2325_v56 = vmul.f32 0.044715, %v2293_v17 }
 0x616   : > { %v4709_v60 = vpop.eup %4708  ;;  %v2443_v58 = vadd.f32 1.0, %v4707_v57  ;;  %v2474_v13 = vmul.f32 0.5, %v2442_v52  ;;  %v6484_v43 = vmul.f32 %v2471_v62, %v6311_v50  ;;  %v2264_v55 = vmul.f32 %v6478_v59, %v6478_v59 }
 0x617   : > { %v4711_v29 = vpop.eup %4710  ;;  %v2478_v39 = vmul.f32 0.5, %v2446_v34  ;;  %v2444_v10 = vadd.f32 1.0, %v4709_v60  ;;  %v6489_v27 = vmul.f32 %v2472_v0, %v6317_v40  ;;  %v2357_v37 = vadd.f32 %v2325_v56, %v6461_v53 }
 0x618   : > { %v2447_v11 = vadd.f32 1.0, %v4711_v29  ;;  %v2475_v30 = vmul.f32 0.5, %v2443_v58  ;;  %v6493_v49 = vmul.f32 %v2473_v45, %v6320_v46  ;;  %v6496_v38 = vmul.f32 %v2474_v13, %v6326_v7 }
 0x619   : > { %v4713_v18 = vpop.eup %4712  ;;  %v2296_v50 = vmul.f32 %v2264_v55, %v6478_v59  ;;  %v6501_v48 = vadd.f32 %v6305_v9, %v6288_v47  ;;  %v6504_v20 = vmul.f32 %v2478_v39, %v6379_v61  ;;  %v2476_v54 = vmul.f32 0.5, %v2444_v10 }
 0x61a   : > { %v4715_v3 = vpop.eup %4714  ;;  %v2451_v40 = vadd.f32 1.0, %v4713_v18  ;;  %v2389_v21 = vmul.f32 0.7978846, %v2357_v37  ;;  %v2479_v46 = vmul.f32 0.5, %v2447_v11  ;;  %v6509_v47 = vmul.f32 %v2475_v30, %v6323_v22 }
 0x61b   : > { %v4717_v8 = vpop.eup %4716  ;;  %v2449_v15 = vadd.f32 1.0, %v4715_v3  ;;  %v2328_v62 = vmul.f32 0.044715, %v2296_v50  ;;  %v2262_v7 = vmul.f32 %v6501_v48, %v6501_v48  ;;  %v6514_v58 = vmul.f32 %v2476_v54, %v6329_v1 }
 0x61c   : > { %v4719_v23 = vpop.eup %4718  ;;  %v2483_v52 = vmul.f32 0.5, %v2451_v40  ;;  %v2452_v0 = vadd.f32 1.0, %v4717_v8  ;;  %4722 = vtanh.f32 %v2389_v21  ;;  %v6518_v56 = vadd.f32 %v6361_v4, %v6305_v9 }
 0x61d   : > { %v4721_v17 = vpop.eup %4720  ;;  %v2481_v61 = vmul.f32 0.5, %v2449_v15  ;;  %v2450_v57 = vadd.f32 1.0, %v4719_v23  ;;  %v2360_v34 = vadd.f32 %v2328_v62, %v6478_v59  ;;  %v2294_v45 = vmul.f32 %v2262_v7, %v6501_v48 }
 0x61e   : > { %v2484_v60 = vmul.f32 0.5, %v2452_v0  ;;  %v2455_v13 = vadd.f32 1.0, %v4721_v17  ;;  %v6521_v22 = vmul.f32 %v2483_v52, %v6409_v32  ;;  %v6524_v29 = vmul.f32 %v2479_v46, %v6332_v28 }
 0x61f   : > { %v2392_v39 = vmul.f32 0.7978846, %v2360_v34  ;;  %v2326_v10 = vmul.f32 0.044715, %v2294_v45  ;;  %v6527_v55 = vmul.f32 %v2481_v61, %v6415_v19  ;;  %v2482_v11 = vmul.f32 0.5, %v2450_v57 }
 0x620   : > { %v2235_v1 = vmul.f32 %v6518_v56, %v6518_v56  ;;  %v6533_v30 = vadd.f32 %v6305_v9, %v6367_v24  ;;  %v6536_v4 = vmul.f32 %v2484_v60, %v6419_v35  ;;  %v6541_v32 = vadd.f32 %v6375_v44, %v6305_v9 }
 0x621   : > { %4724 = vtanh.f32 %v2392_v39  ;;  %v2358_v28 = vadd.f32 %v2326_v10, %v6501_v48  ;;  %v2487_v19 = vmul.f32 0.5, %v2455_v13  ;;  %v6548_v24 = vadd.f32 %v6305_v9, %v6388_v26 }
 0x622   : > { %v2267_v37 = vmul.f32 %v2235_v1, %v6518_v56  ;;  %v2233_v18 = vmul.f32 %v6533_v30, %v6533_v30  ;;  %v2236_v35 = vmul.f32 %v6541_v32, %v6541_v32  ;;  %v6554_v3 = vadd.f32 %v6399_v25, %v6305_v9 }
 0x623   : > { %v2390_v50 = vmul.f32 0.7978846, %v2358_v28  ;;  %v6558_v44 = vadd.f32 %v6305_v9, %v6403_v63  ;;  %v2234_v21 = vmul.f32 %v6548_v24, %v6548_v24  ;;  %v6565_v26 = vadd.f32 %v6411_v16, %v6305_v9 }
 0x624   : > { %v2299_v40 = vmul.f32 0.044715, %v2267_v37  ;;  %v2265_v54 = vmul.f32 %v2233_v18, %v6533_v30  ;;  %v2268_v8 = vmul.f32 %v2236_v35, %v6541_v32  ;;  %v2239_v25 = vmul.f32 %v6554_v3, %v6554_v3 }
 0x625   : > { %4726 = vtanh.f32 %v2390_v50  ;;  %v2237_v63 = vmul.f32 %v6558_v44, %v6558_v44  ;;  %v2266_v7 = vmul.f32 %v2234_v21, %v6548_v24  ;;  %v2240_v23 = vmul.f32 %v6565_v26, %v6565_v26 }
 0x626   : > { %v4723_v15 = vpop.eup %4722  ;;  %v2331_v46 = vadd.f32 %v2299_v40, %v6518_v56  ;;  %v2297_v62 = vmul.f32 0.044715, %v2265_v54  ;;  %v2300_v52 = vmul.f32 0.044715, %v2268_v8  ;;  %v2271_v0 = vmul.f32 %v2239_v25, %v6554_v3 }
 0x627   : > { %v2453_v16 = vadd.f32 1.0, %v4723_v15  ;;  %v2269_v17 = vmul.f32 %v2237_v63, %v6558_v44  ;;  %v2298_v34 = vmul.f32 0.044715, %v2266_v7  ;;  %v2272_v45 = vmul.f32 %v2240_v23, %v6565_v26 }
 0x628   : > { %v2363_v61 = vmul.f32 0.7978846, %v2331_v46  ;;  %v2329_v57 = vadd.f32 %v2297_v62, %v6533_v30  ;;  %v6581_v60 = vmul.f32 %v2482_v11, %v6427_v6  ;;  %v2332_v13 = vadd.f32 %v2300_v52, %v6541_v32 }
 0x629   : > { %v2303_v39 = vmul.f32 0.044715, %v2271_v0  ;;  %v2301_v10 = vmul.f32 0.044715, %v2269_v17  ;;  %v2330_v28 = vadd.f32 %v2298_v34, %v6548_v24  ;;  %v2304_v37 = vmul.f32 0.044715, %v2272_v45 }
 0x62a   : > { %4728 = vtanh.f32 %v2363_v61  ;;  %v2361_v1 = vmul.f32 0.7978846, %v2329_v57  ;;  %v6586_v50 = vmul.f32 %v2487_v19, %v6431_v42  ;;  %v2364_v35 = vmul.f32 0.7978846, %v2332_v13 }
 0x62b   : > { %v4725_v18 = vpop.eup %4724  ;;  %v2335_v40 = vadd.f32 %v2303_v39, %v6554_v3  ;;  %v2333_v54 = vadd.f32 %v2301_v10, %v6558_v44  ;;  %v2485_v6 = vmul.f32 0.5, %v2453_v16  ;;  %v2362_v11 = vmul.f32 0.7978846, %v2330_v28 }
 0x62c   : > { %4730 = vtanh.f32 %v2361_v1  ;;  %v2336_v21 = vadd.f32 %v2304_v37, %v6565_v26  ;;  %v6593_v63 = vadd.f32 %v6305_v9, %v6421_v31  ;;  %v2456_v15 = vadd.f32 1.0, %v4725_v18 }
 0x62d   : > { %4732 = vtanh.f32 %v2364_v35  ;;  %v2367_v8 = vmul.f32 0.7978846, %v2335_v40  ;;  %v2365_v25 = vmul.f32 0.7978846, %v2333_v54  ;;  %v6597_v19 = vadd.f32 %v6443_v41, %v6305_v9 }
 0x62e   : > { %4734 = vtanh.f32 %v2362_v11  ;;  %v2368_v42 = vmul.f32 0.7978846, %v2336_v21  ;;  %v2238_v62 = vmul.f32 %v6593_v63, %v6593_v63  ;;  %v6603_v7 = vadd.f32 %v6305_v9, %v6447_v14 }
 0x62f   : > { %v4727_v46 = vpop.eup %4726  ;;  %4736 = vtanh.f32 %v2367_v8  ;;  %v6607_v31 = vadd.f32 %v6451_v2, %v6305_v9  ;;  %v6610_v23 = vmul.f32 %v2485_v6, %v6461_v53  ;;  %v2243_v41 = vmul.f32 %v6597_v19, %v6597_v19 }
 0x630   : > { %v2454_v16 = vadd.f32 1.0, %v4727_v46  ;;  %4738 = vtanh.f32 %v2365_v25  ;;  %v2270_v52 = vmul.f32 %v2238_v62, %v6593_v63  ;;  %v2241_v0 = vmul.f32 %v6603_v7, %v6603_v7 }
 0x631   : > { %4740 = vtanh.f32 %v2368_v42  ;;  %v2244_v14 = vmul.f32 %v6607_v31, %v6607_v31  ;;  %v2488_v17 = vmul.f32 0.5, %v2456_v15  ;;  %v2275_v2 = vmul.f32 %v2243_v41, %v6597_v19 }
 0x632   : > { %v6622_v53 = vadd.f32 %v6305_v9, %v6453_v12  ;;  %v2527_v61 = vpack.c.bf16 %v6474_v5, %v6470_v36  ;;  %v2302_v57 = vmul.f32 0.044715, %v2270_v52  ;;  %v2273_v34 = vmul.f32 %v2241_v0, %v6603_v7  ;;  %v4685_v36 = vld [vmem:[%s7539_s18 + $0x8] sm:$0xff]  }
 0x633   : > { %v2276_v45 = vmul.f32 %v2244_v14, %v6607_v31  ;;  %v2528_v13 = vpack.c.bf16 %v6489_v27, %v6484_v43  ;;  %v2486_v10 = vmul.f32 0.5, %v2454_v16  ;;  %v2307_v1 = vmul.f32 0.044715, %v2275_v2  ;;  %4259 = vmatprep.subr.bf16.mxu1 %v4685_v36 }
 0x634   : > { %v4729_v39 = vpop.eup %4728  ;;  %v2242_v28 = vmul.f32 %v6622_v53, %v6622_v53  ;;  %v2529_v9 = vpack.c.bf16 %v6496_v38, %v6493_v49  ;;  %v2334_v37 = vadd.f32 %v2302_v57, %v6593_v63  ;;  %v2305_v18 = vmul.f32 0.044715, %v2273_v34  ;;  %4260 = vmatpush3.bf16.msra.mxu1 %v4685_v36 }
 0x635   : > { %v2427_v12 = vadd.f32 1.0, %v4729_v39  ;;  %v2308_v35 = vmul.f32 0.044715, %v2276_v45  ;;  %v2339_v54 = vadd.f32 %v2307_v1, %v6597_v19  ;;  %v2530_v11 = vpack.c.bf16 %v6514_v58, %v6509_v47 }
 0x636   : > { %v4731_v40 = vpop.eup %4730  ;;  %v2274_v6 = vmul.f32 %v2242_v28, %v6622_v53  ;;  %v2531_v21 = vpack.c.bf16 %v6504_v20, %v6467_v33  ;;  %v2366_v42 = vmul.f32 0.7978846, %v2334_v37  ;;  %v2337_v46 = vadd.f32 %v2305_v18, %v6603_v7  ;;  %v6709_v33 = vld [vmem:[%s7540_s8] ss:$0 sm:$0xff] }
 0x637   : > { %v4733_v8 = vpop.eup %4732  ;;  %v2459_v25 = vmul.f32 0.5, %v2427_v12  ;;  %v2425_v15 = vadd.f32 1.0, %v4731_v40  ;;  %v6643_v16 = vmul.f32 %v2488_v17, %v6478_v59  ;;  %v2371_v52 = vmul.f32 0.7978846, %v2339_v54 }
 0x638   : > { %v4735_v62 = vpop.eup %4734  ;;  %v2428_v41 = vadd.f32 1.0, %v4733_v8  ;;  %v2340_v0 = vadd.f32 %v2308_v35, %v6607_v31  ;;  %4742 = vtanh.f32 %v2366_v42  ;;  %v2306_v34 = vmul.f32 0.044715, %v2274_v6 }
 0x639   : > { %v4737_v14 = vpop.eup %4736  ;;  %v2457_v2 = vmul.f32 0.5, %v2425_v15  ;;  %v2426_v57 = vadd.f32 1.0, %v4735_v62  ;;  %4744 = vtanh.f32 %v2371_v52  ;;  %v2369_v28 = vmul.f32 0.7978846, %v2337_v46 }
 0x63a   : > { %v4739_v45 = vpop.eup %4738  ;;  %v2460_v39 = vmul.f32 0.5, %v2428_v41  ;;  %v2431_v1 = vadd.f32 1.0, %v4737_v14  ;;  %v6647_v37 = vmul.f32 %v2486_v10, %v6501_v48  ;;  %v2491_v59 = vmul.f32 %v2459_v25, %v6518_v56 }
 0x63b   : > { %v4741_v12 = vpop.eup %4740  ;;  %v2458_v17 = vmul.f32 0.5, %v2426_v57  ;;  %v2372_v18 = vmul.f32 0.7978846, %v2340_v0  ;;  %4746 = vtanh.f32 %v2369_v28  ;;  %v2489_v6 = vmul.f32 %v2457_v2, %v6533_v30 }
 0x63c   : > { %v2492_v35 = vmul.f32 %v2460_v39, %v6541_v32  ;;  %v2463_v40 = vmul.f32 0.5, %v2431_v1  ;;  %v2432_v54 = vadd.f32 1.0, %v4741_v12  ;;  %v2338_v15 = vadd.f32 %v2306_v34, %v6622_v53 }
 0x63d   : > { %v2490_v8 = vmul.f32 %v2458_v17, %v6548_v24  ;;  %4748 = vtanh.f32 %v2372_v18  ;;  %v2429_v46 = vadd.f32 1.0, %v4739_v45  ;;  %v2532_v56 = vpack.c.bf16 %v6481_v51, %v6524_v29 }
 0x63e   : > { %v2522_v42 = vpack.c.bf16 %v2492_v35, %v2491_v59  ;;  %v2464_v48 = vmul.f32 0.5, %v2432_v54  ;;  %v2495_v10 = vmul.f32 %v2463_v40, %v6554_v3  ;;  %v2370_v25 = vmul.f32 0.7978846, %v2338_v15 }
 0x63f   : > { %v2521_v32 = vpack.c.bf16 %v2490_v8, %v2489_v6  ;;  %v2533_v62 = vpack.c.bf16 %v6581_v60, %v6527_v55  ;;  %v2534_v24 = vpack.c.bf16 %v6536_v4, %v6521_v22  ;;  %v2535_v41 = vpack.c.bf16 %v6647_v37, %v6610_v23 }
 0x640   : > { %v2496_v30 = vmul.f32 %v2464_v48, %v6565_v26  ;;  %v2536_v52 = vpack.c.bf16 %v6643_v16, %v6586_v50  ;;  %4750 = vtanh.f32 %v2370_v25  ;;  %v2461_v3 = vmul.f32 0.5, %v2429_v46 }
 0x641   : > { %4225 = vmatprep.mubr.msk.bf16.mxu0 %vm1918_vm4, %v2521_v32 }
 0x642   : > { %4226 = vmatmul.mubr.msk.bf16.vlgmr.msra.gmra.mrb[16].mxu0 %vm1918_vm4, %v2522_v42  ;;  %v2524_v51 = vpack.c.bf16 %v2496_v30, %v2495_v10  ;;  %v4743_v29 = vpop.eup %4742  ;;  %v2493_v4 = vmul.f32 %v2461_v3, %v6558_v44 }
 0x643   : > { %v4745_v55 = vpop.eup %4744  ;;  %v2430_v60 = vadd.f32 1.0, %v4743_v29 }
 0x644   : > { %v2435_v26 = vadd.f32 1.0, %v4745_v55 }
 0x645   : > { %v4747_v0 = vpop.eup %4746  ;;  %v2462_v14 = vmul.f32 0.5, %v2430_v60 }
 0x646   : > { %v2467_v2 = vmul.f32 0.5, %v2435_v26  ;;  %v2433_v50 = vadd.f32 1.0, %v4747_v0 }
 0x647   : > { %v4749_v22 = vpop.eup %4748  ;;  %v2494_v23 = vmul.f32 %v2462_v14, %v6593_v63 }
 0x648   : > { %v2436_v16 = vadd.f32 1.0, %v4749_v22  ;;  %v2499_v39 = vmul.f32 %v2467_v2, %v6597_v19  ;;  %v2465_v1 = vmul.f32 0.5, %v2433_v50 }
 0x649   : > { %v2523_v34 = vpack.c.bf16 %v2494_v23, %v2493_v4 }
 0x64a   : > { %v2468_v57 = vmul.f32 0.5, %v2436_v16  ;;  %v4751_v45 = vpop.eup %4750  ;;  %v2497_v63 = vmul.f32 %v2465_v1, %v6603_v7 }
 0x64b   : > { %v2434_v12 = vadd.f32 1.0, %v4751_v45  ;;  %4229 = vmatprep.mubr.msk.bf16.mxu0 %vm1918_vm4, %v2523_v34 }
 0x64c   : > { %v2500_v28 = vmul.f32 %v2468_v57, %v6607_v31  ;;  %4230 = vmatmul.mubr.msk.bf16.gmra.mrb[20].mxu0 %vm1918_vm4, %v2524_v51 }
 0x64d   : > { %v2466_v37 = vmul.f32 0.5, %v2434_v12 }
 0x64e   : > { %v2526_v44 = vpack.c.bf16 %v2500_v28, %v2499_v39 }
 0x64f   : > { %v2498_v59 = vmul.f32 %v2466_v37, %v6622_v53 }
 0x651   : > { %v2525_v17 = vpack.c.bf16 %v2498_v59, %v2497_v63 }
 0x653   : > { %4233 = vmatprep.mubr.msk.bf16.mxu0 %vm1918_vm4, %v2525_v17 }
 0x654   : > { %4234 = vmatmul.mubr.msk.bf16.gmra.mrb[24].mxu0 %vm1918_vm4, %v2526_v44 }
 0x655   : > { %4237 = vmatprep.mubr.msk.bf16.mxu0 %vm1918_vm4, %v2527_v61 }
 0x65c   : > { %4238 = vmatmul.mubr.msk.bf16.gmra.mrb[28].mxu0 %vm1918_vm4, %v2528_v13 }
 0x65d   : > { %4241 = vmatprep.mubr.msk.bf16.mxu0 %vm1918_vm4, %v2529_v9 }
 0x664   : > { %4242 = vmatmul.mubr.msk.bf16.gmra.mrb[32].mxu0 %vm1918_vm4, %v2530_v11 }
 0x665   : > { %4245 = vmatprep.mubr.msk.bf16.mxu0 %vm1918_vm4, %v2531_v21 }
 0x66c   : > { %4246 = vmatmul.mubr.msk.bf16.gmra.mrb[36].mxu0 %vm1918_vm4, %v2532_v56 }
 0x66d   : > { %4249 = vmatprep.mubr.msk.bf16.mxu0 %vm1918_vm4, %v2533_v62 }
 0x674   : > { %4250 = vmatmul.mubr.msk.bf16.gmra.mrb[40].mxu0 %vm1918_vm4, %v2534_v24 }
 0x675   : > { %4253 = vmatprep.mubr.msk.bf16.mxu0 %vm1918_vm4, %v2535_v41 }
 0x67c   : > { %4254 = vmatmul.mubr.msk.bf16.gmra.mrb[44].mxu0 %vm1918_vm4, %v2536_v52 }
 0x715   : > { %v4227_v5 = vpop.f32.mrb[16].mxu0 }
 0x716   : > { %v6712_v43 = vadd.f32 %v4227_v5, %v6709_v33  ;;  %v2658_v27 = vpop.f32.mrb[17].mxu0 }
 0x717   : > { %v6715_v49 = vadd.f32 %v6709_v33, %v2658_v27  ;;  %v4228_v38 = vpop.f32.mrb[18].mxu0 }
 0x718   : > { %v2787_v20 = vmul.f32 %v6712_v43, %v6712_v43  ;;  %v6720_v47 = vadd.f32 %v4228_v38, %v6709_v33  ;;  %v2661_v58 = vpop.f32.mrb[19].mxu0 }
 0x719   : > { %v2785_v19 = vmul.f32 %v6715_v49, %v6715_v49  ;;  %v6725_v7 = vadd.f32 %v6709_v33, %v2661_v58 }
 0x71a   : > { %v2819_v31 = vmul.f32 %v2787_v20, %v6712_v43  ;;  %v2788_v53 = vmul.f32 %v6720_v47, %v6720_v47 }
 0x71b   : > { %v2817_v61 = vmul.f32 %v2785_v19, %v6715_v49  ;;  %v2786_v13 = vmul.f32 %v6725_v7, %v6725_v7 }
 0x71c   : > { %v2851_v9 = vmul.f32 0.044715, %v2819_v31  ;;  %v2820_v11 = vmul.f32 %v2788_v53, %v6720_v47 }
 0x71d   : > { %v2849_v21 = vmul.f32 0.044715, %v2817_v61  ;;  %v2818_v18 = vmul.f32 %v2786_v13, %v6725_v7 }
 0x71e   : > { %v2883_v35 = vadd.f32 %v2851_v9, %v6712_v43  ;;  %v2852_v40 = vmul.f32 0.044715, %v2820_v11 }
 0x71f   : > { %v2881_v54 = vadd.f32 %v2849_v21, %v6715_v49  ;;  %v2850_v6 = vmul.f32 0.044715, %v2818_v18  ;;  %v4231_v42 = vpop.f32.mrb[20].mxu0 }
 0x720   : > { %v2915_v8 = vmul.f32 0.7978846, %v2883_v35  ;;  %v2884_v15 = vadd.f32 %v2852_v40, %v6720_v47  ;;  %v6740_v56 = vadd.f32 %v4231_v42, %v6709_v33  ;;  %v2674_v10 = vpop.f32.mrb[21].mxu0 }
 0x721   : > { %v2913_v46 = vmul.f32 0.7978846, %v2881_v54  ;;  %v2882_v48 = vadd.f32 %v2850_v6, %v6725_v7  ;;  %v6743_v32 = vadd.f32 %v6709_v33, %v2674_v10  ;;  %v4232_v62 = vpop.f32.mrb[22].mxu0 }
 0x722   : > { %4752 = vtanh.f32 %v2915_v8  ;;  %v2916_v25 = vmul.f32 0.7978846, %v2884_v15  ;;  %v2791_v24 = vmul.f32 %v6740_v56, %v6740_v56  ;;  %v6748_v41 = vadd.f32 %v4232_v62, %v6709_v33  ;;  %v2677_v52 = vpop.f32.mrb[23].mxu0 }
 0x723   : > { %4754 = vtanh.f32 %v2913_v46  ;;  %v2914_v30 = vmul.f32 0.7978846, %v2882_v48  ;;  %v2789_v51 = vmul.f32 %v6743_v32, %v6743_v32  ;;  %v6753_v29 = vadd.f32 %v6709_v33, %v2677_v52 }
 0x724   : > { %4756 = vtanh.f32 %v2916_v25  ;;  %v2823_v3 = vmul.f32 %v2791_v24, %v6740_v56  ;;  %v2792_v55 = vmul.f32 %v6748_v41, %v6748_v41 }
 0x725   : > { %4758 = vtanh.f32 %v2914_v30  ;;  %v2821_v60 = vmul.f32 %v2789_v51, %v6743_v32  ;;  %v2790_v26 = vmul.f32 %v6753_v29, %v6753_v29 }
 0x726   : > { %v2855_v0 = vmul.f32 0.044715, %v2823_v3  ;;  %v2824_v14 = vmul.f32 %v2792_v55, %v6748_v41 }
 0x727   : > { %v2853_v22 = vmul.f32 0.044715, %v2821_v60  ;;  %v2822_v4 = vmul.f32 %v2790_v26, %v6753_v29  ;;  %v4235_v23 = vpop.f32.mrb[24].mxu0 }
 0x728   : > { %v2887_v2 = vadd.f32 %v2855_v0, %v6740_v56  ;;  %v2856_v50 = vmul.f32 0.044715, %v2824_v14  ;;  %v6765_v16 = vadd.f32 %v4235_v23, %v6709_v33  ;;  %v2690_v57 = vpop.f32.mrb[25].mxu0 }
 0x729   : > { %v2885_v34 = vadd.f32 %v2853_v22, %v6743_v32  ;;  %v2854_v45 = vmul.f32 0.044715, %v2822_v4  ;;  %v6769_v39 = vadd.f32 %v6709_v33, %v2690_v57  ;;  %v4236_v1 = vpop.f32.mrb[26].mxu0 }
 0x72a   : > { %v2919_v28 = vmul.f32 0.7978846, %v2887_v2  ;;  %v2888_v12 = vadd.f32 %v2856_v50, %v6748_v41  ;;  %v2795_v37 = vmul.f32 %v6765_v16, %v6765_v16  ;;  %v6775_v44 = vadd.f32 %v4236_v1, %v6709_v33  ;;  %v2693_v63 = vpop.f32.mrb[27].mxu0 }
 0x72b   : > { %v2917_v17 = vmul.f32 0.7978846, %v2885_v34  ;;  %v2886_v36 = vadd.f32 %v2854_v45, %v6753_v29  ;;  %v2793_v5 = vmul.f32 %v6769_v39, %v6769_v39  ;;  %v6781_v27 = vadd.f32 %v6709_v33, %v2693_v63 }
 0x72c   : > { %v4753_v59 = vpop.eup %4752  ;;  %4760 = vtanh.f32 %v2919_v28  ;;  %v2920_v58 = vmul.f32 0.7978846, %v2888_v12  ;;  %v2827_v19 = vmul.f32 %v2795_v37, %v6765_v16  ;;  %v2796_v46 = vmul.f32 %v6775_v44, %v6775_v44 }
 0x72d   : > { %v4755_v38 = vpop.eup %4754  ;;  %v2979_v20 = vadd.f32 1.0, %v4753_v59  ;;  %4762 = vtanh.f32 %v2917_v17  ;;  %v2918_v61 = vmul.f32 0.7978846, %v2886_v36  ;;  %v2825_v13 = vmul.f32 %v2793_v5, %v6769_v39 }
 0x72e   : > { %v4757_v31 = vpop.eup %4756  ;;  %v2977_v53 = vadd.f32 1.0, %v4755_v38  ;;  %4764 = vtanh.f32 %v2920_v58  ;;  %v2859_v18 = vmul.f32 0.044715, %v2827_v19  ;;  %v2794_v30 = vmul.f32 %v6781_v27, %v6781_v27 }
 0x72f   : > { %v4759_v9 = vpop.eup %4758  ;;  %v3011_v11 = vmul.f32 0.5, %v2979_v20  ;;  %v2980_v21 = vadd.f32 1.0, %v4757_v31  ;;  %4766 = vtanh.f32 %v2918_v61  ;;  %v2857_v54 = vmul.f32 0.044715, %v2825_v13  ;;  %v4239_v6 = vpop.f32.mrb[28].mxu0 }
 0x730   : > { %v3009_v35 = vmul.f32 0.5, %v2977_v53  ;;  %v2978_v40 = vadd.f32 1.0, %v4759_v9  ;;  %v2891_v42 = vadd.f32 %v2859_v18, %v6765_v16  ;;  %v2706_v48 = vpop.f32.mrb[29].mxu0  ;;  %v6796_v3 = vadd.f32 %v4239_v6, %v6709_v33 }
 0x731   : > { %v3043_v8 = vmul.f32 %v3011_v11, %v6712_v43  ;;  %v3012_v15 = vmul.f32 0.5, %v2980_v21  ;;  %v2889_v62 = vadd.f32 %v2857_v54, %v6769_v39  ;;  %v4240_v24 = vpop.f32.mrb[30].mxu0  ;;  %v2828_v43 = vmul.f32 %v2796_v46, %v6775_v44 }
 0x732   : > { %v3041_v10 = vmul.f32 %v3009_v35, %v6715_v49  ;;  %v3010_v25 = vmul.f32 0.5, %v2978_v40  ;;  %v2923_v51 = vmul.f32 0.7978846, %v2891_v42  ;;  %v2709_v55 = vpop.f32.mrb[31].mxu0  ;;  %v2826_v49 = vmul.f32 %v2794_v30, %v6781_v27 }
 0x733   : > { %v3044_v52 = vmul.f32 %v3012_v15, %v6720_v47  ;;  %v2921_v26 = vmul.f32 0.7978846, %v2889_v62  ;;  %v6801_v0 = vadd.f32 %v6709_v33, %v2706_v48  ;;  %v2860_v22 = vmul.f32 0.044715, %v2828_v43 }
 0x734   : > { %v3042_v60 = vmul.f32 %v3010_v25, %v6725_v7  ;;  %4768 = vtanh.f32 %v2923_v51  ;;  %v2799_v47 = vmul.f32 %v6796_v3, %v6796_v3  ;;  %v2858_v4 = vmul.f32 0.044715, %v2826_v49 }
 0x735   : > { %v3074_v14 = vpack.c.bf16 %v3044_v52, %v3043_v8  ;;  %4770 = vtanh.f32 %v2921_v26  ;;  %v2797_v23 = vmul.f32 %v6801_v0, %v6801_v0  ;;  %v6808_v2 = vadd.f32 %v4240_v24, %v6709_v33 }
 0x736   : > { %v4761_v7 = vpop.eup %4760  ;;  %v2892_v50 = vadd.f32 %v2860_v22, %v6775_v44  ;;  %v2831_v57 = vmul.f32 %v2799_v47, %v6796_v3  ;;  %v6813_v34 = vadd.f32 %v6709_v33, %v2709_v55  ;;  %v3073_v45 = vpack.c.bf16 %v3042_v60, %v3041_v10 }
 0x737   : > { %v4763_v1 = vpop.eup %4762  ;;  %v2983_v28 = vadd.f32 1.0, %v4761_v7  ;;  %v2890_v12 = vadd.f32 %v2858_v4, %v6781_v27  ;;  %v2829_v37 = vmul.f32 %v2797_v23, %v6801_v0  ;;  %v2800_v63 = vmul.f32 %v6808_v2, %v6808_v2  ;;  %v4243_v59 = vpop.f32.mrb[32].mxu0 }
 0x738   : > { %v4765_v17 = vpop.eup %4764  ;;  %v2981_v36 = vadd.f32 1.0, %v4763_v1  ;;  %v2924_v5 = vmul.f32 0.7978846, %v2892_v50  ;;  %v2863_v38 = vmul.f32 0.044715, %v2831_v57  ;;  %v2798_v20 = vmul.f32 %v6813_v34, %v6813_v34  ;;  %v2722_v58 = vpop.f32.mrb[33].mxu0  ;;  %4261 = vmatprep.mubr.msk.bf16.mxu1 %vm3112_vm7, %v3073_v45 }
 0x739   : > { %v4767_v19 = vpop.eup %4766  ;;  %v3015_v31 = vmul.f32 0.5, %v2983_v28  ;;  %v2984_v53 = vadd.f32 1.0, %v4765_v17  ;;  %v2922_v61 = vmul.f32 0.7978846, %v2890_v12  ;;  %v2861_v13 = vmul.f32 0.044715, %v2829_v37  ;;  %4262 = vmatmul.mubr.msk.bf16.vlgmr.msra.gmra.mrb[20].mxu1 %vm3112_vm7, %v3074_v14 }
 0x73a   : > { %v3013_v9 = vmul.f32 0.5, %v2981_v36  ;;  %v2982_v11 = vadd.f32 1.0, %v4767_v19  ;;  %4772 = vtanh.f32 %v2924_v5  ;;  %v2895_v21 = vadd.f32 %v2863_v38, %v6796_v3  ;;  %v4244_v18 = vpop.f32.mrb[34].mxu0 }
 0x73b   : > { %v3016_v35 = vmul.f32 0.5, %v2984_v53  ;;  %4774 = vtanh.f32 %v2922_v61  ;;  %v2893_v40 = vadd.f32 %v2861_v13, %v6801_v0  ;;  %v2725_v54 = vpop.f32.mrb[35].mxu0  ;;  %v6826_v6 = vmul.f32 %v3015_v31, %v6740_v56 }
 0x73c   : > { %v6829_v8 = vmul.f32 %v3013_v9, %v6743_v32  ;;  %v2927_v15 = vmul.f32 0.7978846, %v2895_v21  ;;  %v2832_v42 = vmul.f32 %v2800_v63, %v6808_v2  ;;  %v3014_v46 = vmul.f32 0.5, %v2982_v11 }
 0x73d   : > { %v2925_v48 = vmul.f32 0.7978846, %v2893_v40  ;;  %v2830_v10 = vmul.f32 %v2798_v20, %v6813_v34  ;;  %v6834_v25 = vadd.f32 %v4243_v59, %v6709_v33  ;;  %v6837_v30 = vmul.f32 %v3016_v35, %v6748_v41 }
 0x73e   : > { %v4769_v62 = vpop.eup %4768  ;;  %4776 = vtanh.f32 %v2927_v15  ;;  %v2864_v56 = vmul.f32 0.044715, %v2832_v42  ;;  %v6840_v24 = vadd.f32 %v6709_v33, %v2722_v58  ;;  %v6848_v49 = vadd.f32 %v4244_v18, %v6709_v33 }
 0x73f   : > { %v4771_v32 = vpop.eup %4770  ;;  %v2987_v52 = vadd.f32 1.0, %v4769_v62  ;;  %4778 = vtanh.f32 %v2925_v48  ;;  %v2862_v51 = vmul.f32 0.044715, %v2830_v10  ;;  %v2803_v43 = vmul.f32 %v6834_v25, %v6834_v25  ;;  %v4247_v55 = vpop.f32.mrb[36].mxu0 }
 0x740   : > { %v2985_v60 = vadd.f32 1.0, %v4771_v32  ;;  %v2896_v26 = vadd.f32 %v2864_v56, %v6808_v2  ;;  %v2801_v41 = vmul.f32 %v6840_v24, %v6840_v24  ;;  %v2738_v14 = vpop.f32.mrb[37].mxu0  ;;  %v6853_v23 = vadd.f32 %v6709_v33, %v2725_v54 }
 0x741   : > { %v3019_v22 = vmul.f32 0.5, %v2987_v52  ;;  %v2894_v47 = vadd.f32 %v2862_v51, %v6813_v34  ;;  %v2835_v4 = vmul.f32 %v2803_v43, %v6834_v25  ;;  %v4248_v7 = vpop.f32.mrb[38].mxu0  ;;  %v6856_v50 = vmul.f32 %v3014_v46, %v6753_v29 }
 0x742   : > { %v2928_v57 = vmul.f32 0.7978846, %v2896_v26  ;;  %v2833_v45 = vmul.f32 %v2801_v41, %v6840_v24  ;;  %v2804_v1 = vmul.f32 %v6848_v49, %v6848_v49  ;;  %v2741_v28 = vpop.f32.mrb[39].mxu0  ;;  %v3017_v12 = vmul.f32 0.5, %v2985_v60 }
 0x743   : > { %v2926_v37 = vmul.f32 0.7978846, %v2894_v47  ;;  %v2867_v63 = vmul.f32 0.044715, %v2835_v4  ;;  %v2802_v59 = vmul.f32 %v6853_v23, %v6853_v23  ;;  %v6864_v36 = vmul.f32 %v3019_v22, %v6765_v16 }
 0x744   : > { %v4773_v17 = vpop.eup %4772  ;;  %4780 = vtanh.f32 %v2928_v57  ;;  %v2865_v29 = vmul.f32 0.044715, %v2833_v45  ;;  %v2836_v5 = vmul.f32 %v2804_v1, %v6848_v49  ;;  %v6871_v13 = vadd.f32 %v4247_v55, %v6709_v33 }
 0x745   : > { %v4775_v38 = vpop.eup %4774  ;;  %v2988_v20 = vadd.f32 1.0, %v4773_v17  ;;  %4782 = vtanh.f32 %v2926_v37  ;;  %v2899_v58 = vadd.f32 %v2867_v63, %v6834_v25  ;;  %v2834_v19 = vmul.f32 %v2802_v59, %v6853_v23 }
 0x746   : > { %v2986_v31 = vadd.f32 1.0, %v4775_v38  ;;  %v2897_v53 = vadd.f32 %v2865_v29, %v6840_v24  ;;  %v2868_v61 = vmul.f32 0.044715, %v2836_v5  ;;  %v6874_v21 = vadd.f32 %v6709_v33, %v2738_v14 }
 0x747   : > { %v3020_v16 = vmul.f32 0.5, %v2988_v20  ;;  %v2931_v9 = vmul.f32 0.7978846, %v2899_v58  ;;  %v2866_v11 = vmul.f32 0.044715, %v2834_v19  ;;  %v4251_v18 = vpop.f32.mrb[40].mxu0  ;;  %v2807_v42 = vmul.f32 %v6871_v13, %v6871_v13 }
 0x748   : > { %v4777_v35 = vpop.eup %4776  ;;  %v3018_v40 = vmul.f32 0.5, %v2986_v31  ;;  %v2929_v54 = vmul.f32 0.7978846, %v2897_v53  ;;  %v2900_v15 = vadd.f32 %v2868_v61, %v6848_v49  ;;  %v2754_v46 = vpop.f32.mrb[41].mxu0  ;;  %v6880_v10 = vmul.f32 %v3017_v12, %v6769_v39 }
 0x749   : > { %v4779_v48 = vpop.eup %4778  ;;  %v2991_v62 = vadd.f32 1.0, %v4777_v35  ;;  %4784 = vtanh.f32 %v2931_v9  ;;  %v2898_v56 = vadd.f32 %v2866_v11, %v6853_v23  ;;  %v6883_v32 = vpop.f32.mrb[42].mxu0  ;;  %v6886_v52 = vmul.f32 %v3020_v16, %v6775_v44 }
 0x74a   : > { %v2989_v51 = vadd.f32 1.0, %v4779_v48  ;;  %4786 = vtanh.f32 %v2929_v54  ;;  %v2932_v43 = vmul.f32 0.7978846, %v2900_v15  ;;  %v6888_v55 = vpop.f32.mrb[43].mxu0  ;;  %v2839_v41 = vmul.f32 %v2807_v42, %v6871_v13 }
 0x74b   : > { %v3023_v60 = vmul.f32 0.5, %v2991_v62  ;;  %v2930_v26 = vmul.f32 0.7978846, %v2898_v56  ;;  %v2805_v39 = vmul.f32 %v6874_v21, %v6874_v21  ;;  %v6894_v14 = vmul.f32 %v3018_v40, %v6781_v27 }
 0x74c   : > { %4788 = vtanh.f32 %v2932_v43  ;;  %v6897_v22 = vadd.f32 %v4248_v7, %v6709_v33  ;;  %v6900_v44 = vadd.f32 %v6709_v33, %v2741_v28  ;;  %v3021_v47 = vmul.f32 0.5, %v2989_v51 }
 0x74d   : > { %4790 = vtanh.f32 %v2930_v26  ;;  %v2871_v4 = vmul.f32 0.044715, %v2839_v41  ;;  %v2837_v57 = vmul.f32 %v2805_v39, %v6874_v21  ;;  %v6904_v1 = vmul.f32 %v3023_v60, %v6796_v3 }
 0x74e   : > { %v4781_v45 = vpop.eup %4780  ;;  %v2808_v27 = vmul.f32 %v6897_v22, %v6897_v22  ;;  %v2806_v12 = vmul.f32 %v6900_v44, %v6900_v44  ;;  %v3075_v7 = vpack.c.bf16 %v6856_v50, %v6829_v8  ;;  %v3076_v17 = vpack.c.bf16 %v6837_v30, %v6826_v6 }
 0x74f   : > { %v4783_v28 = vpop.eup %4782  ;;  %v2992_v37 = vadd.f32 1.0, %v4781_v45  ;;  %v2903_v63 = vadd.f32 %v2871_v4, %v6871_v13  ;;  %v2869_v59 = vmul.f32 0.044715, %v2837_v57  ;;  %v6915_v29 = vpop.f32.mrb[44].mxu0  ;;  %v6921_v20 = vadd.f32 %v4251_v18, %v6709_v33 }
 0x750   : > { %v2990_v3 = vadd.f32 1.0, %v4783_v28  ;;  %v2840_v5 = vmul.f32 %v2808_v27, %v6897_v22  ;;  %v2838_v38 = vmul.f32 %v2806_v12, %v6900_v44  ;;  %4265 = vmatprep.mubr.msk.bf16.mxu1 %vm3112_vm7, %v3075_v7  ;;  %v2770_v8 = vpop.f32.mrb[45].mxu0  ;;  %v6926_v6 = vadd.f32 %v6709_v33, %v2754_v46 }
 0x751   : > { %v3024_v50 = vmul.f32 0.5, %v2992_v37  ;;  %v2935_v58 = vmul.f32 0.7978846, %v2903_v63  ;;  %v2901_v19 = vadd.f32 %v2869_v59, %v6874_v21  ;;  %4266 = vmatmul.mubr.msk.bf16.gmra.mrb[24].mxu1 %vm3112_vm7, %v3076_v17  ;;  %v4256_v30 = vpop.f32.mrb[46].mxu0  ;;  %v6929_v31 = vmul.f32 %v3021_v47, %v6801_v0 }
 0x752   : > { %v2872_v53 = vmul.f32 0.044715, %v2840_v5  ;;  %v2870_v61 = vmul.f32 0.044715, %v2838_v38  ;;  %v2811_v16 = vmul.f32 %v6921_v20, %v6921_v20  ;;  %v2773_v9 = vpop.f32.mrb[47].mxu0  ;;  %v3022_v18 = vmul.f32 0.5, %v2990_v3 }
 0x753   : > { %v4785_v11 = vpop.eup %4784  ;;  %4792 = vtanh.f32 %v2935_v58  ;;  %v2933_v35 = vmul.f32 0.7978846, %v2901_v19  ;;  %v2809_v40 = vmul.f32 %v6926_v6, %v6926_v6  ;;  %v6936_v15 = vmul.f32 %v3024_v50, %v6808_v2 }
 0x754   : > { %v4787_v54 = vpop.eup %4786  ;;  %v2995_v42 = vadd.f32 1.0, %v4785_v11  ;;  %v2904_v0 = vadd.f32 %v2872_v53, %v6897_v22  ;;  %v2902_v46 = vadd.f32 %v2870_v61, %v6900_v44  ;;  %v2843_v62 = vmul.f32 %v2811_v16, %v6921_v20 }
 0x755   : > { %v2993_v48 = vadd.f32 1.0, %v4787_v54  ;;  %4794 = vtanh.f32 %v2933_v35  ;;  %v2841_v56 = vmul.f32 %v2809_v40, %v6926_v6  ;;  %v6944_v41 = vadd.f32 %v6883_v32, %v6709_v33 }
 0x756   : > { %v4789_v51 = vpop.eup %4788  ;;  %v3027_v43 = vmul.f32 0.5, %v2995_v42  ;;  %v2936_v60 = vmul.f32 0.7978846, %v2904_v0  ;;  %v2934_v26 = vmul.f32 0.7978846, %v2902_v46  ;;  %v6947_v45 = vmul.f32 %v3022_v18, %v6813_v34 }
 0x757   : > { %v4791_v2 = vpop.eup %4790  ;;  %v3025_v39 = vmul.f32 0.5, %v2993_v48  ;;  %v2996_v47 = vadd.f32 1.0, %v4789_v51  ;;  %v2875_v4 = vmul.f32 0.044715, %v2843_v62  ;;  %v2873_v57 = vmul.f32 0.044715, %v2841_v56 }
 0x758   : > { %v2994_v27 = vadd.f32 1.0, %v4791_v2  ;;  %4796 = vtanh.f32 %v2936_v60  ;;  %v2812_v12 = vmul.f32 %v6944_v41, %v6944_v41  ;;  %v6952_v7 = vmul.f32 %v3027_v43, %v6834_v25 }
 0x759   : > { %v3028_v28 = vmul.f32 0.5, %v2996_v47  ;;  %4798 = vtanh.f32 %v2934_v26  ;;  %v2907_v32 = vadd.f32 %v2875_v4, %v6921_v20  ;;  %v6956_v37 = vmul.f32 %v3025_v39, %v6840_v24 }
 0x75a   : > { %v2905_v63 = vadd.f32 %v2873_v57, %v6926_v6  ;;  %v2844_v34 = vmul.f32 %v2812_v12, %v6944_v41  ;;  %v6962_v59 = vadd.f32 %v6709_v33, %v6888_v55  ;;  %v3026_v17 = vmul.f32 0.5, %v2994_v27 }
 0x75b   : > { %v2939_v3 = vmul.f32 0.7978846, %v2907_v32  ;;  %v3077_v25 = vpack.c.bf16 %v6894_v14, %v6880_v10  ;;  %v3078_v5 = vpack.c.bf16 %v6886_v52, %v6864_v36  ;;  %v6969_v38 = vmul.f32 %v3028_v28, %v6848_v49 }
 0x75c   : > { %v2937_v24 = vmul.f32 0.7978846, %v2905_v63  ;;  %v2876_v50 = vmul.f32 0.044715, %v2844_v34  ;;  %v2810_v58 = vmul.f32 %v6962_v59, %v6962_v59  ;;  %v6976_v55 = vadd.f32 %v6915_v29, %v6709_v33 }
 0x75d   : > { %v4793_v19 = vpop.eup %4792  ;;  %4800 = vtanh.f32 %v2939_v3  ;;  %4269 = vmatprep.mubr.msk.bf16.mxu1 %vm3112_vm7, %v3077_v25  ;;  %v6979_v10 = vadd.f32 %v6709_v33, %v2770_v8  ;;  %v6982_v36 = vadd.f32 %v4256_v30, %v6709_v33  ;;  %v6994_v30 = vadd.f32 %v6709_v33, %v2773_v9 }
 0x75e   : > { %v2999_v49 = vadd.f32 1.0, %v4793_v19  ;;  %4802 = vtanh.f32 %v2937_v24  ;;  %v2908_v52 = vadd.f32 %v2876_v50, %v6944_v41  ;;  %v2842_v14 = vmul.f32 %v2810_v58, %v6962_v59  ;;  %4270 = vmatmul.mubr.msk.bf16.gmra.mrb[28].mxu1 %vm3112_vm7, %v3078_v5 }
 0x75f   : > { %v4795_v53 = vpop.eup %4794  ;;  %v2815_v61 = vmul.f32 %v6976_v55, %v6976_v55  ;;  %v2813_v29 = vmul.f32 %v6979_v10, %v6979_v10  ;;  %v2816_v8 = vmul.f32 %v6982_v36, %v6982_v36  ;;  %v2814_v0 = vmul.f32 %v6994_v30, %v6994_v30 }
 0x760   : > { %v3031_v16 = vmul.f32 0.5, %v2999_v49  ;;  %v2997_v11 = vadd.f32 1.0, %v4795_v53  ;;  %v2940_v18 = vmul.f32 0.7978846, %v2908_v52  ;;  %v2874_v35 = vmul.f32 0.044715, %v2842_v14 }
 0x761   : > { %v2847_v40 = vmul.f32 %v2815_v61, %v6976_v55  ;;  %v2845_v54 = vmul.f32 %v2813_v29, %v6979_v10  ;;  %v2848_v42 = vmul.f32 %v2816_v8, %v6982_v36  ;;  %v3058_v48 = vmul.f32 %v3026_v17, %v6853_v23 }
 0x762   : > { %v4797_v46 = vpop.eup %4796  ;;  %v7003_v62 = vmul.f32 %v3031_v16, %v6871_v13  ;;  %4804 = vtanh.f32 %v2940_v18  ;;  %v2906_v33 = vadd.f32 %v2874_v35, %v6962_v59  ;;  %v2846_v60 = vmul.f32 %v2814_v0, %v6994_v30 }
 0x763   : > { %v4799_v9 = vpop.eup %4798  ;;  %v3000_v56 = vadd.f32 1.0, %v4797_v46  ;;  %v2879_v51 = vmul.f32 0.044715, %v2847_v40  ;;  %v2877_v43 = vmul.f32 0.044715, %v2845_v54  ;;  %v3029_v26 = vmul.f32 0.5, %v2997_v11 }
 0x764   : > { %v2998_v2 = vadd.f32 1.0, %v4799_v9  ;;  %v2938_v39 = vmul.f32 0.7978846, %v2906_v33  ;;  %v2880_v47 = vmul.f32 0.044715, %v2848_v42  ;;  %v3079_v28 = vpack.c.bf16 %v6947_v45, %v6929_v31 }
 0x765   : > { %v3032_v4 = vmul.f32 0.5, %v3000_v56  ;;  %v2911_v57 = vadd.f32 %v2879_v51, %v6976_v55  ;;  %v2909_v23 = vadd.f32 %v2877_v43, %v6979_v10  ;;  %v2878_v13 = vmul.f32 0.044715, %v2846_v60 }
 0x766   : > { %v3030_v27 = vmul.f32 0.5, %v2998_v2  ;;  %4806 = vtanh.f32 %v2938_v39  ;;  %v2912_v12 = vadd.f32 %v2880_v47, %v6982_v36  ;;  %v3061_v5 = vmul.f32 %v3029_v26, %v6874_v21  ;;  %4273 = vmatprep.mubr.msk.bf16.mxu1 %vm3112_vm7, %v3079_v28 }
 0x767   : > { %v4801_v32 = vpop.eup %4800  ;;  %v3064_v63 = vmul.f32 %v3032_v4, %v6897_v22  ;;  %v2943_v34 = vmul.f32 0.7978846, %v2911_v57  ;;  %v2941_v17 = vmul.f32 0.7978846, %v2909_v23  ;;  %v2910_v3 = vadd.f32 %v2878_v13, %v6994_v30 }
 0x768   : > { %v4803_v25 = vpop.eup %4802  ;;  %v3062_v24 = vmul.f32 %v3030_v27, %v6900_v44  ;;  %v2944_v50 = vmul.f32 0.7978846, %v2912_v12  ;;  %v3080_v58 = vpack.c.bf16 %v6936_v15, %v6904_v1  ;;  %v3003_v19 = vadd.f32 1.0, %v4801_v32 }
 0x769   : > { %4808 = vtanh.f32 %v2943_v34  ;;  %v2942_v31 = vmul.f32 0.7978846, %v2910_v3  ;;  %v3081_v22 = vpack.c.bf16 %v3058_v48, %v6956_v37  ;;  %v3082_v45 = vpack.c.bf16 %v6969_v38, %v6952_v7 }
 0x76a   : > { %4810 = vtanh.f32 %v2941_v17  ;;  %4274 = vmatmul.mubr.msk.bf16.gmra.mrb[32].mxu1 %vm3112_vm7, %v3080_v58  ;;  %v3083_v21 = vpack.c.bf16 %v3062_v24, %v3061_v5  ;;  %v3084_v44 = vpack.c.bf16 %v3064_v63, %v7003_v62  ;;  %v3035_v1 = vmul.f32 0.5, %v3003_v19 }
 0x76b   : > { %4812 = vtanh.f32 %v2944_v50  ;;  %4277 = vmatprep.mubr.msk.bf16.mxu1 %vm3112_vm7, %v3081_v22  ;;  %v3001_v15 = vadd.f32 1.0, %v4803_v25 }
 0x76c   : > { %v4805_v49 = vpop.eup %4804  ;;  %4814 = vtanh.f32 %v2942_v31  ;;  %v3067_v37 = vmul.f32 %v3035_v1, %v6921_v20 }
 0x76d   : > { %v3004_v52 = vadd.f32 1.0, %v4805_v49  ;;  %v3033_v61 = vmul.f32 0.5, %v3001_v15 }
 0x76f   : > { %v3036_v14 = vmul.f32 0.5, %v3004_v52  ;;  %v3065_v40 = vmul.f32 %v3033_v61, %v6926_v6 }
 0x770   : > { %v4807_v53 = vpop.eup %4806 }
 0x771   : > { %v3068_v29 = vmul.f32 %v3036_v14, %v6944_v41  ;;  %v3002_v8 = vadd.f32 1.0, %v4807_v53 }
 0x772   : > { %4278 = vmatmul.mubr.msk.bf16.gmra.mrb[36].mxu1 %vm3112_vm7, %v3082_v45 }
 0x773   : > { %v4809_v7 = vpop.eup %4808  ;;  %v3034_v38 = vmul.f32 0.5, %v3002_v8  ;;  %4281 = vmatprep.mubr.msk.bf16.mxu1 %vm3112_vm7, %v3083_v21  ;;  %v3086_v16 = vpack.c.bf16 %v3068_v29, %v3067_v37 }
 0x774   : > { %v4811_v11 = vpop.eup %4810  ;;  %v3007_v18 = vadd.f32 1.0, %v4809_v7 }
 0x775   : > { %v4813_v35 = vpop.eup %4812  ;;  %v3066_v54 = vmul.f32 %v3034_v38, %v6962_v59  ;;  %v3005_v42 = vadd.f32 1.0, %v4811_v11 }
 0x776   : > { %v4815_v20 = vpop.eup %4814  ;;  %v3039_v0 = vmul.f32 0.5, %v3007_v18  ;;  %v3008_v46 = vadd.f32 1.0, %v4813_v35 }
 0x777   : > { %v3037_v41 = vmul.f32 0.5, %v3005_v42  ;;  %v3006_v48 = vadd.f32 1.0, %v4815_v20  ;;  %v3085_v62 = vpack.c.bf16 %v3066_v54, %v3065_v40 }
 0x778   : > { %v3040_v33 = vmul.f32 0.5, %v3008_v46  ;;  %v3071_v56 = vmul.f32 %v3039_v0, %v6976_v55  ;;  %v7043_v55 = vld [vmem:[%s7541_s19] ss:$0 sm:$0xff] }
 0x779   : > { %v3038_v9 = vmul.f32 0.5, %v3006_v48  ;;  %v3069_v43 = vmul.f32 %v3037_v41, %v6979_v10 }
 0x77a   : > { %v3072_v51 = vmul.f32 %v3040_v33, %v6982_v36  ;;  %4282 = vmatmul.mubr.msk.bf16.gmra.mrb[40].mxu1 %vm3112_vm7, %v3084_v44 }
 0x77b   : > { %v3070_v6 = vmul.f32 %v3038_v9, %v6994_v30  ;;  %4285 = vmatprep.mubr.msk.bf16.mxu1 %vm3112_vm7, %v3085_v62 }
 0x77c   : > { %v3088_v59 = vpack.c.bf16 %v3072_v51, %v3071_v56 }
 0x77d   : > { %v3087_v60 = vpack.c.bf16 %v3070_v6, %v3069_v43 }
 0x782   : > { %4286 = vmatmul.mubr.msk.bf16.gmra.mrb[44].mxu1 %vm3112_vm7, %v3086_v16 }
 0x783   : > { %4289 = vmatprep.mubr.msk.bf16.mxu1 %vm3112_vm7, %v3087_v60 }
 0x78a   : > { %4290 = vmatmul.mubr.msk.bf16.gmra.mrb[48].mxu1 %vm3112_vm7, %v3088_v59 }
 0x80c   : > { %v4263_v36 = vpop.f32.mrb[20].mxu1 }
 0x80d   : > { %v7046_v10 = vadd.f32 %v4263_v36, %v7043_v55  ;;  %v3195_v30 = vpop.f32.mrb[21].mxu1 }
 0x80e   : > { %v7049_v26 = vadd.f32 %v7043_v55, %v3195_v30  ;;  %v4264_v2 = vpop.f32.mrb[22].mxu1 }
 0x80f   : > { %v7052_v39 = vadd.f32 %v4264_v2, %v7043_v55  ;;  %v3198_v47 = vpop.f32.mrb[23].mxu1  ;;  %v3329_v4 = vsel %vm3322_vm8, %v7046_v10, -inf }
 0x810   : > { %3330 = vmax.xlane.f32.xlu1 %v3329_v4  ;;  %v3323_v57 = vsel %vm3322_vm8, %v7049_v26, -inf  ;;  %v7059_v23 = vadd.f32 %v7043_v55, %v3198_v47 }
 0x811   : > { %3324 = vmax.xlane.f32.xlu0 %v3323_v57  ;;  %v3332_v13 = vsel %vm3322_vm8, %v7052_v39, -inf }
 0x812   : > { %v3326_v27 = vsel %vm3322_vm8, %v7059_v23, -inf }
 0x814   : > { %3333 = vmax.xlane.f32.xlu1 %v3332_v13 }
 0x818   : > { %3327 = vmax.xlane.f32.xlu1 %v3326_v27 }
 0x824   : > { %v4267_v12 = vpop.f32.mrb[24].mxu1 }
 0x825   : > { %v7066_v28 = vadd.f32 %v4267_v12, %v7043_v55  ;;  %v3211_v32 = vpop.f32.mrb[25].mxu1 }
 0x826   : > { %v4268_v63 = vpop.f32.mrb[26].mxu1  ;;  %v7069_v34 = vadd.f32 %v7043_v55, %v3211_v32 }
 0x827   : > { %v3214_v17 = vpop.f32.mrb[27].mxu1  ;;  %v3341_v3 = vsel %vm3322_vm8, %v7066_v28, -inf  ;;  %v7074_v25 = vadd.f32 %v4268_v63, %v7043_v55 }
 0x828   : > { %3342 = vmax.xlane.f32.xlu1 %v3341_v3  ;;  %v3335_v5 = vsel %vm3322_vm8, %v7069_v34, -inf  ;;  %v7079_v24 = vadd.f32 %v7043_v55, %v3214_v17 }
 0x829   : > { %v3344_v50 = vsel %vm3322_vm8, %v7074_v25, -inf }
 0x82a   : > { %v3338_v21 = vsel %vm3322_vm8, %v7079_v24, -inf }
 0x82c   : > { %3336 = vmax.xlane.f32.xlu1 %v3335_v5 }
 0x830   : > { %3345 = vmax.xlane.f32.xlu1 %v3344_v50 }
 0x831   : > { %v4271_v58 = vpop.f32.mrb[28].mxu1 }
 0x832   : > { %v7084_v19 = vadd.f32 %v4271_v58, %v7043_v55  ;;  %v3227_v31 = vpop.f32.mrb[29].mxu1 }
 0x833   : > { %v7087_v22 = vadd.f32 %v7043_v55, %v3227_v31  ;;  %v4272_v45 = vpop.f32.mrb[30].mxu1 }
 0x834   : > { %v3230_v44 = vpop.f32.mrb[31].mxu1  ;;  %v3353_v49 = vsel %vm3322_vm8, %v7084_v19, -inf  ;;  %3339 = vmax.xlane.f32.xlu1 %v3338_v21  ;;  %v7094_v1 = vadd.f32 %v4272_v45, %v7043_v55 }
 0x835   : > { %3354 = vmax.xlane.f32.xlu0 %v3353_v49  ;;  %v3347_v15 = vsel %vm3322_vm8, %v7087_v22, -inf  ;;  %v7099_v52 = vadd.f32 %v7043_v55, %v3230_v44 }
 0x836   : > { %v3356_v14 = vsel %vm3322_vm8, %v7094_v1, -inf }
 0x837   : > { %v3350_v8 = vsel %vm3322_vm8, %v7099_v52, -inf }
 0x838   : > { %3348 = vmax.xlane.f32.xlu1 %v3347_v15 }
 0x83c   : > { %3357 = vmax.xlane.f32.xlu1 %v3356_v14 }
 0x83d   : > { %v4275_v53 = vpop.f32.mrb[32].mxu1 }
 0x83e   : > { %v7104_v37 = vadd.f32 %v4275_v53, %v7043_v55  ;;  %v3243_v61 = vpop.f32.mrb[33].mxu1 }
 0x83f   : > { %v4276_v29 = vpop.f32.mrb[34].mxu1  ;;  %v7109_v7 = vadd.f32 %v7043_v55, %v3243_v61 }
 0x840   : > { %v7112_v38 = vadd.f32 %v4276_v29, %v7043_v55  ;;  %v3246_v16 = vpop.f32.mrb[35].mxu1  ;;  %v3365_v11 = vsel %vm3322_vm8, %v7104_v37, -inf  ;;  %3351 = vmax.xlane.f32.xlu1 %v3350_v8 }
 0x841   : > { %3366 = vmax.xlane.f32.xlu0 %v3365_v11  ;;  %v7117_v18 = vadd.f32 %v7043_v55, %v3246_v16  ;;  %v3359_v40 = vsel %vm3322_vm8, %v7109_v7, -inf }
 0x842   : > { %v3368_v35 = vsel %vm3322_vm8, %v7112_v38, -inf }
 0x843   : > { %v3362_v46 = vsel %vm3322_vm8, %v7117_v18, -inf }
 0x844   : > { %3369 = vmax.xlane.f32.xlu1 %v3368_v35 }
 0x845   : > { %v4279_v54 = vpop.f32.mrb[36].mxu1  ;;  %3360 = vmax.xlane.f32.xlu0 %v3359_v40 }
 0x846   : > { %v7124_v42 = vadd.f32 %v4279_v54, %v7043_v55  ;;  %v3259_v20 = vpop.f32.mrb[37].mxu1 }
 0x847   : > { %v4280_v0 = vpop.f32.mrb[38].mxu1  ;;  %v7129_v41 = vadd.f32 %v7043_v55, %v3259_v20 }
 0x848   : > { %v7132_v48 = vadd.f32 %v4280_v0, %v7043_v55  ;;  %v3262_v62 = vpop.f32.mrb[39].mxu1  ;;  %v3377_v33 = vsel %vm3322_vm8, %v7124_v42, -inf  ;;  %3363 = vmax.xlane.f32.xlu1 %v3362_v46 }
 0x849   : > { %3378 = vmax.xlane.f32.xlu0 %v3377_v33  ;;  %v7137_v9 = vadd.f32 %v7043_v55, %v3262_v62  ;;  %v3371_v51 = vsel %vm3322_vm8, %v7129_v41, -inf }
 0x84a   : > { %v3380_v56 = vsel %vm3322_vm8, %v7132_v48, -inf }
 0x84b   : > { %v3374_v36 = vsel %vm3322_vm8, %v7137_v9, -inf }
 0x84c   : > { %3381 = vmax.xlane.f32.xlu1 %v3380_v56 }
 0x84d   : > { %v4283_v43 = vpop.f32.mrb[40].mxu1  ;;  %3372 = vmax.xlane.f32.xlu0 %v3371_v51 }
 0x84e   : > { %v7144_v6 = vadd.f32 %v4283_v43, %v7043_v55  ;;  %v3275_v59 = vpop.f32.mrb[41].mxu1 }
 0x84f   : > { %v4284_v60 = vpop.f32.mrb[42].mxu1  ;;  %v7149_v30 = vadd.f32 %v7043_v55, %v3275_v59 }
 0x850   : > { %v7152_v2 = vadd.f32 %v4284_v60, %v7043_v55  ;;  %v3278_v47 = vpop.f32.mrb[43].mxu1  ;;  %v3389_v4 = vsel %vm3322_vm8, %v7144_v6, -inf  ;;  %3375 = vmax.xlane.f32.xlu1 %v3374_v36 }
 0x851   : > { %3390 = vmax.xlane.f32.xlu0 %v3389_v4  ;;  %v7157_v57 = vadd.f32 %v7043_v55, %v3278_v47  ;;  %v3383_v27 = vsel %vm3322_vm8, %v7149_v30, -inf }
 0x852   : > { %v3392_v13 = vsel %vm3322_vm8, %v7152_v2, -inf }
 0x853   : > { %v3386_v3 = vsel %vm3322_vm8, %v7157_v57, -inf }
 0x854   : > { %3393 = vmax.xlane.f32.xlu1 %v3392_v13 }
 0x855   : > { %v4287_v12 = vpop.f32.mrb[44].mxu1  ;;  %3384 = vmax.xlane.f32.xlu0 %v3383_v27 }
 0x856   : > { %v7164_v32 = vadd.f32 %v4287_v12, %v7043_v55  ;;  %v3291_v63 = vpop.f32.mrb[45].mxu1 }
 0x857   : > { %v4288_v17 = vpop.f32.mrb[46].mxu1  ;;  %v7169_v5 = vadd.f32 %v7043_v55, %v3291_v63 }
 0x858   : > { %v7172_v50 = vadd.f32 %v4288_v17, %v7043_v55  ;;  %v3294_v58 = vpop.f32.mrb[47].mxu1  ;;  %v3401_v31 = vsel %vm3322_vm8, %v7164_v32, -inf  ;;  %3387 = vmax.xlane.f32.xlu1 %v3386_v3 }
 0x859   : > { %3402 = vmax.xlane.f32.xlu0 %v3401_v31  ;;  %v7177_v45 = vadd.f32 %v7043_v55, %v3294_v58  ;;  %v3395_v44 = vsel %vm3322_vm8, %v7169_v5, -inf }
 0x85a   : > { %v3404_v21 = vsel %vm3322_vm8, %v7172_v50, -inf }
 0x85b   : > { %v3398_v61 = vsel %vm3322_vm8, %v7177_v45, -inf }
 0x85c   : > { %3405 = vmax.xlane.f32.xlu1 %v3404_v21 }
 0x85d   : > { %v4291_v49 = vpop.f32.mrb[48].mxu1  ;;  %3396 = vmax.xlane.f32.xlu0 %v3395_v44 }
 0x85e   : > { %v3307_v15 = vpop.f32.mrb[49].mxu1  ;;  %v7189_v8 = vadd.f32 %v4291_v49, %v7043_v55 }
 0x85f   : > { %v7184_v14 = vadd.f32 %v7043_v55, %v3307_v15  ;;  %v4292_v53 = vpop.f32.mrb[50].mxu1 }
 0x860   : > { %v3310_v29 = vpop.f32.mrb[51].mxu1  ;;  %3399 = vmax.xlane.f32.xlu1 %v3398_v61  ;;  %v7197_v35 = vadd.f32 %v4292_v53, %v7043_v55  ;;  %v3413_v54 = vsel %vm3322_vm8, %v7189_v8, -inf }
 0x861   : > { %v7192_v16 = vadd.f32 %v7043_v55, %v3310_v29  ;;  %v3407_v11 = vsel %vm3322_vm8, %v7184_v14, -inf }
 0x862   : > { %3408 = vmax.xlane.f32.xlu0 %v3407_v11  ;;  %v3416_v20 = vsel %vm3322_vm8, %v7197_v35, -inf }
 0x863   : > { %v3410_v40 = vsel %vm3322_vm8, %v7192_v16, -inf }
 0x864   : > { %3411 = vmax.xlane.f32.xlu1 %v3410_v40 }
 0x866   : > { %3414 = vmax.xlane.f32.xlu0 %v3413_v54 }
 0x868   : > { %3417 = vmax.xlane.f32.xlu1 %v3416_v20 }
 0x89d   : > { %v3331_v0 = vpop.xlane.xlu1 %3330 }
 0x89e   : > { %v7206_v46 = vsub.f32 %v7046_v10, %v3331_v0  ;;  %v3325_v62 = vpop.xlane.xlu0 %3324 }
 0x89f   : > { %v7209_v55 = vsub.f32 %v7049_v26, %v3325_v62 }
 0x8a0   : > { %v3455_v33 = vmul.f32 1.442695, %v7206_v46 }
 0x8a1   : > { %v3451_v56 = vmul.f32 1.442695, %v7209_v55  ;;  %v3334_v51 = vpop.xlane.xlu1 %3333 }
 0x8a2   : > { %4816 = vpow2.f32 %v3455_v33  ;;  %v7214_v43 = vsub.f32 %v7052_v39, %v3334_v51 }
 0x8a3   : > { %4818 = vpow2.f32 %v3451_v56 }
 0x8a4   : > { %v3457_v59 = vmul.f32 1.442695, %v7214_v43 }
 0x8a5   : > { %v3328_v60 = vpop.xlane.xlu1 %3327 }
 0x8a6   : > { %4820 = vpow2.f32 %v3457_v59  ;;  %v7218_v10 = vsub.f32 %v7059_v23, %v3328_v60 }
 0x8a8   : > { %v3453_v26 = vmul.f32 1.442695, %v7218_v10 }
 0x8aa   : > { %4822 = vpow2.f32 %v3453_v26 }
 0x8ac   : > { %v4817_v36 = vpop.eup %4816 }
 0x8ad   : > { %v3521_v47 = vsel %vm3322_vm8, %v4817_v36, 0.0  ;;  %v4819_v4 = vpop.eup %4818 }
 0x8ae   : > { %3522 = vadd.xlane.f32.xlu0 %v3521_v47  ;;  %v3515_v27 = vsel %vm3322_vm8, %v4819_v4, 0.0 }
 0x8b0   : > { %v4821_v13 = vpop.eup %4820 }
 0x8b1   : > { %v3524_v39 = vsel %vm3322_vm8, %v4821_v13, 0.0 }
 0x8b2   : > { %3525 = vadd.xlane.f32.xlu1 %v3524_v39  ;;  %3516 = vadd.xlane.f32.xlu0 %v3515_v27 }
 0x8b4   : > { %v4823_v12 = vpop.eup %4822 }
 0x8b5   : > { %v3343_v63 = vpop.xlane.xlu1 %3342  ;;  %v3518_v23 = vsel %vm3322_vm8, %v4823_v12, 0.0 }
 0x8b6   : > { %v7226_v17 = vsub.f32 %v7066_v28, %v3343_v63  ;;  %3519 = vadd.xlane.f32.xlu1 %v3518_v23 }
 0x8b8   : > { %v3463_v3 = vmul.f32 1.442695, %v7226_v17 }
 0x8b9   : > { %v3337_v58 = vpop.xlane.xlu1 %3336 }
 0x8ba   : > { %4824 = vpow2.f32 %v3463_v3  ;;  %v7230_v31 = vsub.f32 %v7069_v34, %v3337_v58 }
 0x8bc   : > { %v3459_v21 = vmul.f32 1.442695, %v7230_v31 }
 0x8bd   : > { %v3346_v44 = vpop.xlane.xlu1 %3345 }
 0x8be   : > { %4826 = vpow2.f32 %v3459_v21  ;;  %v7234_v49 = vsub.f32 %v7074_v25, %v3346_v44 }
 0x8c0   : > { %v3465_v15 = vmul.f32 1.442695, %v7234_v49 }
 0x8c1   : > { %v3340_v53 = vpop.xlane.xlu1 %3339 }
 0x8c2   : > { %v3355_v28 = vpop.xlane.xlu0 %3354  ;;  %4828 = vpow2.f32 %v3465_v15  ;;  %v7238_v61 = vsub.f32 %v7079_v24, %v3340_v53 }
 0x8c3   : > { %v7241_v29 = vsub.f32 %v7084_v19, %v3355_v28 }
 0x8c4   : > { %v4825_v34 = vpop.eup %4824  ;;  %v3461_v11 = vmul.f32 1.442695, %v7238_v61 }
 0x8c5   : > { %v3471_v40 = vmul.f32 1.442695, %v7241_v29  ;;  %v3349_v54 = vpop.xlane.xlu1 %3348  ;;  %v3533_v25 = vsel %vm3322_vm8, %v4825_v34, 0.0 }
 0x8c6   : > { %4830 = vpow2.f32 %v3461_v11  ;;  %v7247_v20 = vsub.f32 %v7087_v22, %v3349_v54  ;;  %3534 = vadd.xlane.f32.xlu0 %v3533_v25 }
 0x8c7   : > { %4832 = vpow2.f32 %v3471_v40 }
 0x8c8   : > { %v4827_v0 = vpop.eup %4826  ;;  %v3467_v24 = vmul.f32 1.442695, %v7247_v20 }
 0x8c9   : > { %v3358_v62 = vpop.xlane.xlu1 %3357  ;;  %v3527_v19 = vsel %vm3322_vm8, %v4827_v0, 0.0 }
 0x8ca   : > { %4834 = vpow2.f32 %v3467_v24  ;;  %v7252_v33 = vsub.f32 %v7094_v1, %v3358_v62  ;;  %3528 = vadd.xlane.f32.xlu0 %v3527_v19 }
 0x8cc   : > { %v4829_v56 = vpop.eup %4828  ;;  %v3473_v51 = vmul.f32 1.442695, %v7252_v33 }
 0x8cd   : > { %v3352_v59 = vpop.xlane.xlu1 %3351  ;;  %v3536_v22 = vsel %vm3322_vm8, %v4829_v56, 0.0 }
 0x8ce   : > { %v3367_v60 = vpop.xlane.xlu0 %3366  ;;  %4836 = vpow2.f32 %v3473_v51  ;;  %v7257_v26 = vsub.f32 %v7099_v52, %v3352_v59  ;;  %3537 = vadd.xlane.f32.xlu1 %v3536_v22 }
 0x8cf   : > { %v7260_v36 = vsub.f32 %v7104_v37, %v3367_v60 }
 0x8d0   : > { %v4831_v47 = vpop.eup %4830  ;;  %v3469_v1 = vmul.f32 1.442695, %v7257_v26 }
 0x8d1   : > { %v4833_v4 = vpop.eup %4832  ;;  %v3479_v13 = vmul.f32 1.442695, %v7260_v36  ;;  %v3370_v39 = vpop.xlane.xlu1 %3369  ;;  %v3530_v27 = vsel %vm3322_vm8, %v4831_v47, 0.0 }
 0x8d2   : > { %v3361_v12 = vpop.xlane.xlu0 %3360  ;;  %4838 = vpow2.f32 %v3469_v1  ;;  %v3545_v63 = vsel %vm3322_vm8, %v4833_v4, 0.0  ;;  %v7267_v52 = vsub.f32 %v7112_v38, %v3370_v39  ;;  %3531 = vadd.xlane.f32.xlu1 %v3530_v27 }
 0x8d3   : > { %4840 = vpow2.f32 %v3479_v13  ;;  %v7270_v37 = vsub.f32 %v7109_v7, %v3361_v12  ;;  %3546 = vadd.xlane.f32.xlu0 %v3545_v63 }
 0x8d4   : > { %v4835_v23 = vpop.eup %4834  ;;  %v3481_v3 = vmul.f32 1.442695, %v7267_v52 }
 0x8d5   : > { %v3475_v58 = vmul.f32 1.442695, %v7270_v37  ;;  %v3364_v21 = vpop.xlane.xlu1 %3363  ;;  %v3539_v44 = vsel %vm3322_vm8, %v4835_v23, 0.0 }
 0x8d6   : > { %v3379_v15 = vpop.xlane.xlu0 %3378  ;;  %4842 = vpow2.f32 %v3481_v3  ;;  %v7276_v53 = vsub.f32 %v7117_v18, %v3364_v21 }
 0x8d7   : > { %4844 = vpow2.f32 %v3475_v58  ;;  %v7279_v38 = vsub.f32 %v7124_v42, %v3379_v15  ;;  %3540 = vadd.xlane.f32.xlu0 %v3539_v44 }
 0x8d8   : > { %v4837_v7 = vpop.eup %4836  ;;  %v3477_v28 = vmul.f32 1.442695, %v7276_v53 }
 0x8d9   : > { %v3487_v34 = vmul.f32 1.442695, %v7279_v38  ;;  %v3382_v11 = vpop.xlane.xlu1 %3381  ;;  %v3548_v40 = vsel %vm3322_vm8, %v4837_v7, 0.0 }
 0x8da   : > { %v3373_v54 = vpop.xlane.xlu0 %3372  ;;  %4846 = vpow2.f32 %v3477_v28  ;;  %v7285_v25 = vsub.f32 %v7132_v48, %v3382_v11  ;;  %3549 = vadd.xlane.f32.xlu1 %v3548_v40 }
 0x8db   : > { %4848 = vpow2.f32 %v3487_v34  ;;  %v7288_v18 = vsub.f32 %v7129_v41, %v3373_v54 }
 0x8dc   : > { %v4839_v42 = vpop.eup %4838  ;;  %v3489_v0 = vmul.f32 1.442695, %v7285_v25 }
 0x8dd   : > { %v4841_v24 = vpop.eup %4840  ;;  %v3483_v62 = vmul.f32 1.442695, %v7288_v18  ;;  %v3376_v19 = vpop.xlane.xlu1 %3375  ;;  %v3542_v56 = vsel %vm3322_vm8, %v4839_v42, 0.0 }
 0x8de   : > { %v3391_v51 = vpop.xlane.xlu0 %3390  ;;  %4850 = vpow2.f32 %v3489_v0  ;;  %v3557_v59 = vsel %vm3322_vm8, %v4841_v24, 0.0  ;;  %v7295_v48 = vsub.f32 %v7137_v9, %v3376_v19  ;;  %3543 = vadd.xlane.f32.xlu1 %v3542_v56 }
 0x8df   : > { %4852 = vpow2.f32 %v3483_v62  ;;  %v7298_v41 = vsub.f32 %v7144_v6, %v3391_v51  ;;  %3558 = vadd.xlane.f32.xlu0 %v3557_v59 }
 0x8e0   : > { %v4843_v22 = vpop.eup %4842  ;;  %v3485_v60 = vmul.f32 1.442695, %v7295_v48 }
 0x8e1   : > { %v4845_v47 = vpop.eup %4844  ;;  %v3495_v1 = vmul.f32 1.442695, %v7298_v41  ;;  %v3394_v4 = vpop.xlane.xlu1 %3393  ;;  %v3560_v13 = vsel %vm3322_vm8, %v4843_v22, 0.0 }
 0x8e2   : > { %v3385_v39 = vpop.xlane.xlu0 %3384  ;;  %4854 = vpow2.f32 %v3485_v60  ;;  %v3551_v9 = vsel %vm3322_vm8, %v4845_v47, 0.0  ;;  %v7305_v27 = vsub.f32 %v7152_v2, %v3394_v4  ;;  %3561 = vadd.xlane.f32.xlu1 %v3560_v13 }
 0x8e3   : > { %4856 = vpow2.f32 %v3495_v1  ;;  %v7308_v6 = vsub.f32 %v7149_v30, %v3385_v39  ;;  %3552 = vadd.xlane.f32.xlu0 %v3551_v9 }
 0x8e4   : > { %v4847_v12 = vpop.eup %4846  ;;  %v3497_v63 = vmul.f32 1.442695, %v7305_v27 }
 0x8e5   : > { %v4849_v23 = vpop.eup %4848  ;;  %v3491_v3 = vmul.f32 1.442695, %v7308_v6  ;;  %v3388_v58 = vpop.xlane.xlu1 %3387  ;;  %v3554_v21 = vsel %vm3322_vm8, %v4847_v12, 0.0 }
 0x8e6   : > { %v3403_v44 = vpop.xlane.xlu0 %3402  ;;  %4858 = vpow2.f32 %v3497_v63  ;;  %v3569_v2 = vsel %vm3322_vm8, %v4849_v23, 0.0  ;;  %v7315_v15 = vsub.f32 %v7157_v57, %v3388_v58  ;;  %3555 = vadd.xlane.f32.xlu1 %v3554_v21 }
 0x8e7   : > { %4860 = vpow2.f32 %v3491_v3  ;;  %v7318_v30 = vsub.f32 %v7164_v32, %v3403_v44  ;;  %3570 = vadd.xlane.f32.xlu0 %v3569_v2 }
 0x8e8   : > { %v4851_v7 = vpop.eup %4850  ;;  %v3493_v28 = vmul.f32 1.442695, %v7315_v15 }
 0x8e9   : > { %v4853_v34 = vpop.eup %4852  ;;  %v3503_v11 = vmul.f32 1.442695, %v7318_v30  ;;  %v3406_v40 = vpop.xlane.xlu1 %3405  ;;  %v3572_v54 = vsel %vm3322_vm8, %v4851_v7, 0.0 }
 0x8ea   : > { %v3397_v42 = vpop.xlane.xlu0 %3396  ;;  %4862 = vpow2.f32 %v3493_v28  ;;  %v3563_v57 = vsel %vm3322_vm8, %v4853_v34, 0.0  ;;  %v7325_v0 = vsub.f32 %v7172_v50, %v3406_v40  ;;  %3573 = vadd.xlane.f32.xlu1 %v3572_v54 }
 0x8eb   : > { %4864 = vpow2.f32 %v3503_v11  ;;  %v7328_v32 = vsub.f32 %v7169_v5, %v3397_v42  ;;  %3564 = vadd.xlane.f32.xlu0 %v3563_v57 }
 0x8ec   : > { %v4855_v24 = vpop.eup %4854  ;;  %v3505_v62 = vmul.f32 1.442695, %v7325_v0 }
 0x8ed   : > { %v4857_v19 = vpop.eup %4856  ;;  %v3499_v56 = vmul.f32 1.442695, %v7328_v32  ;;  %v3400_v51 = vpop.xlane.xlu1 %3399  ;;  %v3566_v59 = vsel %vm3322_vm8, %v4855_v24, 0.0 }
 0x8ee   : > { %4866 = vpow2.f32 %v3505_v62  ;;  %v3581_v22 = vsel %vm3322_vm8, %v4857_v19, 0.0  ;;  %v7335_v50 = vsub.f32 %v7177_v45, %v3400_v51  ;;  %3567 = vadd.xlane.f32.xlu1 %v3566_v59 }
 0x8ef   : > { %4868 = vpow2.f32 %v3499_v56  ;;  %v3409_v5 = vpop.xlane.xlu0 %3408  ;;  %3582 = vadd.xlane.f32.xlu0 %v3581_v22 }
 0x8f0   : > { %v4859_v60 = vpop.eup %4858  ;;  %v7338_v47 = vsub.f32 %v7184_v14, %v3409_v5  ;;  %v3501_v1 = vmul.f32 1.442695, %v7335_v50 }
 0x8f1   : > { %v4861_v4 = vpop.eup %4860  ;;  %v3412_v13 = vpop.xlane.xlu1 %3411  ;;  %v3584_v39 = vsel %vm3322_vm8, %v4859_v60, 0.0 }
 0x8f2   : > { %v3507_v9 = vmul.f32 1.442695, %v7338_v47  ;;  %4870 = vpow2.f32 %v3501_v1  ;;  %v3575_v45 = vsel %vm3322_vm8, %v4861_v4, 0.0  ;;  %v7345_v12 = vsub.f32 %v7192_v16, %v3412_v13  ;;  %3585 = vadd.xlane.f32.xlu1 %v3584_v39 }
 0x8f3   : > { %v3415_v63 = vpop.xlane.xlu0 %3414  ;;  %3576 = vadd.xlane.f32.xlu0 %v3575_v45 }
 0x8f4   : > { %v4863_v23 = vpop.eup %4862  ;;  %4872 = vpow2.f32 %v3507_v9  ;;  %v7348_v14 = vsub.f32 %v7189_v8, %v3415_v63  ;;  %v3509_v3 = vmul.f32 1.442695, %v7345_v12 }
 0x8f5   : > { %v4865_v58 = vpop.eup %4864  ;;  %v3418_v21 = vpop.xlane.xlu1 %3417  ;;  %v3578_v44 = vsel %vm3322_vm8, %v4863_v23, 0.0 }
 0x8f6   : > { %v3511_v2 = vmul.f32 1.442695, %v7348_v14  ;;  %4874 = vpow2.f32 %v3509_v3  ;;  %v3593_v16 = vsel %vm3322_vm8, %v4865_v58, 0.0  ;;  %v7355_v7 = vsub.f32 %v7197_v35, %v3418_v21  ;;  %3579 = vadd.xlane.f32.xlu1 %v3578_v44 }
 0x8f7   : > { %3594 = vadd.xlane.f32.xlu0 %v3593_v16 }
 0x8f8   : > { %v4867_v28 = vpop.eup %4866  ;;  %4876 = vpow2.f32 %v3511_v2  ;;  %v3513_v8 = vmul.f32 1.442695, %v7355_v7 }
 0x8f9   : > { %v4869_v34 = vpop.eup %4868  ;;  %v3596_v11 = vsel %vm3322_vm8, %v4867_v28, 0.0 }
 0x8fa   : > { %4878 = vpow2.f32 %v3513_v8  ;;  %v3587_v40 = vsel %vm3322_vm8, %v4869_v34, 0.0  ;;  %3597 = vadd.xlane.f32.xlu1 %v3596_v11 }
 0x8fb   : > { %3588 = vadd.xlane.f32.xlu0 %v3587_v40 }
 0x8fc   : > { %v4871_v54 = vpop.eup %4870 }
 0x8fd   : > { %v3590_v42 = vsel %vm3322_vm8, %v4871_v54, 0.0 }
 0x8fe   : > { %v4873_v57 = vpop.eup %4872  ;;  %3591 = vadd.xlane.f32.xlu1 %v3590_v42 }
 0x8ff   : > { %v3599_v35 = vsel %vm3322_vm8, %v4873_v57, 0.0 }
 0x900   : > { %v4875_v24 = vpop.eup %4874  ;;  %3600 = vadd.xlane.f32.xlu0 %v3599_v35 }
 0x901   : > { %v3602_v62 = vsel %vm3322_vm8, %v4875_v24, 0.0 }
 0x902   : > { %v4877_v19 = vpop.eup %4876  ;;  %3603 = vadd.xlane.f32.xlu1 %v3602_v62 }
 0x903   : > { %v3605_v56 = vsel %vm3322_vm8, %v4877_v19, 0.0 }
 0x904   : > { %v4879_v51 = vpop.eup %4878  ;;  %3606 = vadd.xlane.f32.xlu0 %v3605_v56 }
 0x905   : > { %v3608_v59 = vsel %vm3322_vm8, %v4879_v51, 0.0 }
 0x906   : > { %3609 = vadd.xlane.f32.xlu1 %v3608_v59 }
 0x93b   : > { %v3523_v22 = vpop.xlane.xlu0 %3522 }
 0x93c   : > { %4880 = vlog2.f32 %v3523_v22 }
 0x93f   : > { %v3526_v5 = vpop.xlane.xlu1 %3525  ;;  %v3517_v60 = vpop.xlane.xlu0 %3516 }
 0x940   : > { %4882 = vlog2.f32 %v3526_v5 }
 0x941   : > { %4884 = vlog2.f32 %v3517_v60 }
 0x943   : > { %v3520_v1 = vpop.xlane.xlu1 %3519 }
 0x944   : > { %4886 = vlog2.f32 %v3520_v1 }
 0x946   : > { %v4881_v4 = vpop.eup %4880 }
 0x947   : > { %v3616_v13 = vmul.f32 0.6931472, %v4881_v4 }
 0x949   : > { %v3677_v39 = vsub.f32 %v7206_v46, %v3616_v13 }
 0x94a   : > { %v4883_v9 = vpop.eup %4882 }
 0x94b   : > { %v4885_v45 = vpop.eup %4884  ;;  %3709 = vst.msk [vmem:[%s5464_s3 + $0x10] sm:$0xff] %vm3322_vm8, %v3677_v39  ;;  %v3618_v63 = vmul.f32 0.6931472, %v4883_v9 }
 0x94c   : > { %v3612_v23 = vmul.f32 0.6931472, %v4885_v45 }
 0x94d   : > { %v3678_v3 = vsub.f32 %v7214_v43, %v3618_v63 }
 0x94e   : > { %v4887_v58 = vpop.eup %4886  ;;  %v3675_v21 = vsub.f32 %v7209_v55, %v3612_v23 }
 0x94f   : > { %3710 = vst.msk [vmem:[%s5464_s3 + $0x18] sm:$0xff] %vm3322_vm8, %v3678_v3  ;;  %v3614_v44 = vmul.f32 0.6931472, %v4887_v58 }
 0x950   : > { %3707 = vst.msk [vmem:[%s5464_s3] sm:$0xff] %vm3322_vm8, %v3675_v21 }
 0x951   : > { %v3676_v2 = vsub.f32 %v7218_v10, %v3614_v44 }
 0x953   : > { %3708 = vst.msk [vmem:[%s5464_s3 + $0x8] sm:$0xff] %vm3322_vm8, %v3676_v2  ;;  %v3535_v46 = vpop.xlane.xlu0 %3534 }
 0x954   : > { %4888 = vlog2.f32 %v3535_v46 }
 0x957   : > { %v3529_v16 = vpop.xlane.xlu0 %3528 }
 0x958   : > { %4890 = vlog2.f32 %v3529_v16 }
 0x95b   : > { %v3538_v28 = vpop.xlane.xlu1 %3537 }
 0x95c   : > { %4892 = vlog2.f32 %v3538_v28 }
 0x95e   : > { %v4889_v43 = vpop.eup %4888 }
 0x95f   : > { %v3624_v8 = vmul.f32 0.6931472, %v4889_v43  ;;  %v3532_v55 = vpop.xlane.xlu1 %3531 }
 0x960   : > { %v3547_v34 = vpop.xlane.xlu0 %3546  ;;  %4894 = vlog2.f32 %v3532_v55 }
 0x961   : > { %v3681_v11 = vsub.f32 %v7226_v17, %v3624_v8  ;;  %4896 = vlog2.f32 %v3547_v34 }
 0x962   : > { %v4891_v10 = vpop.eup %4890 }
 0x963   : > { %3713 = vst.msk [vmem:[%s5464_s3 + $0x30] sm:$0xff] %vm3322_vm8, %v3681_v11  ;;  %v3620_v40 = vmul.f32 0.6931472, %v4891_v10 }
 0x964   : > { %v3541_v54 = vpop.xlane.xlu0 %3540 }
 0x965   : > { %v3679_v42 = vsub.f32 %v7230_v31, %v3620_v40  ;;  %4898 = vlog2.f32 %v3541_v54 }
 0x966   : > { %v4893_v57 = vpop.eup %4892 }
 0x967   : > { %3711 = vst.msk [vmem:[%s5464_s3 + $0x20] sm:$0xff] %vm3322_vm8, %v3679_v42  ;;  %v3626_v35 = vmul.f32 0.6931472, %v4893_v57  ;;  %v3550_v24 = vpop.xlane.xlu1 %3549 }
 0x968   : > { %4900 = vlog2.f32 %v3550_v24 }
 0x969   : > { %v3682_v17 = vsub.f32 %v7234_v49, %v3626_v35 }
 0x96a   : > { %v4895_v62 = vpop.eup %4894 }
 0x96b   : > { %v4897_v19 = vpop.eup %4896  ;;  %3714 = vst.msk [vmem:[%s5464_s3 + $0x38] sm:$0xff] %vm3322_vm8, %v3682_v17  ;;  %v3622_v56 = vmul.f32 0.6931472, %v4895_v62  ;;  %v3544_v51 = vpop.xlane.xlu1 %3543 }
 0x96c   : > { %v3632_v59 = vmul.f32 0.6931472, %v4897_v19  ;;  %v3559_v22 = vpop.xlane.xlu0 %3558  ;;  %4902 = vlog2.f32 %v3544_v51 }
 0x96d   : > { %v3680_v31 = vsub.f32 %v7238_v61, %v3622_v56  ;;  %4904 = vlog2.f32 %v3559_v22 }
 0x96e   : > { %v3685_v5 = vsub.f32 %v7241_v29, %v3632_v59 }
 0x96f   : > { %v4899_v60 = vpop.eup %4898  ;;  %3712 = vst.msk [vmem:[%s5464_s3 + $0x28] sm:$0xff] %vm3322_vm8, %v3680_v31  ;;  %v3562_v1 = vpop.xlane.xlu1 %3561 }
 0x970   : > { %3717 = vst.msk [vmem:[%s5464_s3 + $0x50] sm:$0xff] %vm3322_vm8, %v3685_v5  ;;  %v3628_v49 = vmul.f32 0.6931472, %v4899_v60  ;;  %v3553_v4 = vpop.xlane.xlu0 %3552  ;;  %4906 = vlog2.f32 %v3562_v1 }
 0x971   : > { %4908 = vlog2.f32 %v3553_v4 }
 0x972   : > { %v4901_v13 = vpop.eup %4900  ;;  %v3683_v39 = vsub.f32 %v7247_v20, %v3628_v49 }
 0x973   : > { %v3634_v9 = vmul.f32 0.6931472, %v4901_v13  ;;  %v3556_v45 = vpop.xlane.xlu1 %3555 }
 0x974   : > { %3715 = vst.msk [vmem:[%s5464_s3 + $0x40] sm:$0xff] %vm3322_vm8, %v3683_v39  ;;  %v3571_v61 = vpop.xlane.xlu0 %3570  ;;  %4910 = vlog2.f32 %v3556_v45 }
 0x975   : > { %v3686_v29 = vsub.f32 %v7252_v33, %v3634_v9  ;;  %4912 = vlog2.f32 %v3571_v61 }
 0x976   : > { %v4903_v63 = vpop.eup %4902 }
 0x977   : > { %v4905_v23 = vpop.eup %4904  ;;  %3718 = vst.msk [vmem:[%s5464_s3 + $0x58] sm:$0xff] %vm3322_vm8, %v3686_v29  ;;  %v3630_v3 = vmul.f32 0.6931472, %v4903_v63  ;;  %v3574_v58 = vpop.xlane.xlu1 %3573 }
 0x978   : > { %v3640_v21 = vmul.f32 0.6931472, %v4905_v23  ;;  %v3565_v44 = vpop.xlane.xlu0 %3564  ;;  %4914 = vlog2.f32 %v3574_v58 }
 0x979   : > { %v3684_v20 = vsub.f32 %v7257_v26, %v3630_v3  ;;  %4916 = vlog2.f32 %v3565_v44 }
 0x97a   : > { %v4907_v2 = vpop.eup %4906  ;;  %v3689_v46 = vsub.f32 %v7260_v36, %v3640_v21 }
 0x97b   : > { %v4909_v16 = vpop.eup %4908  ;;  %3716 = vst.msk [vmem:[%s5464_s3 + $0x48] sm:$0xff] %vm3322_vm8, %v3684_v20  ;;  %v3642_v33 = vmul.f32 0.6931472, %v4907_v2  ;;  %v3568_v28 = vpop.xlane.xlu1 %3567 }
 0x97c   : > { %3721 = vst.msk [vmem:[%s5464_s3 + $0x70] sm:$0xff] %vm3322_vm8, %v3689_v46  ;;  %v3636_v43 = vmul.f32 0.6931472, %v4909_v16  ;;  %v3583_v8 = vpop.xlane.xlu0 %3582  ;;  %4918 = vlog2.f32 %v3568_v28 }
 0x97d   : > { %v3690_v55 = vsub.f32 %v7267_v52, %v3642_v33  ;;  %4920 = vlog2.f32 %v3583_v8 }
 0x97e   : > { %v4911_v26 = vpop.eup %4910  ;;  %v3687_v34 = vsub.f32 %v7270_v37, %v3636_v43 }
 0x97f   : > { %v4913_v11 = vpop.eup %4912  ;;  %3722 = vst.msk [vmem:[%s5464_s3 + $0x78] sm:$0xff] %vm3322_vm8, %v3690_v55  ;;  %v3638_v36 = vmul.f32 0.6931472, %v4911_v26  ;;  %v3586_v10 = vpop.xlane.xlu1 %3585 }
 0x980   : > { %3719 = vst.msk [vmem:[%s5464_s3 + $0x60] sm:$0xff] %vm3322_vm8, %v3687_v34  ;;  %v3648_v40 = vmul.f32 0.6931472, %v4913_v11  ;;  %v3577_v54 = vpop.xlane.xlu0 %3576  ;;  %4922 = vlog2.f32 %v3586_v10 }
 0x981   : > { %v3688_v42 = vsub.f32 %v7276_v53, %v3638_v36  ;;  %4924 = vlog2.f32 %v3577_v54 }
 0x982   : > { %v4915_v52 = vpop.eup %4914  ;;  %v3693_v57 = vsub.f32 %v7279_v38, %v3648_v40 }
 0x983   : > { %v4917_v35 = vpop.eup %4916  ;;  %3720 = vst.msk [vmem:[%s5464_s3 + $0x68] sm:$0xff] %vm3322_vm8, %v3688_v42  ;;  %v3650_v37 = vmul.f32 0.6931472, %v4915_v52  ;;  %v3580_v24 = vpop.xlane.xlu1 %3579 }
 0x984   : > { %3725 = vst.msk [vmem:[%s5464_s3 + $0x90] sm:$0xff] %vm3322_vm8, %v3693_v57  ;;  %v3644_v17 = vmul.f32 0.6931472, %v4917_v35  ;;  %v3595_v62 = vpop.xlane.xlu0 %3594  ;;  %4926 = vlog2.f32 %v3580_v24 }
 0x985   : > { %v3694_v19 = vsub.f32 %v7285_v25, %v3650_v37  ;;  %4928 = vlog2.f32 %v3595_v62 }
 0x986   : > { %v4919_v53 = vpop.eup %4918  ;;  %v3691_v56 = vsub.f32 %v7288_v18, %v3644_v17 }
 0x987   : > { %v4921_v51 = vpop.eup %4920  ;;  %3726 = vst.msk [vmem:[%s5464_s3 + $0x98] sm:$0xff] %vm3322_vm8, %v3694_v19  ;;  %v3646_v38 = vmul.f32 0.6931472, %v4919_v53  ;;  %v3598_v59 = vpop.xlane.xlu1 %3597 }
 0x988   : > { %3723 = vst.msk [vmem:[%s5464_s3 + $0x80] sm:$0xff] %vm3322_vm8, %v3691_v56  ;;  %v3656_v22 = vmul.f32 0.6931472, %v4921_v51  ;;  %v3589_v31 = vpop.xlane.xlu0 %3588  ;;  %4930 = vlog2.f32 %v3598_v59 }
 0x989   : > { %v3692_v5 = vsub.f32 %v7295_v48, %v3646_v38  ;;  %4932 = vlog2.f32 %v3589_v31 }
 0x98a   : > { %v4923_v25 = vpop.eup %4922  ;;  %v3697_v60 = vsub.f32 %v7298_v41, %v3656_v22 }
 0x98b   : > { %v4925_v1 = vpop.eup %4924  ;;  %3724 = vst.msk [vmem:[%s5464_s3 + $0x88] sm:$0xff] %vm3322_vm8, %v3692_v5  ;;  %v3658_v18 = vmul.f32 0.6931472, %v4923_v25  ;;  %v3592_v49 = vpop.xlane.xlu1 %3591 }
 0x98c   : > { %3729 = vst.msk [vmem:[%s5464_s3 + $0xb0] sm:$0xff] %vm3322_vm8, %v3697_v60  ;;  %v3652_v4 = vmul.f32 0.6931472, %v4925_v1  ;;  %4934 = vlog2.f32 %v3592_v49 }
 0x98d   : > { %v3698_v13 = vsub.f32 %v7305_v27, %v3658_v18  ;;  %v3601_v39 = vpop.xlane.xlu0 %3600 }
 0x98e   : > { %v4927_v9 = vpop.eup %4926  ;;  %v3695_v48 = vsub.f32 %v7308_v6, %v3652_v4  ;;  %4936 = vlog2.f32 %v3601_v39 }
 0x98f   : > { %v4929_v45 = vpop.eup %4928  ;;  %3730 = vst.msk [vmem:[%s5464_s3 + $0xb8] sm:$0xff] %vm3322_vm8, %v3698_v13  ;;  %v3654_v41 = vmul.f32 0.6931472, %v4927_v9  ;;  %v3604_v61 = vpop.xlane.xlu1 %3603 }
 0x990   : > { %3727 = vst.msk [vmem:[%s5464_s3 + $0xa0] sm:$0xff] %vm3322_vm8, %v3695_v48  ;;  %v3664_v29 = vmul.f32 0.6931472, %v4929_v45  ;;  %4938 = vlog2.f32 %v3604_v61 }
 0x991   : > { %v3696_v63 = vsub.f32 %v7315_v15, %v3654_v41  ;;  %v3607_v27 = vpop.xlane.xlu0 %3606 }
 0x992   : > { %v4931_v23 = vpop.eup %4930  ;;  %v3701_v3 = vsub.f32 %v7318_v30, %v3664_v29  ;;  %4940 = vlog2.f32 %v3607_v27 }
 0x993   : > { %v4933_v6 = vpop.eup %4932  ;;  %3728 = vst.msk [vmem:[%s5464_s3 + $0xa8] sm:$0xff] %vm3322_vm8, %v3696_v63  ;;  %v3666_v58 = vmul.f32 0.6931472, %v4931_v23  ;;  %v3610_v21 = vpop.xlane.xlu1 %3609 }
 0x994   : > { %3733 = vst.msk [vmem:[%s5464_s3 + $0xd0] sm:$0xff] %vm3322_vm8, %v3701_v3  ;;  %v3660_v44 = vmul.f32 0.6931472, %v4933_v6  ;;  %4942 = vlog2.f32 %v3610_v21 }
 0x995   : > { %v3702_v20 = vsub.f32 %v7325_v0, %v3666_v58 }
 0x996   : > { %v4935_v15 = vpop.eup %4934  ;;  %v3699_v2 = vsub.f32 %v7328_v32, %v3660_v44 }
 0x997   : > { %3734 = vst.msk [vmem:[%s5464_s3 + $0xd8] sm:$0xff] %vm3322_vm8, %v3702_v20  ;;  %v3662_v30 = vmul.f32 0.6931472, %v4935_v15 }
 0x998   : > { %v4937_v46 = vpop.eup %4936  ;;  %3731 = vst.msk [vmem:[%s5464_s3 + $0xc0] sm:$0xff] %vm3322_vm8, %v3699_v2 }
 0x999   : > { %v3668_v16 = vmul.f32 0.6931472, %v4937_v46  ;;  %v3700_v33 = vsub.f32 %v7335_v50, %v3662_v30 }
 0x99a   : > { %v4939_v28 = vpop.eup %4938 }
 0x99b   : > { %v3703_v43 = vsub.f32 %v7338_v47, %v3668_v16  ;;  %3732 = vst.msk [vmem:[%s5464_s3 + $0xc8] sm:$0xff] %vm3322_vm8, %v3700_v33  ;;  %v3670_v0 = vmul.f32 0.6931472, %v4939_v28 }
 0x99c   : > { %v4941_v8 = vpop.eup %4940 }
 0x99d   : > { %3735 = vst.msk [vmem:[%s5464_s3 + $0xe0] sm:$0xff] %vm3322_vm8, %v3703_v43  ;;  %v3672_v32 = vmul.f32 0.6931472, %v4941_v8  ;;  %v3704_v55 = vsub.f32 %v7345_v12, %v3670_v0 }
 0x99e   : > { %v4943_v26 = vpop.eup %4942 }
 0x99f   : > { %v3705_v34 = vsub.f32 %v7348_v14, %v3672_v32  ;;  %3736 = vst.msk [vmem:[%s5464_s3 + $0xe8] sm:$0xff] %vm3322_vm8, %v3704_v55  ;;  %v3674_v11 = vmul.f32 0.6931472, %v4943_v26 }
 0x9a1   : > { %3737 = vst.msk [vmem:[%s5464_s3 + $0xf0] sm:$0xff] %vm3322_vm8, %v3705_v34  ;;  %v3706_v50 = vsub.f32 %v7355_v7, %v3674_v11 }
 0x9a3   : > { %3738 = vst.msk [vmem:[%s5464_s3 + $0xf8] sm:$0xff] %vm3322_vm8, %v3706_v50 }
 0x9a4 PF: > { %s30_s15 = sadd.s32 1, %s5138_s15   ;;  %s7542_s28 = sld [smem:[#allocation17_spill]] }
 0x9a5   : > { %p27_p12 = scmp.ge.s32.totalorder %s30_s15, 6   ;;  %s7543_s30 = sld [smem:[#allocation18_spill]] }
 0x9a6   : > { %s7544_s21 = sld [smem:[#allocation19_spill]]  ;;  %s7545_s25 = smov %s5114_s26 }
 0x9a7   : > { %s7546_s26 = smov %s5118_s27  ;;  %s7547_s27 = smov %s5375_s6 }
 0x9a8   : > { %s7548_s29 = smov %s5134_s14  ;;  %29 = sbr.rel (!%p27_p12) target bundleno = 19 (0x13), region = 151 }
 0x9ac   : > { %s7549_s14 = smov %s7544_s21 }
 0x9af   :  { %3772 = vsyncpa [#allocation7], 1 }
 0x9b0   :  { %3774 = vsyncpa [#allocation7 + $0x1], 1 }
 0x9b1   :  { %3775 = vsyncpa [#allocation9], 1 }
 0x9b2   :  { %3777 = vsyncpa [#allocation9 + $0x1], 1 }
 0x9b3   :  { %3778 = vsyncpa [#allocation12], 1 }

</bundles_post_ra>
